<compile_context>
chip_gen: v6e
topology: v6e:2x2x1
jax: 0.10.0
libtpu: 0.0.40
codegen_flags: <defaults>
</compile_context>

<pallas_src>
import numpy as np
import jax
import jax.numpy as jnp
from jax.experimental import pallas as pl
from jax.experimental.pallas import tpu as pltpu


# --------------------------- geometry constants -----------------------------
# fc1 expects 500 = 20*5*5 features, which forces a (B, 1, 32, 32) input.
_K = 5                      # conv kernel size
_H1, _W1 = 14, 14           # spatial after conv1 (28x28) + 2x2 maxpool
_S1 = _H1 * _W1             # 196 spatial positions of y1
_S1P = 200                  # padded to a multiple of 8 (sublane alignment)
_C1, _C1P = 10, 16          # conv1 out channels (padded)
_H2, _W2 = 5, 5             # spatial after conv2 (10x10) + 2x2 maxpool
_P2, _P2P = 25, 32          # pooled conv2 positions (padded to multiple of 8)
_C2, _C2P = 20, 32          # conv2 out channels (padded)
_F1, _F1P = 50, 64          # fc1 out features (padded)
_F2, _F2P = 5, 8            # fc2 out features (padded)
# rows of the conv2 "full grid" output we keep: covers positions (oh, ow) with
# oh, ow in [0, 10) laid out as oh*14 + ow  ->  max index 9*14 + 9 = 135.
_R2 = (2 * _H2 - 1) * _W1 + (2 * _W2 - 1) + 1          # 136 (multiple of 8)


def _build_pool_select():
    """Small constant 0/1 matrix implementing conv2's 2x2 maxpool gather:
    row q*32 + (ph*5+pw) selects conv2-output row (2ph+qi)*14 + (2pw+qj) of
    the (136, 32) conv2 slab, for quadrant q = qi*2 + qj."""
    m = np.zeros((4 * _P2P, _R2), dtype=np.float32)
    for qi in range(2):
        for qj in range(2):
            q = qi * 2 + qj
            for ph in range(_H2):
                for pw in range(_W2):
                    m[q * _P2P + ph * _W2 + pw,
                      (2 * ph + qi) * _W1 + (2 * pw + qj)] = 1.0
    return m


_POOL_SELECT = _build_pool_select()        # (128, 136)  ~70 KB, VMEM-resident


# ------------------------------- the kernel ---------------------------------

def mnist_cnn_kernel(p1_ref, w1_ref, b1_ref, w2_ref, b2_ref, psel_ref,
                     wf1_ref, bf1_ref, wf2_ref, bf2_ref, h_ref, r_ref, y1_ref):
    # ---- conv1 + 2x2 maxpool + ReLU -----------------------------------
    # One MXU matmul over all 4 pooling quadrants (stacked along rows), then
    # an aligned-row-slice VPU max; per-channel bias after the max is exact.
    s1 = jnp.dot(p1_ref[0], w1_ref[...], preferred_element_type=jnp.float32)  # (800, 16)
    y1 = s1[0:_S1P, :]
    for q in range(1, 4):
        y1 = jnp.maximum(y1, s1[q * _S1P:(q + 1) * _S1P, :])
    # Park y1 in VMEM scratch so conv2's im2col can re-read it at arbitrary
    # (hardware-addressable) row offsets instead of via a huge gather matmul.
    y1_ref[...] = jnp.maximum(y1 + b1_ref[...], 0.0)                           # (200, 16)

    # ---- conv2 (+ Dropout2d == identity) ------------------------------
    # im2col by 25 shifted 136-row window loads (offset kh*14+kw <= 60, so
    # every read stays inside the 196 valid rows), concatenated along lanes
    # -> one wide MXU matmul.  Row r = oh*14+ow of s2 is conv2(y1) at (oh,ow).
    patch = jnp.concatenate(
        [y1_ref[pl.ds(kh * _W1 + kw, _R2), :]
         for kh in range(_K) for kw in range(_K)],
        axis=1)                                                                 # (136, 400)
    s2 = jnp.dot(patch, w2_ref[...], preferred_element_type=jnp.float32)        # (136, 32)

    # ---- 2x2 maxpool + bias + ReLU -------------------------------------
    # Tiny 0/1 selection matmul gathers the 4 quadrants' 25 pooled positions,
    # then a VPU max over aligned 32-row groups.  Garbage rows of s2 (ow>=10)
    # are multiplied by exact zeros, so they never leak into the result.
    pooled = jnp.dot(psel_ref[...], s2, preferred_element_type=jnp.float32)     # (128, 32)
    y2 = pooled[0:_P2P, :]
    for q in range(1, 4):
        y2 = jnp.maximum(y2, pooled[q * _P2P:(q + 1) * _P2P, :])
    y2 = jnp.maximum(y2 + b2_ref[...], 0.0)     # rows = pooled positions, lanes = channels

    # ---- flatten + fc1 + ReLU (+ dropout == identity) + fc2 -----------
    # feat lane order is (position, channel); fc1's weight was re-ordered on
    # the host to match, so this equals torch's NCHW .view(B, -1) flatten.
    feat = jnp.concatenate([y2[p:p + 1, :] for p in range(_P2)], axis=1)        # (1, 800)
    h = jnp.dot(feat, wf1_ref[...], preferred_element_type=jnp.float32) + bf1_ref[...]
    h = jnp.maximum(h, 0.0)                                                     # (1, 64)
    h_ref[0] = h
    # TODO(synk): F.dropout / Dropout2d are identity here (inference mode); training-mode RNG dropout not implemented.
    r_ref[0] = jnp.dot(h, wf2_ref[...], preferred_element_type=jnp.float32) + bf2_ref[...]


# ------------------------------- host glue ----------------------------------

def _conv1_patches(x):
    """Host-side im2col for conv1 only (x is tiny).  Rows per quadrant are
    ordered h*14+w and padded 196->200; features are (kh,kw) padded 25->32,
    so every in-kernel slice / store is alignment-friendly."""
    B = x.shape[0]
    quads = []
    for qi in range(2):
        for qj in range(2):
            cols = []
            for kh in range(_K):
                for kw in range(_K):
                    sub = x[:, 0, qi + kh: qi + kh + 2 * _H1: 2,
                                  qj + kw: qj + kw + 2 * _W1: 2]     # (B, 14, 14)
                    cols.append(sub.reshape(B, _S1))
            q = jnp.stack(cols, axis=-1)                             # (B, 196, 25)
            quads.append(jnp.pad(q, ((0, 0), (0, _S1P - _S1), (0, 32 - _K * _K))))
    return jnp.concatenate(quads, axis=1)                            # (B, 800, 32)


def _prep_params(p):
    """Convert torch-layout weights to the padded, permuted kernel layouts."""
    w1 = jnp.zeros((32, _C1P), jnp.float32).at[:_K * _K, :_C1].set(
        p["conv1_w"].reshape(_C1, _K * _K).T)
    b1 = jnp.zeros((1, _C1P), jnp.float32).at[0, :_C1].set(p["conv1_b"])

    # conv2 weight rows are ordered (kernel offset k = kh*5+kw) * 16 + c_in,
    # matching the lane order of the in-kernel patch slab.
    w2 = jnp.zeros((_K * _K, _C1P, _C2P), jnp.float32).at[:, :_C1, :_C2].set(
        p["conv2_w"].transpose(2, 3, 1, 0).reshape(_K * _K, _C1, _C2))
    w2 = w2.reshape(_K * _K * _C1P, _C2P)                            # (400, 32)
    b2 = jnp.zeros((1, _C2P), jnp.float32).at[0, :_C2].set(p["conv2_b"])

    # torch flatten order is c*25 + p; kernel feat order is p*32 + c.
    wf1 = jnp.zeros((_P2, _C2P, _F1P), jnp.float32).at[:, :_C2, :_F1].set(
        p["fc1_w"].reshape(_F1, _C2, _P2).transpose(2, 1, 0))
    wf1 = wf1.reshape(_P2 * _C2P, _F1P)                              # (800, 64)
    bf1 = jnp.zeros((1, _F1P), jnp.float32).at[0, :_F1].set(p["fc1_b"])

    wf2 = jnp.zeros((_F1P, _F2P), jnp.float32).at[:_F1, :_F2].set(p["fc2_w"].T)
    bf2 = jnp.zeros((1, _F2P), jnp.float32).at[0, :_F2].set(p["fc2_b"])
    return w1, b1, w2, b2, wf1, bf1, wf2, bf2


def mnist_cnn_forward(x, params):
    B = x.shape[0]
    p1 = _conv1_patches(x)                                           # (B, 800, 32)
    psel = jnp.asarray(_POOL_SELECT)                                 # (128, 136)
    w1, b1, w2, b2, wf1, bf1, wf2, bf2 = _prep_params(params)

    flops = int(2 * B * (4 * _S1P * 32 * _C1P          # conv1
                         + _R2 * 400 * _C2P            # conv2
                         + 4 * _P2P * _R2 * _C2P       # pool gather
                         + _P2 * _C2P * _F1P           # fc1
                         + _F1P * _F2P))               # fc2
    operands = (p1, psel, w1, b1, w2, b2, wf1, bf1, wf2, bf2)
    bytes_accessed = int(sum(4 * o.size for o in operands) + 4 * B * (_F1P + _F2P))

    h_pad, r_pad = pl.pallas_call(
        mnist_cnn_kernel,
        out_shape=(jax.ShapeDtypeStruct((B, 1, _F1P), jnp.float32),
                   jax.ShapeDtypeStruct((B, 1, _F2P), jnp.float32)),
        grid=(B,),
        in_specs=[
            pl.BlockSpec((1, 4 * _S1P, 32), lambda b: (b, 0, 0)),        # conv1 patches (per image)
            pl.BlockSpec((32, _C1P), lambda b: (0, 0)),                  # conv1 weight
            pl.BlockSpec((1, _C1P), lambda b: (0, 0)),                   # conv1 bias
            pl.BlockSpec((_K * _K * _C1P, _C2P), lambda b: (0, 0)),      # conv2 weight
            pl.BlockSpec((1, _C2P), lambda b: (0, 0)),                   # conv2 bias
            pl.BlockSpec((4 * _P2P, _R2), lambda b: (0, 0)),             # pool selector (resident)
            pl.BlockSpec((_P2 * _C2P, _F1P), lambda b: (0, 0)),          # fc1 weight (permuted)
            pl.BlockSpec((1, _F1P), lambda b: (0, 0)),                   # fc1 bias
            pl.BlockSpec((_F1P, _F2P), lambda b: (0, 0)),                # fc2 weight
            pl.BlockSpec((1, _F2P), lambda b: (0, 0)),                   # fc2 bias
        ],
        out_specs=(pl.BlockSpec((1, 1, _F1P), lambda b: (b, 0, 0)),
                   pl.BlockSpec((1, 1, _F2P), lambda b: (b, 0, 0))),
        scratch_shapes=[pltpu.VMEM((_S1P, _C1P), jnp.float32)],          # y1 (persists per step)
        compiler_params=pltpu.CompilerParams(
            dimension_semantics=("parallel",),
            vmem_limit_bytes=32 * 1024 * 1024),
        cost_estimate=pl.CostEstimate(flops=flops, transcendentals=0,
                                      bytes_accessed=bytes_accessed),
    )(p1, w1, b1, w2, b2, psel, wf1, bf1, wf2, bf2)

    h = h_pad[:, 0, :_F1]
    res = r_pad[:, 0, :_F2]
    return [h, res]


# ------------------------------ reference & test -----------------------------

def init_params(key):
    ks = jax.random.split(key, 8)
    s = 0.1
    p = {}
    p["conv1_w"] = s * jax.random.normal(ks[0], (10, 1, 5, 5), jnp.float32)   # OIHW
    p["conv1_b"] = s * jax.random.normal(ks[1], (10,), jnp.float32)
    p["conv2_w"] = s * jax.random.normal(ks[2], (20, 10, 5, 5), jnp.float32)
    p["conv2_b"] = s * jax.random.normal(ks[3], (20,), jnp.float32)
    p["fc1_w"] = s * jax.random.normal(ks[4], (50, 500), jnp.float32)          # torch (out, in)
    p["fc1_b"] = s * jax.random.normal(ks[5], (50,), jnp.float32)
    p["fc2_w"] = s * jax.random.normal(ks[6], (5, 50), jnp.float32)
    p["fc2_b"] = s * jax.random.normal(ks[7], (5,), jnp.float32)
    return p


def reference_forward(x, p):
    """Pure-JAX reference (lax conv / reduce_window), used only for checking."""
    y = jax.lax.conv_general_dilated(
        x, p["conv1_w"], (1, 1), "VALID",
        dimension_numbers=("NCHW", "OIHW", "NCHW"),
        precision=jax.lax.Precision.HIGHEST) + p["conv1_b"].reshape(1, 10, 1, 1)
    y = jax.lax.reduce_window(y, -jnp.inf, jax.lax.max, (1, 1, 2, 2), (1, 1, 2, 2), "VALID")
    y = jnp.maximum(y, 0.0)
    y = jax.lax.conv_general_dilated(
        y, p["conv2_w"], (1, 1), "VALID",
        dimension_numbers=("NCHW", "OIHW", "NCHW"),
        precision=jax.lax.Precision.HIGHEST) + p["conv2_b"].reshape(1, 20, 1, 1)
    y = jax.lax.reduce_window(y, -jnp.inf, jax.lax.max, (1, 1, 2, 2), (1, 1, 2, 2), "VALID")
    y = jnp.maximum(y, 0.0)
    feat = y.reshape(x.shape[0], -1)
    h = jnp.maximum(feat @ p["fc1_w"].T + p["fc1_b"], 0.0)
    res = h @ p["fc2_w"].T + p["fc2_b"]
    return [h, res]


if __name__ == "__main__":
    key = jax.random.PRNGKey(0)
    kx, kp = jax.random.split(key)
    # fc1 expects 500 = 20*5*5 flattened features -> input must be (B, 1, 32, 32).
    x = jax.random.normal(kx, (2, 1, 32, 32), jnp.float32)
    params = init_params(kp)

    h, res = jax.jit(mnist_cnn_forward)(x, params)
    jax.block_until_ready((h, res))

    h_ref, res_ref = reference_forward(x, params)
    assert h.shape == (2, 50) and res.shape == (2, 5)
    assert jnp.allclose(h, h_ref, rtol=1e-2, atol=1e-2)
    assert jnp.allclose(res, res_ref, rtol=1e-2, atol=1e-2)
    print("KERNEL_OK")
</pallas_src>

<mosaic_0001>
module attributes {stable_mosaic.version = 11 : i64} {
  func.func @mnist_cnn_kernel(%arg0: i32, %arg1: memref<1x800x32xf32, #tpu.memory_space<vmem>>, %arg2: memref<32x16xf32, #tpu.memory_space<vmem>>, %arg3: memref<1x16xf32, #tpu.memory_space<vmem>>, %arg4: memref<400x32xf32, #tpu.memory_space<vmem>>, %arg5: memref<1x32xf32, #tpu.memory_space<vmem>>, %arg6: memref<128x136xf32, #tpu.memory_space<vmem>>, %arg7: memref<800x64xf32, #tpu.memory_space<vmem>>, %arg8: memref<1x64xf32, #tpu.memory_space<vmem>>, %arg9: memref<64x8xf32, #tpu.memory_space<vmem>>, %arg10: memref<1x8xf32, #tpu.memory_space<vmem>>, %arg11: memref<1x1x64xf32, #tpu.memory_space<vmem>>, %arg12: memref<1x1x8xf32, #tpu.memory_space<vmem>>, %arg13: memref<200x16xf32, #tpu.memory_space<vmem>>) attributes {dimension_semantics = [#tpu.dimension_semantics<parallel>], iteration_bounds = array<i64: 2>, scalar_prefetch = 0 : i64, scratch_operands = 1 : i64, tpu.core_type = #tpu.core_type<tc>, window_params = [{transform_indices = @transform_0, window_bounds = array<i64: 1, 800, 32>}, {pipeline_mode = #tpu.pipeline_mode<synchronous>, transform_indices = @transform_1, window_bounds = array<i64: 32, 16>}, {pipeline_mode = #tpu.pipeline_mode<synchronous>, transform_indices = @transform_2, window_bounds = array<i64: 1, 16>}, {pipeline_mode = #tpu.pipeline_mode<synchronous>, transform_indices = @transform_3, window_bounds = array<i64: 400, 32>}, {pipeline_mode = #tpu.pipeline_mode<synchronous>, transform_indices = @transform_4, window_bounds = array<i64: 1, 32>}, {pipeline_mode = #tpu.pipeline_mode<synchronous>, transform_indices = @transform_5, window_bounds = array<i64: 128, 136>}, {pipeline_mode = #tpu.pipeline_mode<synchronous>, transform_indices = @transform_6, window_bounds = array<i64: 800, 64>}, {pipeline_mode = #tpu.pipeline_mode<synchronous>, transform_indices = @transform_7, window_bounds = array<i64: 1, 64>}, {pipeline_mode = #tpu.pipeline_mode<synchronous>, transform_indices = @transform_8, window_bounds = array<i64: 64, 8>}, {pipeline_mode = #tpu.pipeline_mode<synchronous>, transform_indices = @transform_9, window_bounds = array<i64: 1, 8>}, {transform_indices = @transform_10, window_bounds = array<i64: 1, 1, 64>}, {transform_indices = @transform_11, window_bounds = array<i64: 1, 1, 8>}]} {
    %c0 = arith.constant 0 : index
    %c0_0 = arith.constant 0 : index
    %c0_1 = arith.constant 0 : index
    %0 = vector.load %arg1[%c0, %c0_0, %c0_1] : memref<1x800x32xf32, #tpu.memory_space<vmem>>, vector<1x800x32xf32>
    %1 = vector.shape_cast %0 : vector<1x800x32xf32> to vector<800x32xf32>
    %c0_2 = arith.constant 0 : index
    %c0_3 = arith.constant 0 : index
    %2 = vector.load %arg2[%c0_2, %c0_3] : memref<32x16xf32, #tpu.memory_space<vmem>>, vector<32x16xf32>
    %cst = arith.constant dense<0.000000e+00> : vector<800x16xf32>
    %3 = tpu.matmul %1, %2, %cst {dimension_numbers = #tpu.dot_dimension_numbers<[1], [0], [0], [1], [0, 0, 1, 1], [], []>} : vector<800x32xf32>, vector<32x16xf32>, vector<800x16xf32> -> vector<800x16xf32>
    %4 = vector.extract_strided_slice %3 {offsets = [0, 0], sizes = [200, 16], strides = [1, 1]} : vector<800x16xf32> to vector<200x16xf32>
    %5 = vector.extract_strided_slice %3 {offsets = [200, 0], sizes = [200, 16], strides = [1, 1]} : vector<800x16xf32> to vector<200x16xf32>
    %6 = arith.maximumf %4, %5 : vector<200x16xf32>
    %7 = vector.extract_strided_slice %3 {offsets = [400, 0], sizes = [200, 16], strides = [1, 1]} : vector<800x16xf32> to vector<200x16xf32>
    %8 = arith.maximumf %6, %7 : vector<200x16xf32>
    %9 = vector.extract_strided_slice %3 {offsets = [600, 0], sizes = [200, 16], strides = [1, 1]} : vector<800x16xf32> to vector<200x16xf32>
    %10 = arith.maximumf %8, %9 : vector<200x16xf32>
    %c0_4 = arith.constant 0 : index
    %c0_5 = arith.constant 0 : index
    %11 = vector.load %arg3[%c0_4, %c0_5] : memref<1x16xf32, #tpu.memory_space<vmem>>, vector<1x16xf32>
    %12 = vector.broadcast %11 : vector<1x16xf32> to vector<200x16xf32>
    %13 = arith.addf %10, %12 : vector<200x16xf32>
    %cst_6 = arith.constant 0.000000e+00 : f32
    %14 = vector.broadcast %cst_6 : f32 to vector<200x16xf32>
    %15 = arith.maximumf %13, %14 : vector<200x16xf32>
    %c0_7 = arith.constant 0 : index
    %c0_8 = arith.constant 0 : index
    %16 = vector.load %arg13[%c0_7, %c0_8] : memref<200x16xf32, #tpu.memory_space<vmem>>, vector<200x16xf32>
    tpu.vector_store %arg13[%c0_7, %c0_8], %15 {strides = array<i32>} : memref<200x16xf32, #tpu.memory_space<vmem>>, vector<200x16xf32>,
    %c0_9 = arith.constant 0 : index
    %c0_10 = arith.constant 0 : index
    %17 = vector.load %arg13[%c0_9, %c0_10] : memref<200x16xf32, #tpu.memory_space<vmem>>, vector<136x16xf32>
    %c1 = arith.constant 1 : index
    %c0_11 = arith.constant 0 : index
    %18 = vector.load %arg13[%c1, %c0_11] : memref<200x16xf32, #tpu.memory_space<vmem>>, vector<136x16xf32>
    %c2 = arith.constant 2 : index
    %c0_12 = arith.constant 0 : index
    %19 = vector.load %arg13[%c2, %c0_12] : memref<200x16xf32, #tpu.memory_space<vmem>>, vector<136x16xf32>
    %c3 = arith.constant 3 : index
    %c0_13 = arith.constant 0 : index
    %20 = vector.load %arg13[%c3, %c0_13] : memref<200x16xf32, #tpu.memory_space<vmem>>, vector<136x16xf32>
    %c4 = arith.constant 4 : index
    %c0_14 = arith.constant 0 : index
    %21 = vector.load %arg13[%c4, %c0_14] : memref<200x16xf32, #tpu.memory_space<vmem>>, vector<136x16xf32>
    %c14 = arith.constant 14 : index
    %c0_15 = arith.constant 0 : index
    %22 = vector.load %arg13[%c14, %c0_15] : memref<200x16xf32, #tpu.memory_space<vmem>>, vector<136x16xf32>
    %c15 = arith.constant 15 : index
    %c0_16 = arith.constant 0 : index
    %23 = vector.load %arg13[%c15, %c0_16] : memref<200x16xf32, #tpu.memory_space<vmem>>, vector<136x16xf32>
    %c16 = arith.constant 16 : index
    %c0_17 = arith.constant 0 : index
    %24 = vector.load %arg13[%c16, %c0_17] : memref<200x16xf32, #tpu.memory_space<vmem>>, vector<136x16xf32>
    %c17 = arith.constant 17 : index
    %c0_18 = arith.constant 0 : index
    %25 = vector.load %arg13[%c17, %c0_18] : memref<200x16xf32, #tpu.memory_space<vmem>>, vector<136x16xf32>
    %c18 = arith.constant 18 : index
    %c0_19 = arith.constant 0 : index
    %26 = vector.load %arg13[%c18, %c0_19] : memref<200x16xf32, #tpu.memory_space<vmem>>, vector<136x16xf32>
    %c28 = arith.constant 28 : index
    %c0_20 = arith.constant 0 : index
    %27 = vector.load %arg13[%c28, %c0_20] : memref<200x16xf32, #tpu.memory_space<vmem>>, vector<136x16xf32>
    %c29 = arith.constant 29 : index
    %c0_21 = arith.constant 0 : index
    %28 = vector.load %arg13[%c29, %c0_21] : memref<200x16xf32, #tpu.memory_space<vmem>>, vector<136x16xf32>
    %c30 = arith.constant 30 : index
    %c0_22 = arith.constant 0 : index
    %29 = vector.load %arg13[%c30, %c0_22] : memref<200x16xf32, #tpu.memory_space<vmem>>, vector<136x16xf32>
    %c31 = arith.constant 31 : index
    %c0_23 = arith.constant 0 : index
    %30 = vector.load %arg13[%c31, %c0_23] : memref<200x16xf32, #tpu.memory_space<vmem>>, vector<136x16xf32>
    %c32 = arith.constant 32 : index
    %c0_24 = arith.constant 0 : index
    %31 = vector.load %arg13[%c32, %c0_24] : memref<200x16xf32, #tpu.memory_space<vmem>>, vector<136x16xf32>
    %c42 = arith.constant 42 : index
    %c0_25 = arith.constant 0 : index
    %32 = vector.load %arg13[%c42, %c0_25] : memref<200x16xf32, #tpu.memory_space<vmem>>, vector<136x16xf32>
    %c43 = arith.constant 43 : index
    %c0_26 = arith.constant 0 : index
    %33 = vector.load %arg13[%c43, %c0_26] : memref<200x16xf32, #tpu.memory_space<vmem>>, vector<136x16xf32>
    %c44 = arith.constant 44 : index
    %c0_27 = arith.constant 0 : index
    %34 = vector.load %arg13[%c44, %c0_27] : memref<200x16xf32, #tpu.memory_space<vmem>>, vector<136x16xf32>
    %c45 = arith.constant 45 : index
    %c0_28 = arith.constant 0 : index
    %35 = vector.load %arg13[%c45, %c0_28] : memref<200x16xf32, #tpu.memory_space<vmem>>, vector<136x16xf32>
    %c46 = arith.constant 46 : index
    %c0_29 = arith.constant 0 : index
    %36 = vector.load %arg13[%c46, %c0_29] : memref<200x16xf32, #tpu.memory_space<vmem>>, vector<136x16xf32>
    %c56 = arith.constant 56 : index
    %c0_30 = arith.constant 0 : index
    %37 = vector.load %arg13[%c56, %c0_30] : memref<200x16xf32, #tpu.memory_space<vmem>>, vector<136x16xf32>
    %c57 = arith.constant 57 : index
    %c0_31 = arith.constant 0 : index
    %38 = vector.load %arg13[%c57, %c0_31] : memref<200x16xf32, #tpu.memory_space<vmem>>, vector<136x16xf32>
    %c58 = arith.constant 58 : index
    %c0_32 = arith.constant 0 : index
    %39 = vector.load %arg13[%c58, %c0_32] : memref<200x16xf32, #tpu.memory_space<vmem>>, vector<136x16xf32>
    %c59 = arith.constant 59 : index
    %c0_33 = arith.constant 0 : index
    %40 = vector.load %arg13[%c59, %c0_33] : memref<200x16xf32, #tpu.memory_space<vmem>>, vector<136x16xf32>
    %c60 = arith.constant 60 : index
    %c0_34 = arith.constant 0 : index
    %41 = vector.load %arg13[%c60, %c0_34] : memref<200x16xf32, #tpu.memory_space<vmem>>, vector<136x16xf32>
    %42 = tpu.concatenate %17, %18, %19, %20, %21, %22, %23, %24, %25, %26, %27, %28, %29, %30, %31, %32 in 1 : vector<136x16xf32>, vector<136x16xf32>, vector<136x16xf32>, vector<136x16xf32>, vector<136x16xf32>, vector<136x16xf32>, vector<136x16xf32>, vector<136x16xf32>, vector<136x16xf32>, vector<136x16xf32>, vector<136x16xf32>, vector<136x16xf32>, vector<136x16xf32>, vector<136x16xf32>, vector<136x16xf32>, vector<136x16xf32> -> vector<136x256xf32>
    %43 = tpu.concatenate %33, %34, %35, %36, %37, %38, %39, %40, %41 in 1 : vector<136x16xf32>, vector<136x16xf32>, vector<136x16xf32>, vector<136x16xf32>, vector<136x16xf32>, vector<136x16xf32>, vector<136x16xf32>, vector<136x16xf32>, vector<136x16xf32> -> vector<136x144xf32>
    %44 = tpu.concatenate %42, %43 in 1 : vector<136x256xf32>, vector<136x144xf32> -> vector<136x400xf32>
    %c0_35 = arith.constant 0 : index
    %c0_36 = arith.constant 0 : index
    %45 = vector.load %arg4[%c0_35, %c0_36] : memref<400x32xf32, #tpu.memory_space<vmem>>, vector<400x32xf32>
    %cst_37 = arith.constant dense<0.000000e+00> : vector<136x32xf32>
    %46 = tpu.matmul %44, %45, %cst_37 {dimension_numbers = #tpu.dot_dimension_numbers<[1], [0], [0], [1], [0, 0, 1, 1], [], []>} : vector<136x400xf32>, vector<400x32xf32>, vector<136x32xf32> -> vector<136x32xf32>
    %c0_38 = arith.constant 0 : index
    %c0_39 = arith.constant 0 : index
    %47 = vector.load %arg6[%c0_38, %c0_39] : memref<128x136xf32, #tpu.memory_space<vmem>>, vector<128x136xf32>
    %cst_40 = arith.constant dense<0.000000e+00> : vector<128x32xf32>
    %48 = tpu.matmul %47, %46, %cst_40 {dimension_numbers = #tpu.dot_dimension_numbers<[1], [0], [0], [1], [0, 0, 1, 1], [], []>} : vector<128x136xf32>, vector<136x32xf32>, vector<128x32xf32> -> vector<128x32xf32>
    %49 = vector.extract_strided_slice %48 {offsets = [0, 0], sizes = [32, 32], strides = [1, 1]} : vector<128x32xf32> to vector<32x32xf32>
    %50 = vector.extract_strided_slice %48 {offsets = [32, 0], sizes = [32, 32], strides = [1, 1]} : vector<128x32xf32> to vector<32x32xf32>
    %51 = arith.maximumf %49, %50 : vector<32x32xf32>
    %52 = vector.extract_strided_slice %48 {offsets = [64, 0], sizes = [32, 32], strides = [1, 1]} : vector<128x32xf32> to vector<32x32xf32>
    %53 = arith.maximumf %51, %52 : vector<32x32xf32>
    %54 = vector.extract_strided_slice %48 {offsets = [96, 0], sizes = [32, 32], strides = [1, 1]} : vector<128x32xf32> to vector<32x32xf32>
    %55 = arith.maximumf %53, %54 : vector<32x32xf32>
    %c0_41 = arith.constant 0 : index
    %c0_42 = arith.constant 0 : index
    %56 = vector.load %arg5[%c0_41, %c0_42] : memref<1x32xf32, #tpu.memory_space<vmem>>, vector<1x32xf32>
    %57 = vector.broadcast %56 : vector<1x32xf32> to vector<32x32xf32>
    %58 = arith.addf %55, %57 : vector<32x32xf32>
    %cst_43 = arith.constant 0.000000e+00 : f32
    %59 = vector.broadcast %cst_43 : f32 to vector<32x32xf32>
    %60 = arith.maximumf %58, %59 : vector<32x32xf32>
    %61 = vector.extract_strided_slice %60 {offsets = [0, 0], sizes = [1, 32], strides = [1, 1]} : vector<32x32xf32> to vector<1x32xf32>
    %62 = vector.extract_strided_slice %60 {offsets = [1, 0], sizes = [1, 32], strides = [1, 1]} : vector<32x32xf32> to vector<1x32xf32>
    %63 = vector.extract_strided_slice %60 {offsets = [2, 0], sizes = [1, 32], strides = [1, 1]} : vector<32x32xf32> to vector<1x32xf32>
    %64 = vector.extract_strided_slice %60 {offsets = [3, 0], sizes = [1, 32], strides = [1, 1]} : vector<32x32xf32> to vector<1x32xf32>
    %65 = vector.extract_strided_slice %60 {offsets = [4, 0], sizes = [1, 32], strides = [1, 1]} : vector<32x32xf32> to vector<1x32xf32>
    %66 = vector.extract_strided_slice %60 {offsets = [5, 0], sizes = [1, 32], strides = [1, 1]} : vector<32x32xf32> to vector<1x32xf32>
    %67 = vector.extract_strided_slice %60 {offsets = [6, 0], sizes = [1, 32], strides = [1, 1]} : vector<32x32xf32> to vector<1x32xf32>
    %68 = vector.extract_strided_slice %60 {offsets = [7, 0], sizes = [1, 32], strides = [1, 1]} : vector<32x32xf32> to vector<1x32xf32>
    %69 = vector.extract_strided_slice %60 {offsets = [8, 0], sizes = [1, 32], strides = [1, 1]} : vector<32x32xf32> to vector<1x32xf32>
    %70 = vector.extract_strided_slice %60 {offsets = [9, 0], sizes = [1, 32], strides = [1, 1]} : vector<32x32xf32> to vector<1x32xf32>
    %71 = vector.extract_strided_slice %60 {offsets = [10, 0], sizes = [1, 32], strides = [1, 1]} : vector<32x32xf32> to vector<1x32xf32>
    %72 = vector.extract_strided_slice %60 {offsets = [11, 0], sizes = [1, 32], strides = [1, 1]} : vector<32x32xf32> to vector<1x32xf32>
    %73 = vector.extract_strided_slice %60 {offsets = [12, 0], sizes = [1, 32], strides = [1, 1]} : vector<32x32xf32> to vector<1x32xf32>
    %74 = vector.extract_strided_slice %60 {offsets = [13, 0], sizes = [1, 32], strides = [1, 1]} : vector<32x32xf32> to vector<1x32xf32>
    %75 = vector.extract_strided_slice %60 {offsets = [14, 0], sizes = [1, 32], strides = [1, 1]} : vector<32x32xf32> to vector<1x32xf32>
    %76 = vector.extract_strided_slice %60 {offsets = [15, 0], sizes = [1, 32], strides = [1, 1]} : vector<32x32xf32> to vector<1x32xf32>
    %77 = vector.extract_strided_slice %60 {offsets = [16, 0], sizes = [1, 32], strides = [1, 1]} : vector<32x32xf32> to vector<1x32xf32>
    %78 = vector.extract_strided_slice %60 {offsets = [17, 0], sizes = [1, 32], strides = [1, 1]} : vector<32x32xf32> to vector<1x32xf32>
    %79 = vector.extract_strided_slice %60 {offsets = [18, 0], sizes = [1, 32], strides = [1, 1]} : vector<32x32xf32> to vector<1x32xf32>
    %80 = vector.extract_strided_slice %60 {offsets = [19, 0], sizes = [1, 32], strides = [1, 1]} : vector<32x32xf32> to vector<1x32xf32>
    %81 = vector.extract_strided_slice %60 {offsets = [20, 0], sizes = [1, 32], strides = [1, 1]} : vector<32x32xf32> to vector<1x32xf32>
    %82 = vector.extract_strided_slice %60 {offsets = [21, 0], sizes = [1, 32], strides = [1, 1]} : vector<32x32xf32> to vector<1x32xf32>
    %83 = vector.extract_strided_slice %60 {offsets = [22, 0], sizes = [1, 32], strides = [1, 1]} : vector<32x32xf32> to vector<1x32xf32>
    %84 = vector.extract_strided_slice %60 {offsets = [23, 0], sizes = [1, 32], strides = [1, 1]} : vector<32x32xf32> to vector<1x32xf32>
    %85 = vector.extract_strided_slice %60 {offsets = [24, 0], sizes = [1, 32], strides = [1, 1]} : vector<32x32xf32> to vector<1x32xf32>
    %86 = tpu.concatenate %61, %62, %63, %64, %65, %66, %67, %68, %69, %70, %71, %72, %73, %74, %75, %76 in 1 : vector<1x32xf32>, vector<1x32xf32>, vector<1x32xf32>, vector<1x32xf32>, vector<1x32xf32>, vector<1x32xf32>, vector<1x32xf32>, vector<1x32xf32>, vector<1x32xf32>, vector<1x32xf32>, vector<1x32xf32>, vector<1x32xf32>, vector<1x32xf32>, vector<1x32xf32>, vector<1x32xf32>, vector<1x32xf32> -> vector<1x512xf32>
    %87 = tpu.concatenate %77, %78, %79, %80, %81, %82, %83, %84, %85 in 1 : vector<1x32xf32>, vector<1x32xf32>, vector<1x32xf32>, vector<1x32xf32>, vector<1x32xf32>, vector<1x32xf32>, vector<1x32xf32>, vector<1x32xf32>, vector<1x32xf32> -> vector<1x288xf32>
    %88 = tpu.concatenate %86, %87 in 1 : vector<1x512xf32>, vector<1x288xf32> -> vector<1x800xf32>
    %c0_44 = arith.constant 0 : index
    %c0_45 = arith.constant 0 : index
    %89 = vector.load %arg7[%c0_44, %c0_45] : memref<800x64xf32, #tpu.memory_space<vmem>>, vector<800x64xf32>
    %cst_46 = arith.constant dense<0.000000e+00> : vector<1x64xf32>
    %90 = tpu.matmul %88, %89, %cst_46 {dimension_numbers = #tpu.dot_dimension_numbers<[1], [0], [0], [1], [0, 0, 1, 1], [], []>} : vector<1x800xf32>, vector<800x64xf32>, vector<1x64xf32> -> vector<1x64xf32>
    %c0_47 = arith.constant 0 : index
    %c0_48 = arith.constant 0 : index
    %91 = vector.load %arg8[%c0_47, %c0_48] : memref<1x64xf32, #tpu.memory_space<vmem>>, vector<1x64xf32>
    %92 = arith.addf %90, %91 : vector<1x64xf32>
    %cst_49 = arith.constant 0.000000e+00 : f32
    %93 = vector.broadcast %cst_49 : f32 to vector<1x64xf32>
    %94 = arith.maximumf %92, %93 : vector<1x64xf32>
    %c0_50 = arith.constant 0 : index
    %c0_51 = arith.constant 0 : index
    %c0_52 = arith.constant 0 : index
    %95 = vector.load %arg11[%c0_50, %c0_51, %c0_52] : memref<1x1x64xf32, #tpu.memory_space<vmem>>, vector<1x1x64xf32>
    %96 = vector.shape_cast %95 : vector<1x1x64xf32> to vector<1x64xf32>
    %97 = vector.shape_cast %94 : vector<1x64xf32> to vector<1x1x64xf32>
    tpu.vector_store %arg11[%c0_50, %c0_51, %c0_52], %97 {strides = array<i32>} : memref<1x1x64xf32, #tpu.memory_space<vmem>>, vector<1x1x64xf32>,
    %c0_53 = arith.constant 0 : index
    %c0_54 = arith.constant 0 : index
    %98 = vector.load %arg9[%c0_53, %c0_54] : memref<64x8xf32, #tpu.memory_space<vmem>>, vector<64x8xf32>
    %cst_55 = arith.constant dense<0.000000e+00> : vector<1x8xf32>
    %99 = tpu.matmul %94, %98, %cst_55 {dimension_numbers = #tpu.dot_dimension_numbers<[1], [0], [0], [1], [0, 0, 1, 1], [], []>} : vector<1x64xf32>, vector<64x8xf32>, vector<1x8xf32> -> vector<1x8xf32>
    %c0_56 = arith.constant 0 : index
    %c0_57 = arith.constant 0 : index
    %100 = vector.load %arg10[%c0_56, %c0_57] : memref<1x8xf32, #tpu.memory_space<vmem>>, vector<1x8xf32>
    %101 = arith.addf %99, %100 : vector<1x8xf32>
    %c0_58 = arith.constant 0 : index
    %c0_59 = arith.constant 0 : index
    %c0_60 = arith.constant 0 : index
    %102 = vector.load %arg12[%c0_58, %c0_59, %c0_60] : memref<1x1x8xf32, #tpu.memory_space<vmem>>, vector<1x1x8xf32>
    %103 = vector.shape_cast %102 : vector<1x1x8xf32> to vector<1x8xf32>
    %104 = vector.shape_cast %101 : vector<1x8xf32> to vector<1x1x8xf32>
    tpu.vector_store %arg12[%c0_58, %c0_59, %c0_60], %104 {strides = array<i32>} : memref<1x1x8xf32, #tpu.memory_space<vmem>>, vector<1x1x8xf32>,
    return
  }
  func.func @transform_0(%arg0: i32) -> (i32, i32, i32) {
    %c0_i32 = arith.constant 0 : i32
    %c0_i32_0 = arith.constant 0 : i32
    %c0_i32_1 = arith.constant 0 : i32
    return %arg0, %c0_i32, %c0_i32_0 : i32, i32, i32
  }
  func.func @transform_1(%arg0: i32) -> (i32, i32) {
    %c0_i32 = arith.constant 0 : i32
    %c0_i32_0 = arith.constant 0 : i32
    %c0_i32_1 = arith.constant 0 : i32
    return %c0_i32, %c0_i32_0 : i32, i32
  }
  func.func @transform_2(%arg0: i32) -> (i32, i32) {
    %c0_i32 = arith.constant 0 : i32
    %c0_i32_0 = arith.constant 0 : i32
    %c0_i32_1 = arith.constant 0 : i32
    return %c0_i32, %c0_i32_0 : i32, i32
  }
  func.func @transform_3(%arg0: i32) -> (i32, i32) {
    %c0_i32 = arith.constant 0 : i32
    %c0_i32_0 = arith.constant 0 : i32
    %c0_i32_1 = arith.constant 0 : i32
    return %c0_i32, %c0_i32_0 : i32, i32
  }
  func.func @transform_4(%arg0: i32) -> (i32, i32) {
    %c0_i32 = arith.constant 0 : i32
    %c0_i32_0 = arith.constant 0 : i32
    %c0_i32_1 = arith.constant 0 : i32
    return %c0_i32, %c0_i32_0 : i32, i32
  }
  func.func @transform_5(%arg0: i32) -> (i32, i32) {
    %c0_i32 = arith.constant 0 : i32
    %c0_i32_0 = arith.constant 0 : i32
    %c0_i32_1 = arith.constant 0 : i32
    return %c0_i32, %c0_i32_0 : i32, i32
  }
  func.func @transform_6(%arg0: i32) -> (i32, i32) {
    %c0_i32 = arith.constant 0 : i32
    %c0_i32_0 = arith.constant 0 : i32
    %c0_i32_1 = arith.constant 0 : i32
    return %c0_i32, %c0_i32_0 : i32, i32
  }
  func.func @transform_7(%arg0: i32) -> (i32, i32) {
    %c0_i32 = arith.constant 0 : i32
    %c0_i32_0 = arith.constant 0 : i32
    %c0_i32_1 = arith.constant 0 : i32
    return %c0_i32, %c0_i32_0 : i32, i32
  }
  func.func @transform_8(%arg0: i32) -> (i32, i32) {
    %c0_i32 = arith.constant 0 : i32
    %c0_i32_0 = arith.constant 0 : i32
    %c0_i32_1 = arith.constant 0 : i32
    return %c0_i32, %c0_i32_0 : i32, i32
  }
  func.func @transform_9(%arg0: i32) -> (i32, i32) {
    %c0_i32 = arith.constant 0 : i32
    %c0_i32_0 = arith.constant 0 : i32
    %c0_i32_1 = arith.constant 0 : i32
    return %c0_i32, %c0_i32_0 : i32, i32
  }
  func.func @transform_10(%arg0: i32) -> (i32, i32, i32) {
    %c0_i32 = arith.constant 0 : i32
    %c0_i32_0 = arith.constant 0 : i32
    %c0_i32_1 = arith.constant 0 : i32
    return %arg0, %c0_i32, %c0_i32_0 : i32, i32, i32
  }
  func.func @transform_11(%arg0: i32) -> (i32, i32, i32) {
    %c0_i32 = arith.constant 0 : i32
    %c0_i32_0 = arith.constant 0 : i32
    %c0_i32_1 = arith.constant 0 : i32
    return %arg0, %c0_i32, %c0_i32_0 : i32, i32, i32
  }
}

</mosaic_0001>

<bundles_post_ra>
// kernel: squeeze.102
= control target key start
LH: loop header
LB: loop body
LE: loop exit
PB: predicated region body
PF: predicated region fallthrough
CT: control target
= control target key end

     0   :  { %s7_s6 = smov 3  ;;  %s10_s7 = smov 3  ;;  %vm12_vm0 = vcmask 15360   ;;  %vm4_vm1 = vcmask 113664   ;;  %vm16_vm2 = vcmask 97280   ;;  %vm19_vm3 = vcmask 1048560   ;;  %s225_s0 = inlined_call_operand.vmem [shape: f32[2,1,14,14], index: 0, kind: input, shape index: {}]   ;;  %s226_s1 = inlined_call_operand.vmem [shape: f32[2,196,1], index: 1, kind: output, shape index: {}]  }
   0x1   :  { %v123_v0 = vld [vmem:[%s225_s0 + $0x9] ss:$16 sm:%s7_s6]   ;;  %s29_s12 = smov 3  ;;  %s22_s15 = smov 3  ;;  %vm26_vm4 = vcmask 1032064   ;;  %vm33_vm5 = vcmask 917264  }
   0x2   :  { %v124_v1 = vld [vmem:[%s225_s0 + $0x9] ss:$16 sm:%s10_s7]   ;;  %v126_v3 = vld [vmem:[%s225_s0 + $0x7] ss:$16 sm:%s29_s12]   ;;  %s151_s16 = smov 126   ;;  %s152_s17 = smov 98  }
   0x3   :  { %v13_v2 = vsel %vm12_vm0, %v124_v1, %v123_v0  ;;  %31 = vrot.lane.b32.xlu1 %v126_v3, %s152_s17  ;;  %s36_s18 = smov 3  ;;  %v125_v4 = vld [vmem:[%s225_s0 + $0x8] ss:$16 sm:%s22_s15]   ;;  %s43_s23 = smov 3  ;;  %vm40_vm6 = vcmask 802464   ;;  %vm47_vm7 = vcmask 687664  }
   0x4   :  { %14 = vrot.lane.b32.xlu0 %v13_v2, %s151_s16  ;;  %v127_v5 = vld [vmem:[%s225_s0 + $0x6] ss:$16 sm:%s36_s18]   ;;  %s50_s24 = smov 3  ;;  %s153_s25 = smov 112   ;;  %vm54_vm8 = vcmask 572864   ;;  %vm61_vm9 = vcmask 556464  }
   0x5   :  { %s154_s26 = smov 84   ;;  %v128_v6 = vld [vmem:[%s225_s0 + $0x5] ss:$16 sm:%s43_s23]   ;;  %v129_v7 = vld [vmem:[%s225_s0 + $0x4] ss:$16 sm:%s50_s24]   ;;  %s57_s2 = smov 3 }
   0x6   :  { %s65_s3 = smov 3  ;;  %s155_s4 = smov 70   ;;  %v130_v8 = vld [vmem:[%s225_s0 + $0xd] ss:$16 sm:%s57_s2]   ;;  %vm69_vm10 = vcmask 458064   ;;  %vm76_vm11 = vcmask 441664  }
   0x7   :  { %38 = vrot.lane.b32.xlu1 %v127_v5, %s154_s26  ;;  %s156_s5 = smov 56   ;;  %v131_v9 = vld [vmem:[%s225_s0 + $0x3] ss:$16 sm:%s65_s3]   ;;  %s72_s10 = smov 3  ;;  %vm84_vm12 = vcmask 343264   ;;  %vm91_vm13 = vcmask 326864  }
   0x8   :  { %24 = vrot.lane.b32.xlu0 %v125_v4, %s153_s25  ;;  %s80_s11 = smov 3  ;;  %s2_s12 = smov 3  ;;  %v132_v11 = vld [vmem:[%s225_s0 + $0xc] ss:$16 sm:%s72_s10]   ;;  %vm99_vm14 = vcmask 228464   ;;  %vm106_vm15 = vcmask 212064  }
   0x9   :  { %v3_v10 = vld [vmem:[%s225_s0] ss:$16 sm:%s2_s12]   ;;  %s157_s15 = smov 54   ;;  %s158_s16 = smov 42   ;;  %v133_v12 = vld [vmem:[%s225_s0 + $0x2] ss:$16 sm:%s80_s11]  }
   0xa   :  { %5 = vst.msk [vmem:[#allocation0] sm:$0x3] %vm4_vm1, %v3_v10   ;;  %s87_s21 = smov 3  ;;  %s95_s22 = smov 3 }
   0xb   :  { %52 = vrot.lane.b32.xlu1 %v129_v7, %s156_s5  ;;  %s159_s23 = smov 40   ;;  %s160_s24 = smov 28   ;;  %v134_v13 = vld [vmem:[%s225_s0 + $0xb] ss:$16 sm:%s87_s21]  }
   0xc   :  { %45 = vrot.lane.b32.xlu0 %v128_v6, %s155_s4  ;;  %v135_v14 = vld [vmem:[%s225_s0 + $0x1] ss:$16 sm:%s95_s22]   ;;  %s102_s29 = smov 3  ;;  %s161_s30 = smov 26  }
   0xd   :  { %s162_s2 = smov 14   ;;  %v136_v15 = vld [vmem:[%s225_s0 + $0xa] ss:$16 sm:%s102_s29]   ;;  %s163_s0 = smov 12  }
   0xf   :  { %67 = vrot.lane.b32.xlu1 %v131_v9, %s158_s16 }
  0x10   :  { %59 = vrot.lane.b32.xlu0 %v130_v8, %s157_s15 }
  0x13   :  { %82 = vrot.lane.b32.xlu1 %v133_v12, %s160_s24 }
  0x14   :  { %74 = vrot.lane.b32.xlu0 %v132_v11, %s159_s23 }
  0x17   :  { %97 = vrot.lane.b32.xlu1 %v135_v14, %s162_s2 }
  0x18   :  { %89 = vrot.lane.b32.xlu0 %v134_v13, %s161_s30 }
  0x1c   :  { %104 = vrot.lane.b32.xlu0 %v136_v15, %s163_s0 }
  0x75   :  { %v32_v17 = vpop.permute.xlu1 %31  }
  0x76   :  { %v15_v16 = vpop.permute.xlu0 %14  }
  0x77   :  { %18 = vst.msk [vmem:[#allocation0 + $0x8] sm:$0x3] %vm16_vm2, %v15_v16  }
  0x78   :  { %20 = vst.msk [vmem:[#allocation0] sm:$0x3] %vm19_vm3, %v15_v16  }
  0x79   :  { %v39_v19 = vpop.permute.xlu1 %38  }
  0x7a   :  { %v25_v18 = vpop.permute.xlu0 %24  }
  0x7b   :  { %27 = vst.msk [vmem:[#allocation0] sm:$0x3] %vm26_vm4, %v25_v18  }
  0x7c   :  { %34 = vst.msk [vmem:[#allocation0] sm:$0x3] %vm33_vm5, %v32_v17  }
  0x7d   :  { %41 = vst.msk [vmem:[#allocation0] sm:$0x3] %vm40_vm6, %v39_v19   ;;  %v53_v21 = vpop.permute.xlu1 %52  }
  0x7e   :  { %v46_v20 = vpop.permute.xlu0 %45  }
  0x7f   :  { %48 = vst.msk [vmem:[#allocation0] sm:$0x3] %vm47_vm7, %v46_v20  }
  0x80   :  { %55 = vst.msk [vmem:[#allocation0] sm:$0x3] %vm54_vm8, %v53_v21  }
  0x81   :  { %v68_v23 = vpop.permute.xlu1 %67  }
  0x82   :  { %v60_v22 = vpop.permute.xlu0 %59   ;;  %70 = vst.msk [vmem:[#allocation0] sm:$0x3] %vm69_vm10, %v68_v23  }
  0x83   :  { %63 = vst.msk [vmem:[#allocation0 + $0x8] sm:$0x3] %vm61_vm9, %v60_v22  }
  0x85   :  { %v83_v25 = vpop.permute.xlu1 %82  }
  0x86   :  { %v75_v24 = vpop.permute.xlu0 %74   ;;  %85 = vst.msk [vmem:[#allocation0] sm:$0x3] %vm84_vm12, %v83_v25  }
  0x87   :  { %78 = vst.msk [vmem:[#allocation0 + $0x8] sm:$0x3] %vm76_vm11, %v75_v24  }
  0x89   :  { %v98_v27 = vpop.permute.xlu1 %97  }
  0x8a   :  { %v90_v26 = vpop.permute.xlu0 %89   ;;  %100 = vst.msk [vmem:[#allocation0] sm:$0x3] %vm99_vm14, %v98_v27  }
  0x8b   :  { %93 = vst.msk [vmem:[#allocation0 + $0x8] sm:$0x3] %vm91_vm13, %v90_v26  }
  0x8e   :  { %v105_v28 = vpop.permute.xlu0 %104  }
  0x8f   :  { %108 = vst.msk [vmem:[#allocation0 + $0x8] sm:$0x3] %vm106_vm15, %v105_v28  }
  0x91   :  { %v113_v29 = vld [vmem:[#allocation0] sm:$0x3] }
  0x92   :  { %116 = vst [vmem:[%s226_s1] sm:$0x3] %v113_v29 }
  0x96   :  { %v118_v30 = vld [vmem:[#allocation0 + $0x8] sm:$0x3] }
  0x97   :  { %137 = vst [vmem:[%s226_s1 + $0x2] sm:$0x3] %v118_v30 }

// kernel: mnist_cnn_forward.1
= control target key start
LH: loop header
LB: loop body
LE: loop exit
PB: predicated region body
PF: predicated region fallthrough
CT: control target
= control target key end

     0   :  { %s9481_s0 = inlined_call_operand.vmem [shape: f32[2,800,32], index: 0, kind: input, shape index: {}]   ;;  %s9482_s1 = inlined_call_operand.vmem [shape: f32[32,16], index: 1, kind: input, shape index: {}]   ;;  %s9483_s2 = inlined_call_operand.vmem [shape: f32[1,16], index: 2, kind: input, shape index: {}]   ;;  %s9484_s3 = inlined_call_operand.vmem [shape: f32[400,32], index: 3, kind: input, shape index: {}]   ;;  %s9485_s4 = inlined_call_operand.vmem [shape: f32[1,32], index: 4, kind: input, shape index: {}]   ;;  %s9486_s5 = inlined_call_operand.vmem [shape: f32[128,136], index: 5, kind: input, shape index: {}]   ;;  %s9487_s6 = inlined_call_operand.vmem [shape: f32[800,64], index: 6, kind: input, shape index: {}]   ;;  %s9488_s7 = inlined_call_operand.vmem [shape: f32[1,64], index: 7, kind: input, shape index: {}]   ;;  %s9489_s8 = inlined_call_operand.vmem [shape: f32[64,8], index: 8, kind: input, shape index: {}]   ;;  %s9490_s9 = inlined_call_operand.vmem [shape: f32[1,8], index: 9, kind: input, shape index: {}]   ;;  %s9491_s10 = inlined_call_operand.hbm [shape: f32[2,1,64], index: 10, kind: output, shape index: {0}]   ;;  %s9492_s11 = inlined_call_operand.hbm [shape: f32[2,1,8], index: 11, kind: output, shape index: {1}]  }
   0x1   :  { %9564 = sst [smem:[#allocation43_spill]] %s9481_s0 }
   0x2   :  { %9565 = sst [smem:[#allocation44_spill]] %s9482_s1 }
   0x3   :  { %9566 = sst [smem:[#allocation45_spill]] %s9483_s2 }
   0x4   :  { %9567 = sst [smem:[#allocation46_spill]] %s9484_s3 }
   0x5   :  { %17 = vsyncpa [#allocation4], 0 }
   0x6   :  { %19 = vsyncpa [#allocation4 + $0x1], 0 }
   0x7   :  { %20 = vsyncpa [#allocation6], 0 }
   0x8   :  { %22 = vsyncpa [#allocation6 + $0x1], 0  ;;  %s6355_s17 = smov 0   ;;  %s6357_s18 = smov 0  }
   0x9   :  { %s6359_s19 = smov 0   ;;  %s6361_s20 = smov 0  }
   0xa LB: > { %s6376_s21 = sadd.s32 4294967295, %s6282_s20   ;;  %s4631_s22 = sadd.s32 4294967294, %s6282_s20   ;;  %s6282_s20 = sphi %s6361_s20, %s9738_s20   ;;  %s6278_s19 = sphi %s6359_s19, %s9737_s19   ;;  %s6274_s18 = sphi %s6357_s18, %s9736_s18   ;;  %s6270_s17 = sphi %s6355_s17, %s9735_s17  }
   0xb   : > { %s6380_s23 = sadd.s32 1, %s6282_s20   ;;  %s250_s24 = sadd.s32 1, %s6278_s19 }
   0xc   : > { %s247_s25 = ssub.s32 %s6282_s20, %s6380_s23  ;;  %p260_p0 = scmp.ne.s32.totalorder %s6278_s19, %s6274_s18 }
   0xd   : > { %p248_p1 = scmp.eq.s32.totalorder %s247_s25, 0  ;;  %p261_p2 = scmp.eq.s32.totalorder %s6376_s21, 1 }
   0xe   : > { %p266_p3 = scmp.ne.s32.totalorder %s6274_s18, %s6270_s17  ;;  %p267_p4 = scmp.eq.s32.totalorder %s4631_s22, 1 }
   0xf   : > { %s6391_s26 = scalar_select %p248_p1, %s6278_s19, %s250_s24  }
  0x10   : > { %p6393_p5 = por %p261_p2, %p260_p0  ;;  %p6397_p6 = por %p267_p4, %p266_p3 }
  0x11   : > { %p4634_p7 = scmp.ge.s32.totalorder %s6282_s20, 1  ;;  %p346_p8 = scmp.lt.s32.totalorder %s6282_s20, 3 }
  0x13   : > { %p347_p9 = pnand %p4634_p7, %p346_p8 }
  0x15   : > { %350 = sbr.rel (%p347_p9) target bundleno = 1927 (0x787), region = 60 }
  0x1a   : > { %s9570_s1 = sld [smem:[#allocation44_spill]]  ;;  %p389_p10 = scmp.lt.s32.totalorder %s6376_s21, 1  ;;  %vm498_vm0 = vcmask 261120   ;;  %vm1496_vm1 = vcmask 130048   ;;  %vm2599_vm2 = vcmask 392192   ;;  %vm2617_vm3 = vcmask 523264  }
  0x1b   : > { %s9571_s0 = sld [smem:[#allocation43_spill]]  ;;  %s9509_s13 = smov 96   ;;  %vm2635_vm4 = vcmask 654336   ;;  %vm2653_vm5 = vcmask 785408   ;;  %vm2671_vm6 = vcmask 916480   ;;  %vm3727_vm7 = vcmask 64512  }
  0x1c   : > { %s390_s16 = scalar_select %p389_p10, %s6376_s21, 1  ;;  %vm6292_vm8 = vmmov 0   ;;  %vm4432_vm9 = vcmask 516096  }
  0x1d   : > { %s9586_s3 = sld [smem:[#allocation46_spill]]  ;;  %s9561_s14 = smov 16  }
  0x1e   : > { %s5188_s25 = smul.u32 800, %s390_s16  ;;  %s9594_s2 = sld [smem:[#allocation45_spill]] }
  0x1f   : > { %s9507_s15 = smov 48   ;;  %s9526_s16 = smov 32  }
  0x20   : > { %v497_v0 = vld [vmem:[%s9570_s1 + $0x18] sm:$0xff]  ;;  %v496_v1 = vld [vmem:[%s9570_s1 + $0x10] sm:$0xff]  ;;  %v495_v2 = vld [vmem:[%s9570_s1 + $0x8] sm:$0xff]  ;;  %s9534_s22 = smov 64   ;;  %s9532_s24 = smov 80  }
  0x21   : > { %5000 = vmatprep.subr.mxu0 %v497_v0  ;;  %v494_v3 = vld [vmem:[%s9570_s1] sm:$0xff]  ;;  %s6420_s12 = scalar_lea.vmem %s9571_s0, %s5188_s25  ;;  %s6291_s25 = smov 112  }
  0x22   : > { %5001 = vmatpush3.msra.mxu0 %v497_v0  ;;  %v394_v4 = vld [vmem:[%s6420_s12] sm:$0xff]  ;;  %v395_v5 = vld [vmem:[%s6420_s12 + $0x8] sm:$0xff]  ;;  %v396_v6 = vld [vmem:[%s6420_s12 + $0x10] sm:$0xff]  ;;  %s9688_s30 = smov 64   ;;  %s9563_s1 = sshll.u32 %s6376_s21, 4 }
  0x23   : > { %5002 = vmatprep.subr.mxu0 %v496_v1  ;;  %5008 = vmatprep.mubr.msk.f32.mxu0 %vm498_vm0, %v394_v4  ;;  %v397_v7 = vld [vmem:[%s6420_s12 + $0x18] sm:$0xff]  ;;  %v398_v8 = vld [vmem:[%s6420_s12 + $0x20] sm:$0xff]  ;;  %v399_v9 = vld [vmem:[%s6420_s12 + $0x28] sm:$0xff] }
  0x24   : > { %5003 = vmatpush3.msra.mxu0 %v496_v1  ;;  %v400_v10 = vld [vmem:[%s6420_s12 + $0x30] sm:$0xff]  ;;  %v401_v11 = vld [vmem:[%s6420_s12 + $0x38] sm:$0xff]  ;;  %v402_v12 = vld [vmem:[%s6420_s12 + $0x40] sm:$0xff] }
  0x25   : > { %5004 = vmatprep.subr.mxu0 %v495_v2  ;;  %v403_v13 = vld [vmem:[%s6420_s12 + $0x48] sm:$0xff]  ;;  %v404_v14 = vld [vmem:[%s6420_s12 + $0x50] sm:$0xff]  ;;  %v405_v15 = vld [vmem:[%s6420_s12 + $0x58] sm:$0xff] }
  0x26   : > { %5005 = vmatpush3.msra.mxu0 %v495_v2  ;;  %v406_v16 = vld [vmem:[%s6420_s12 + $0x60] sm:$0xff]  ;;  %v407_v17 = vld [vmem:[%s6420_s12 + $0x68] sm:$0xff]  ;;  %v408_v18 = vld [vmem:[%s6420_s12 + $0x70] sm:$0xff] }
  0x27   : > { %5006 = vmatprep.subr.mxu0 %v494_v3  ;;  %v409_v19 = vld [vmem:[%s6420_s12 + $0x78] sm:$0xff]  ;;  %v410_v20 = vld [vmem:[%s6420_s12 + $0x80] sm:$0xff]  ;;  %v411_v21 = vld [vmem:[%s6420_s12 + $0x88] sm:$0xff] }
  0x28   : > { %5007 = vmatpush3.msra.mxu0 %v494_v3  ;;  %v412_v22 = vld [vmem:[%s6420_s12 + $0x90] sm:$0xff]  ;;  %v413_v23 = vld [vmem:[%s6420_s12 + $0x98] sm:$0xff]  ;;  %v414_v24 = vld [vmem:[%s6420_s12 + $0xa0] sm:$0xff] }
  0x29   : > { %5009 = vmatmul.mubr.msk.f32.vlgmr.msra.gmra.mxu0 %vm498_vm0, %v395_v5  ;;  %v415_v25 = vld [vmem:[%s6420_s12 + $0xa8] sm:$0xff]  ;;  %v416_v26 = vld [vmem:[%s6420_s12 + $0xb0] sm:$0xff]  ;;  %v417_v27 = vld [vmem:[%s6420_s12 + $0xb8] sm:$0xff] }
  0x2a   : > { %5011 = vmatprep.mubr.msk.f32.mxu0 %vm498_vm0, %v396_v6  ;;  %v418_v28 = vld [vmem:[%s6420_s12 + $0xc0] sm:$0xff]  ;;  %v419_v29 = vld [vmem:[%s6420_s12 + $0xc8] sm:$0xff]  ;;  %v420_v30 = vld [vmem:[%s6420_s12 + $0xd0] sm:$0xff] }
  0x2b   : > { %v421_v31 = vld [vmem:[%s6420_s12 + $0xd8] sm:$0xff]  ;;  %v422_v32 = vld [vmem:[%s6420_s12 + $0xe0] sm:$0xff]  ;;  %v423_v33 = vld [vmem:[%s6420_s12 + $0xe8] sm:$0xff] }
  0x2c   : > { %v424_v34 = vld [vmem:[%s6420_s12 + $0xf0] sm:$0xff]  ;;  %v425_v35 = vld [vmem:[%s6420_s12 + $0xf8] sm:$0xff]  ;;  %v426_v36 = vld [vmem:[%s6420_s12 + $0x100] sm:$0xff] }
  0x2d   : > { %5012 = vmatmul.mubr.msk.f32.gmra.mxu0 %vm498_vm0, %v397_v7  ;;  %v427_v37 = vld [vmem:[%s6420_s12 + $0x108] sm:$0xff]  ;;  %v428_v38 = vld [vmem:[%s6420_s12 + $0x110] sm:$0xff]  ;;  %v429_v39 = vld [vmem:[%s6420_s12 + $0x118] sm:$0xff] }
  0x2e   : > { %5014 = vmatprep.mubr.msk.f32.mxu0 %vm498_vm0, %v398_v8  ;;  %v430_v40 = vld [vmem:[%s6420_s12 + $0x120] sm:$0xff]  ;;  %v431_v41 = vld [vmem:[%s6420_s12 + $0x128] sm:$0xff]  ;;  %v432_v42 = vld [vmem:[%s6420_s12 + $0x130] sm:$0xff] }
  0x2f   : > { %v433_v43 = vld [vmem:[%s6420_s12 + $0x138] sm:$0xff]  ;;  %v434_v44 = vld [vmem:[%s6420_s12 + $0x140] sm:$0xff]  ;;  %v435_v45 = vld [vmem:[%s6420_s12 + $0x148] sm:$0xff] }
  0x30   : > { %v436_v46 = vld [vmem:[%s6420_s12 + $0x150] sm:$0xff]  ;;  %v437_v47 = vld [vmem:[%s6420_s12 + $0x158] sm:$0xff]  ;;  %v438_v48 = vld [vmem:[%s6420_s12 + $0x160] sm:$0xff] }
  0x31   : > { %5015 = vmatmul.mubr.msk.f32.gmra.mxu0 %vm498_vm0, %v399_v9  ;;  %v439_v49 = vld [vmem:[%s6420_s12 + $0x168] sm:$0xff]  ;;  %v440_v50 = vld [vmem:[%s6420_s12 + $0x170] sm:$0xff]  ;;  %v441_v51 = vld [vmem:[%s6420_s12 + $0x178] sm:$0xff] }
  0x32   : > { %5017 = vmatprep.mubr.msk.f32.mxu0 %vm498_vm0, %v400_v10  ;;  %v442_v52 = vld [vmem:[%s6420_s12 + $0x180] sm:$0xff]  ;;  %v443_v53 = vld [vmem:[%s6420_s12 + $0x188] sm:$0xff]  ;;  %v444_v54 = vld [vmem:[%s6420_s12 + $0x190] sm:$0xff] }
  0x33   : > { %v445_v55 = vld [vmem:[%s6420_s12 + $0x198] sm:$0xff]  ;;  %v446_v56 = vld [vmem:[%s6420_s12 + $0x1a0] sm:$0xff]  ;;  %v447_v57 = vld [vmem:[%s6420_s12 + $0x1a8] sm:$0xff] }
  0x34   : > { %v448_v58 = vld [vmem:[%s6420_s12 + $0x1b0] sm:$0xff]  ;;  %v449_v59 = vld [vmem:[%s6420_s12 + $0x1b8] sm:$0xff]  ;;  %v450_v60 = vld [vmem:[%s6420_s12 + $0x1c0] sm:$0xff] }
  0x35   : > { %5018 = vmatmul.mubr.msk.f32.gmra.mxu0 %vm498_vm0, %v401_v11  ;;  %v451_v61 = vld [vmem:[%s6420_s12 + $0x1c8] sm:$0xff]  ;;  %v452_v62 = vld [vmem:[%s6420_s12 + $0x1d0] sm:$0xff]  ;;  %v453_v63 = vld [vmem:[%s6420_s12 + $0x1d8] sm:$0xff] }
  0x36   : > { %5020 = vmatprep.mubr.msk.f32.mxu0 %vm498_vm0, %v402_v12  ;;  %v454_v0 = vld [vmem:[%s6420_s12 + $0x1e0] sm:$0xff]  ;;  %v455_v1 = vld [vmem:[%s6420_s12 + $0x1e8] sm:$0xff]  ;;  %v456_v2 = vld [vmem:[%s6420_s12 + $0x1f0] sm:$0xff] }
  0x37   : > { %v457_v3 = vld [vmem:[%s6420_s12 + $0x1f8] sm:$0xff]  ;;  %v458_v4 = vld [vmem:[%s6420_s12 + $0x200] sm:$0xff]  ;;  %v459_v5 = vld [vmem:[%s6420_s12 + $0x208] sm:$0xff] }
  0x38   : > { %v460_v6 = vld [vmem:[%s6420_s12 + $0x210] sm:$0xff]  ;;  %v461_v7 = vld [vmem:[%s6420_s12 + $0x218] sm:$0xff]  ;;  %v462_v8 = vld [vmem:[%s6420_s12 + $0x220] sm:$0xff] }
  0x39   : > { %5021 = vmatmul.mubr.msk.f32.gmra.mxu0 %vm498_vm0, %v403_v13  ;;  %v463_v9 = vld [vmem:[%s6420_s12 + $0x228] sm:$0xff]  ;;  %v464_v10 = vld [vmem:[%s6420_s12 + $0x230] sm:$0xff]  ;;  %v465_v11 = vld [vmem:[%s6420_s12 + $0x238] sm:$0xff] }
  0x3a   : > { %5023 = vmatprep.mubr.msk.f32.mxu0 %vm498_vm0, %v404_v14  ;;  %v466_v12 = vld [vmem:[%s6420_s12 + $0x240] sm:$0xff]  ;;  %v467_v13 = vld [vmem:[%s6420_s12 + $0x248] sm:$0xff]  ;;  %v468_v14 = vld [vmem:[%s6420_s12 + $0x250] sm:$0xff] }
  0x3d   : > { %5024 = vmatmul.mubr.msk.f32.gmra.mxu0 %vm498_vm0, %v405_v15  ;;  %v469_v15 = vld [vmem:[%s6420_s12 + $0x258] sm:$0xff] }
  0x3e   : > { %5026 = vmatprep.mubr.msk.f32.mxu0 %vm498_vm0, %v406_v16  ;;  %v470_v16 = vld [vmem:[%s6420_s12 + $0x260] sm:$0xff] }
  0x41   : > { %5027 = vmatmul.mubr.msk.f32.gmra.mxu0 %vm498_vm0, %v407_v17  ;;  %v471_v17 = vld [vmem:[%s6420_s12 + $0x268] sm:$0xff] }
  0x42   : > { %5029 = vmatprep.mubr.msk.f32.mxu0 %vm498_vm0, %v408_v18  ;;  %v472_v18 = vld [vmem:[%s6420_s12 + $0x270] sm:$0xff] }
  0x45   : > { %5030 = vmatmul.mubr.msk.f32.gmra.mxu0 %vm498_vm0, %v409_v19  ;;  %v473_v19 = vld [vmem:[%s6420_s12 + $0x278] sm:$0xff] }
  0x46   : > { %5032 = vmatprep.mubr.msk.f32.mxu0 %vm498_vm0, %v410_v20  ;;  %v474_v20 = vld [vmem:[%s6420_s12 + $0x280] sm:$0xff] }
  0x49   : > { %5033 = vmatmul.mubr.msk.f32.gmra.mxu0 %vm498_vm0, %v411_v21  ;;  %v475_v21 = vld [vmem:[%s6420_s12 + $0x288] sm:$0xff] }
  0x4a   : > { %5035 = vmatprep.mubr.msk.f32.mxu0 %vm498_vm0, %v412_v22  ;;  %v476_v22 = vld [vmem:[%s6420_s12 + $0x290] sm:$0xff] }
  0x4d   : > { %5036 = vmatmul.mubr.msk.f32.gmra.mxu0 %vm498_vm0, %v413_v23  ;;  %v477_v23 = vld [vmem:[%s6420_s12 + $0x298] sm:$0xff] }
  0x4e   : > { %5038 = vmatprep.mubr.msk.f32.mxu0 %vm498_vm0, %v414_v24  ;;  %v478_v24 = vld [vmem:[%s6420_s12 + $0x2a0] sm:$0xff] }
  0x51   : > { %5039 = vmatmul.mubr.msk.f32.gmra.mxu0 %vm498_vm0, %v415_v25  ;;  %v479_v25 = vld [vmem:[%s6420_s12 + $0x2a8] sm:$0xff] }
  0x52   : > { %5041 = vmatprep.mubr.msk.f32.mxu0 %vm498_vm0, %v416_v26  ;;  %v480_v26 = vld [vmem:[%s6420_s12 + $0x2b0] sm:$0xff] }
  0x55   : > { %5042 = vmatmul.mubr.msk.f32.gmra.mxu0 %vm498_vm0, %v417_v27  ;;  %v481_v27 = vld [vmem:[%s6420_s12 + $0x2b8] sm:$0xff] }
  0x56   : > { %5044 = vmatprep.mubr.msk.f32.mxu0 %vm498_vm0, %v418_v28  ;;  %v482_v28 = vld [vmem:[%s6420_s12 + $0x2c0] sm:$0xff] }
  0x59   : > { %5045 = vmatmul.mubr.msk.f32.gmra.mxu0 %vm498_vm0, %v419_v29  ;;  %v483_v29 = vld [vmem:[%s6420_s12 + $0x2c8] sm:$0xff] }
  0x5a   : > { %5047 = vmatprep.mubr.msk.f32.mxu0 %vm498_vm0, %v420_v30  ;;  %v484_v30 = vld [vmem:[%s6420_s12 + $0x2d0] sm:$0xff] }
  0x5d   : > { %5048 = vmatmul.mubr.msk.f32.gmra.mxu0 %vm498_vm0, %v421_v31  ;;  %v485_v31 = vld [vmem:[%s6420_s12 + $0x2d8] sm:$0xff] }
  0x5e   : > { %5050 = vmatprep.mubr.msk.f32.mxu0 %vm498_vm0, %v422_v32  ;;  %v486_v32 = vld [vmem:[%s6420_s12 + $0x2e0] sm:$0xff] }
  0x61   : > { %5051 = vmatmul.mubr.msk.f32.gmra.mxu0 %vm498_vm0, %v423_v33  ;;  %v487_v33 = vld [vmem:[%s6420_s12 + $0x2e8] sm:$0xff] }
  0x62   : > { %5053 = vmatprep.mubr.msk.f32.mxu0 %vm498_vm0, %v424_v34  ;;  %v488_v34 = vld [vmem:[%s6420_s12 + $0x2f0] sm:$0xff] }
  0x65   : > { %5054 = vmatmul.mubr.msk.f32.gmra.mxu0 %vm498_vm0, %v425_v35  ;;  %v489_v35 = vld [vmem:[%s6420_s12 + $0x2f8] sm:$0xff] }
  0x66   : > { %5056 = vmatprep.mubr.msk.f32.mxu0 %vm498_vm0, %v426_v36  ;;  %v490_v36 = vld [vmem:[%s6420_s12 + $0x300] sm:$0xff] }
  0x69   : > { %5057 = vmatmul.mubr.msk.f32.gmra.mxu0 %vm498_vm0, %v427_v37  ;;  %v491_v37 = vld [vmem:[%s6420_s12 + $0x308] sm:$0xff] }
  0x6a   : > { %5059 = vmatprep.mubr.msk.f32.mxu0 %vm498_vm0, %v428_v38  ;;  %v492_v38 = vld [vmem:[%s6420_s12 + $0x310] sm:$0xff] }
  0x6d   : > { %5060 = vmatmul.mubr.msk.f32.gmra.mxu0 %vm498_vm0, %v429_v39 }
  0x6e   : > { %5062 = vmatprep.mubr.msk.f32.mxu0 %vm498_vm0, %v430_v40  ;;  %v493_v40 = vld [vmem:[%s6420_s12 + $0x318] sm:$0xff]  ;;  %s9690_s12 = smov 80  }
  0x71   : > { %5063 = vmatmul.mubr.msk.f32.gmra.mxu0 %vm498_vm0, %v431_v41 }
  0x72   : > { %5065 = vmatprep.mubr.msk.f32.mxu0 %vm498_vm0, %v432_v42 }
  0x75   : > { %5066 = vmatmul.mubr.msk.f32.gmra.mxu0 %vm498_vm0, %v433_v43 }
  0x76   : > { %5068 = vmatprep.mubr.msk.f32.mxu0 %vm498_vm0, %v434_v44 }
  0x79   : > { %5069 = vmatmul.mubr.msk.f32.gmra.mxu0 %vm498_vm0, %v435_v45 }
  0x7a   : > { %5071 = vmatprep.mubr.msk.f32.mxu0 %vm498_vm0, %v436_v46 }
  0x7d   : > { %5072 = vmatmul.mubr.msk.f32.gmra.mxu0 %vm498_vm0, %v437_v47 }
  0x7e   : > { %5074 = vmatprep.mubr.msk.f32.mxu0 %vm498_vm0, %v438_v48 }
  0x81   : > { %5075 = vmatmul.mubr.msk.f32.gmra.mxu0 %vm498_vm0, %v439_v49 }
  0x82   : > { %5077 = vmatprep.mubr.msk.f32.mxu0 %vm498_vm0, %v440_v50 }
  0x85   : > { %5078 = vmatmul.mubr.msk.f32.gmra.mxu0 %vm498_vm0, %v441_v51 }
  0x86   : > { %5080 = vmatprep.mubr.msk.f32.mxu0 %vm498_vm0, %v442_v52 }
  0x89   : > { %5081 = vmatmul.mubr.msk.f32.gmra.mxu0 %vm498_vm0, %v443_v53 }
  0x8a   : > { %5083 = vmatprep.mubr.msk.f32.mxu0 %vm498_vm0, %v444_v54 }
  0x8d   : > { %5084 = vmatmul.mubr.msk.f32.gmra.mxu0 %vm498_vm0, %v445_v55 }
  0x8e   : > { %5086 = vmatprep.mubr.msk.f32.mxu0 %vm498_vm0, %v446_v56 }
  0x91   : > { %5087 = vmatmul.mubr.msk.f32.gmra.mxu0 %vm498_vm0, %v447_v57 }
  0x92   : > { %5089 = vmatprep.mubr.msk.f32.mxu0 %vm498_vm0, %v448_v58 }
  0x95   : > { %5090 = vmatmul.mubr.msk.f32.gmra.mxu0 %vm498_vm0, %v449_v59 }
  0x96   : > { %5092 = vmatprep.mubr.msk.f32.mxu0 %vm498_vm0, %v450_v60 }
  0x99   : > { %5093 = vmatmul.mubr.msk.f32.gmra.mxu0 %vm498_vm0, %v451_v61 }
  0x9a   : > { %5095 = vmatprep.mubr.msk.f32.mxu0 %vm498_vm0, %v452_v62 }
  0x9d   : > { %5096 = vmatmul.mubr.msk.f32.gmra.mxu0 %vm498_vm0, %v453_v63 }
  0x9e   : > { %5098 = vmatprep.mubr.msk.f32.mxu0 %vm498_vm0, %v454_v0 }
  0xa1   : > { %5099 = vmatmul.mubr.msk.f32.gmra.mxu0 %vm498_vm0, %v455_v1  ;;  %v3323_v1 = vld [vmem:[%s9586_s3 + $0x70] sm:$0xff] }
  0xa2   : > { %5101 = vmatprep.mubr.msk.f32.mxu0 %vm498_vm0, %v456_v2 }
  0xa5   : > { %5102 = vmatmul.mubr.msk.f32.gmra.mxu0 %vm498_vm0, %v457_v3 }
  0xa6   : > { %5104 = vmatprep.mubr.msk.f32.mxu0 %vm498_vm0, %v458_v4  ;;  %v9511_v4 = vmov 0.0  }
  0xa7   : > { %3395 = vmatprep.subr.mxu1 %v9511_v4 }
  0xa9   : > { %5105 = vmatmul.mubr.msk.f32.gmra.mxu0 %vm498_vm0, %v459_v5 }
  0xaa   : > { %5107 = vmatprep.mubr.msk.f32.mxu0 %vm498_vm0, %v460_v6 }
  0xad   : > { %5108 = vmatmul.mubr.msk.f32.gmra.mxu0 %vm498_vm0, %v461_v7 }
  0xae   : > { %5110 = vmatprep.mubr.msk.f32.mxu0 %vm498_vm0, %v462_v8 }
  0xb1   : > { %5111 = vmatmul.mubr.msk.f32.gmra.mxu0 %vm498_vm0, %v463_v9 }
  0xb2   : > { %5113 = vmatprep.mubr.msk.f32.mxu0 %vm498_vm0, %v464_v10 }
  0xb5   : > { %5114 = vmatmul.mubr.msk.f32.gmra.mxu0 %vm498_vm0, %v465_v11 }
  0xb6   : > { %5116 = vmatprep.mubr.msk.f32.mxu0 %vm498_vm0, %v466_v12 }
  0xb9   : > { %5117 = vmatmul.mubr.msk.f32.gmra.mxu0 %vm498_vm0, %v467_v13 }
  0xba   : > { %5119 = vmatprep.mubr.msk.f32.mxu0 %vm498_vm0, %v468_v14 }
  0xbd   : > { %5120 = vmatmul.mubr.msk.f32.gmra.mxu0 %vm498_vm0, %v469_v15 }
  0xbe   : > { %5122 = vmatprep.mubr.msk.f32.mxu0 %vm498_vm0, %v470_v16 }
  0xc1   : > { %5123 = vmatmul.mubr.msk.f32.gmra.mxu0 %vm498_vm0, %v471_v17 }
  0xc2   : > { %5125 = vmatprep.mubr.msk.f32.mxu0 %vm498_vm0, %v472_v18 }
  0xc5   : > { %5126 = vmatmul.mubr.msk.f32.gmra.mxu0 %vm498_vm0, %v473_v19 }
  0xc6   : > { %5128 = vmatprep.mubr.msk.f32.mxu0 %vm498_vm0, %v474_v20 }
  0xc9   : > { %5129 = vmatmul.mubr.msk.f32.gmra.mxu0 %vm498_vm0, %v475_v21 }
  0xca   : > { %5131 = vmatprep.mubr.msk.f32.mxu0 %vm498_vm0, %v476_v22 }
  0xcd   : > { %5132 = vmatmul.mubr.msk.f32.gmra.mxu0 %vm498_vm0, %v477_v23 }
  0xce   : > { %5134 = vmatprep.mubr.msk.f32.mxu0 %vm498_vm0, %v478_v24 }
  0xd1   : > { %5135 = vmatmul.mubr.msk.f32.gmra.mxu0 %vm498_vm0, %v479_v25 }
  0xd2   : > { %5137 = vmatprep.mubr.msk.f32.mxu0 %vm498_vm0, %v480_v26 }
  0xd5   : > { %5138 = vmatmul.mubr.msk.f32.gmra.mxu0 %vm498_vm0, %v481_v27 }
  0xd6   : > { %5140 = vmatprep.mubr.msk.f32.mxu0 %vm498_vm0, %v482_v28 }
  0xd9   : > { %5141 = vmatmul.mubr.msk.f32.gmra.mxu0 %vm498_vm0, %v483_v29 }
  0xda   : > { %5143 = vmatprep.mubr.msk.f32.mxu0 %vm498_vm0, %v484_v30 }
  0xdd   : > { %5144 = vmatmul.mubr.msk.f32.gmra.mxu0 %vm498_vm0, %v485_v31 }
  0xde   : > { %5146 = vmatprep.mubr.msk.f32.mxu0 %vm498_vm0, %v486_v32 }
  0xe1   : > { %5147 = vmatmul.mubr.msk.f32.gmra.mxu0 %vm498_vm0, %v487_v33 }
  0xe2   : > { %5149 = vmatprep.mubr.msk.f32.mxu0 %vm498_vm0, %v488_v34  ;;  %v3324_v34 = vld [vmem:[%s9586_s3 + $0x78] sm:$0xff] }
  0xe3   : > { %3396 = vmatpush1.msra.mxu1 %v3324_v34  ;;  %v3321_v34 = vld [vmem:[%s9586_s3 + $0x60] sm:$0xff] }
  0xe4   : > { %3397 = vmatprep.subr.mxu1 %v9511_v4 }
  0xe5   : > { %5150 = vmatmul.mubr.msk.f32.gmra.mxu0 %vm498_vm0, %v489_v35  ;;  %3398 = vmatpush1.msra.mxu1 %v3323_v1  ;;  %v3320_v1 = vld [vmem:[%s9586_s3 + $0x58] sm:$0xff] }
  0xe6   : > { %5152 = vmatprep.mubr.msk.f32.mxu0 %vm498_vm0, %v490_v36  ;;  %3399 = vmatprep.subr.mxu1 %v9511_v4 }
  0xe9   : > { %v6618_v39 = vpop.f32.mrf.mxu0  ;;  %5153 = vmatmul.mubr.msk.f32.gmra.mxu0 %vm498_vm0, %v491_v37 }
  0xea   : > { %5155 = vmatprep.mubr.msk.f32.mxu0 %vm498_vm0, %v492_v38 }
  0xeb   : > { %v6623_v41 = vpop.f32.mrf.mxu0 }
  0xed   : > { %v6625_v42 = vpop.f32.mrf.mxu0  ;;  %5156 = vmatmul.mubr.msk.f32.gmra.mxu0 %vm498_vm0, %v493_v40 }
  0xef   : > { %v6628_v43 = vpop.f32.mrf.mxu0 }
  0xf1   : > { %v6630_v44 = vpop.f32.mrf.mxu0 }
  0xf3   : > { %v6632_v45 = vpop.f32.mrf.mxu0 }
  0xf5   : > { %v6634_v46 = vpop.f32.mrf.mxu0 }
  0xf7   : > { %v6636_v47 = vpop.f32.mrf.mxu0 }
  0xf9   : > { %v6638_v48 = vpop.f32.mrf.mxu0 }
  0xfb   : > { %v6640_v49 = vpop.f32.mrf.mxu0 }
  0xfd   : > { %v6642_v50 = vpop.f32.mrf.mxu0 }
  0xff   : > { %v6644_v51 = vpop.f32.mrf.mxu0 }
 0x101   : > { %v6646_v52 = vpop.f32.mrf.mxu0 }
 0x103   : > { %v6648_v53 = vpop.f32.mrf.mxu0 }
 0x105   : > { %v6650_v54 = vpop.f32.mrf.mxu0 }
 0x107   : > { %v6652_v55 = vpop.f32.mrf.mxu0 }
 0x109   : > { %v6654_v56 = vpop.f32.mrf.mxu0 }
 0x10a   : > { %9572 = vst [vmem:[#allocation9_spill] sm:$0xff] %v6654_v56 }
 0x10b   : > { %v6656_v57 = vpop.f32.mrf.mxu0 }
 0x10d   : > { %v6658_v58 = vpop.f32.mrf.mxu0 }
 0x10e   : > { %9573 = vst [vmem:[#allocation10_spill] sm:$0xff] %v6658_v58 }
 0x10f   : > { %v6660_v59 = vpop.f32.mrf.mxu0 }
 0x111   : > { %v6662_v60 = vpop.f32.mrf.mxu0 }
 0x112   : > { %9574 = vst [vmem:[#allocation11_spill] sm:$0xff] %v6662_v60 }
 0x113   : > { %v6664_v61 = vpop.f32.mrf.mxu0 }
 0x114   : > { %9575 = vst [vmem:[#allocation12_spill] sm:$0xff] %v6664_v61 }
 0x115   : > { %v6666_v62 = vpop.f32.mrf.mxu0 }
 0x116   : > { %9576 = vst [vmem:[#allocation13_spill] sm:$0xff] %v6666_v62  ;;  %v3322_v62 = vld [vmem:[%s9586_s3 + $0x68] sm:$0xff] }
 0x117   : > { %v6668_v63 = vpop.f32.mrf.mxu0  ;;  %3400 = vmatpush1.msra.mxu1 %v3322_v62  ;;  %v3319_v62 = vld [vmem:[%s9586_s3 + $0x50] sm:$0xff] }
 0x118   : > { %9577 = vst [vmem:[#allocation14_spill] sm:$0xff] %v6668_v63  ;;  %3401 = vmatprep.subr.mxu1 %v9511_v4 }
 0x119   : > { %v6670_v0 = vpop.f32.mrf.mxu0  ;;  %3402 = vmatpush1.msra.mxu1 %v3321_v34  ;;  %v3318_v34 = vld [vmem:[%s9586_s3 + $0x48] sm:$0xff] }
 0x11a   : > { %3403 = vmatprep.subr.mxu1 %v9511_v4 }
 0x11b   : > { %v6674_v2 = vpop.f32.mrf.mxu0  ;;  %3404 = vmatpush1.msra.mxu1 %v3320_v1  ;;  %v3317_v1 = vld [vmem:[%s9586_s3 + $0x40] sm:$0xff] }
 0x11c   : > { %9578 = vst [vmem:[#allocation15_spill] sm:$0xff] %v6674_v2  ;;  %3405 = vmatprep.subr.mxu1 %v9511_v4 }
 0x11d   : > { %v6676_v3 = vpop.f32.mrf.mxu0  ;;  %3406 = vmatpush1.msra.mxu1 %v3319_v62  ;;  %v3316_v62 = vld [vmem:[%s9586_s3 + $0x38] sm:$0xff] }
 0x11e   : > { %3407 = vmatprep.subr.mxu1 %v9511_v4 }
 0x11f   : > { %v6680_v5 = vpop.f32.mrf.mxu0  ;;  %3408 = vmatpush1.msra.mxu1 %v3318_v34  ;;  %v3315_v34 = vld [vmem:[%s9586_s3 + $0x30] sm:$0xff] }
 0x120   : > { %3409 = vmatprep.subr.mxu1 %v9511_v4 }
 0x121   : > { %v6684_v7 = vpop.f32.mrf.mxu0  ;;  %3410 = vmatpush1.msra.mxu1 %v3317_v1  ;;  %v3314_v1 = vld [vmem:[%s9586_s3 + $0x28] sm:$0xff] }
 0x122   : > { %3411 = vmatprep.subr.mxu1 %v9511_v4 }
 0x123   : > { %v6688_v9 = vpop.f32.mrf.mxu0  ;;  %3412 = vmatpush1.msra.mxu1 %v3316_v62  ;;  %v3313_v62 = vld [vmem:[%s9586_s3 + $0x20] sm:$0xff] }
 0x124   : > { %3413 = vmatprep.subr.mxu1 %v9511_v4 }
 0x125   : > { %v6692_v11 = vpop.f32.mrf.mxu0  ;;  %3414 = vmatpush1.msra.mxu1 %v3315_v34  ;;  %v3312_v34 = vld [vmem:[%s9586_s3 + $0x18] sm:$0xff] }
 0x126   : > { %3415 = vmatprep.subr.mxu1 %v9511_v4 }
 0x127   : > { %v6696_v13 = vpop.f32.mrf.mxu0  ;;  %3416 = vmatpush1.msra.mxu1 %v3314_v1  ;;  %v3311_v1 = vld [vmem:[%s9586_s3 + $0x10] sm:$0xff] }
 0x128   : > { %3417 = vmatprep.subr.mxu1 %v9511_v4 }
 0x129   : > { %v6700_v15 = vpop.f32.mrf.mxu0  ;;  %3418 = vmatpush1.msra.mxu1 %v3313_v62  ;;  %v9593_v62 = vmax.f32 %v6623_v41, %v6670_v0  ;;  %v3309_v41 = vld [vmem:[%s9586_s3] sm:$0xff] }
 0x12a   : > { %3419 = vmatprep.subr.mxu1 %v9511_v4 }
 0x12b   : > { %v6704_v17 = vpop.f32.mrf.mxu0  ;;  %3420 = vmatpush1.msra.mxu1 %v3312_v34  ;;  %v6886_v34 = vld [vmem:[%s9594_s2] ss:$0 sm:$0xff] }
 0x12c   : > { %3421 = vmatprep.subr.mxu1 %v9511_v4 }
 0x12d   : > { %v6708_v19 = vpop.f32.mrf.mxu0  ;;  %3422 = vmatpush1.msra.mxu1 %v3311_v1 }
 0x12e   : > { %3423 = vmatprep.subr.mxu1 %v9511_v4 }
 0x12f   : > { %v6712_v21 = vpop.f32.mrf.mxu0 }
 0x131   : > { %v6716_v23 = vpop.f32.mrf.mxu0 }
 0x133   : > { %v6720_v25 = vpop.f32.mrf.mxu0 }
 0x135   : > { %v6724_v27 = vpop.f32.mrf.mxu0 }
 0x137   : > { %v6728_v29 = vpop.f32.mrf.mxu0 }
 0x139   : > { %v6732_v31 = vpop.f32.mrf.mxu0 }
 0x13b   : > { %v6736_v33 = vpop.f32.mrf.mxu0 }
 0x13d   : > { %v6740_v35 = vpop.f32.mrf.mxu0 }
 0x13f   : > { %v6744_v37 = vpop.f32.mrf.mxu0 }
 0x140   : > { %9579 = vst [vmem:[#allocation16_spill] sm:$0xff] %v6744_v37 }
 0x141   : > { %v6748_v40 = vpop.f32.mrf.mxu0 }
 0x142   : > { %9580 = vst [vmem:[#allocation17_spill] sm:$0xff] %v6748_v40 }
 0x143   : > { %v6752_v30 = vpop.f32.mrf.mxu0 }
 0x144   : > { %9581 = vst [vmem:[#allocation18_spill] sm:$0xff] %v6752_v30 }
 0x145   : > { %v6756_v28 = vpop.f32.mrf.mxu0 }
 0x146   : > { %9582 = vst [vmem:[#allocation19_spill] sm:$0xff] %v6756_v28 }
 0x147   : > { %v6760_v26 = vpop.f32.mrf.mxu0 }
 0x148   : > { %9583 = vst [vmem:[#allocation20_spill] sm:$0xff] %v6760_v26 }
 0x149   : > { %v6764_v24 = vpop.f32.mrf.mxu0 }
 0x14a   : > { %9584 = vst [vmem:[#allocation21_spill] sm:$0xff] %v6764_v24 }
 0x14b   : > { %v6768_v22 = vpop.f32.mrf.mxu0 }
 0x14c   : > { %9585 = vst [vmem:[#allocation22_spill] sm:$0xff] %v6768_v22 }
 0x14d   : > { %v6772_v20 = vpop.f32.mrf.mxu0 }
 0x14f   : > { %v6774_v18 = vpop.f32.mrf.mxu0 }
 0x151   : > { %v6776_v36 = vpop.f32.mrf.mxu0 }
 0x153   : > { %v6778_v16 = vpop.f32.mrf.mxu0 }
 0x155   : > { %v6780_v14 = vpop.f32.mrf.mxu0 }
 0x157   : > { %v6782_v38 = vpop.f32.mrf.mxu0 }
 0x159   : > { %v6784_v12 = vpop.f32.mrf.mxu0 }
 0x15b   : > { %v6786_v32 = vpop.f32.mrf.mxu0 }
 0x15d   : > { %v6788_v10 = vpop.f32.mrf.mxu0 }
 0x15f   : > { %v6790_v8 = vpop.f32.mrf.mxu0 }
 0x161   : > { %v6795_v6 = vpop.f32.mrf.mxu0 }
 0x163   : > { %v6801_v22 = vpop.f32.mrf.mxu0 }
 0x165   : > { %v6807_v24 = vpop.f32.mrf.mxu0 }
 0x167   : > { %v6813_v2 = vpop.f32.mrf.mxu0 }
 0x169   : > { %v6819_v26 = vpop.f32.mrf.mxu0 }
 0x16b   : > { %v6825_v60 = vpop.f32.mrf.mxu0 }
 0x16d   : > { %v6831_v28 = vpop.f32.mrf.mxu0 }
 0x16e   : > { %9587 = vst [vmem:[#allocation23_spill] sm:$0xff] %v6831_v28 }
 0x16f   : > { %v6837_v63 = vpop.f32.mrf.mxu0 }
 0x171   : > { %v6843_v30 = vpop.f32.mrf.mxu0 }
 0x172   : > { %9588 = vst [vmem:[#allocation24_spill] sm:$0xff] %v6843_v30 }
 0x173   : > { %v6849_v58 = vpop.f32.mrf.mxu0 }
 0x175   : > { %v6855_v40 = vpop.f32.mrf.mxu0 }
 0x176   : > { %9589 = vst [vmem:[#allocation25_spill] sm:$0xff] %v6855_v40 }
 0x177   : > { %v6861_v30 = vpop.f32.mrf.mxu0 }
 0x178   : > { %9590 = vst [vmem:[#allocation26_spill] sm:$0xff] %v6861_v30  ;;  %v1389_v30 = vmax.f32 %v9593_v62, %v6774_v18  ;;  %v9596_v18 = vmax.f32 %v6628_v43, %v6676_v3  ;;  %v3339_v43 = vld [vmem:[%s9586_s3 + $0xf0] sm:$0xff] }
 0x179   : > { %v6867_v61 = vpop.f32.mrf.mxu0 }
 0x17a   : > { %9591 = vst [vmem:[#allocation27_spill] sm:$0xff] %v6867_v61  ;;  %v3310_v61 = vld [vmem:[%s9586_s3 + $0x8] sm:$0xff]  ;;  %v1391_v1 = vmax.f32 %v9596_v18, %v6778_v16  ;;  %v9598_v16 = vmax.f32 %v6632_v45, %v6684_v7  ;;  %v9599_v18 = vmax.f32 %v6625_v42, %v6688_v9 }
 0x17b   : > { %v6873_v40 = vpop.f32.mrf.mxu0  ;;  %3424 = vmatpush1.msra.mxu1 %v3310_v61  ;;  %v3340_v61 = vld [vmem:[%s9586_s3 + $0xf8] sm:$0xff] }
 0x17c   : > { %9592 = vst [vmem:[#allocation28_spill] sm:$0xff] %v6873_v40  ;;  %3425 = vmatprep.subr.mxu1 %v9511_v4 }
 0x17d   : > { %v5121_v37 = vpop.f32.mrf.mxu0  ;;  %3426 = vmatpush1.msra.mxu1 %v3309_v41 }
 0x17e   : > { %v1414_v40 = vmax.f32 %v1389_v30, %v5121_v37  ;;  %3427 = vmatprep.subr.mxu1 %v9511_v4  ;;  %v9597_v37 = vmax.f32 %v6618_v39, %v6680_v5 }
 0x17f   : > { %v6892_v0 = vpop.f32.mrf.mxu0  ;;  %3428 = vmatpush2.msra.mxu1 %v3340_v61 }
 0x180   : > { %9595 = vst [vmem:[#allocation29_spill] sm:$0xff] %v6892_v0  ;;  %v1446_v62 = vadd.f32 %v6886_v34, %v1414_v40  ;;  %v1390_v0 = vmax.f32 %v9597_v37, %v6772_v20  ;;  %3429 = vmatprep.subr.mxu1 %v9511_v4  ;;  %v1393_v40 = vmax.f32 %v9598_v16, %v6782_v38  ;;  %v3338_v20 = vld [vmem:[%s9586_s3 + $0xe8] sm:$0xff] }
 0x181   : > { %v5124_v30 = vpop.f32.mrf.mxu0  ;;  %3430 = vmatpush2.msra.mxu1 %v3339_v43  ;;  %v9601_v37 = vmax.f32 %v6630_v44, %v6696_v13  ;;  %v9602_v16 = vmax.f32 %v6640_v49, %v6700_v15  ;;  %v9603_v49 = vmax.f32 %v6634_v46, %v6704_v17 }
 0x182   : > { %v1471_v56 = vmax.f32 %v1446_v62, 0.0  ;;  %v1416_v28 = vmax.f32 %v1391_v1, %v5124_v30  ;;  %3431 = vmatprep.subr.mxu1 %v9511_v4  ;;  %v1392_v1 = vmax.f32 %v9599_v18, %v6776_v36  ;;  %v3336_v30 = vld [vmem:[%s9586_s3 + $0xd8] sm:$0xff] }
 0x183   : > { %v1245_v3 = vpop.f32.mrf.mxu0  ;;  %3432 = vmatpush2.msra.mxu1 %v3338_v20  ;;  %v3334_v20 = vld [vmem:[%s9586_s3 + $0xc8] sm:$0xff] }
 0x184   : > { %1497 = vst.msk [vmem:[#allocation2] sm:$0xff] %vm1496_vm1, %v1471_v56  ;;  %v1448_v39 = vadd.f32 %v6886_v34, %v1416_v28  ;;  %v1415_v5 = vmax.f32 %v1390_v0, %v1245_v3  ;;  %v3337_v28 = vld [vmem:[%s9586_s3 + $0xe0] sm:$0xff]  ;;  %3433 = vmatprep.subr.mxu1 %v9511_v4  ;;  %v9600_v0 = vmax.f32 %v6636_v47, %v6692_v11 }
 0x185   : > { %v5127_v41 = vpop.f32.mrf.mxu0  ;;  %3434 = vmatpush2.msra.mxu1 %v3337_v28  ;;  %v1394_v47 = vmax.f32 %v9601_v37, %v6780_v14  ;;  %v9605_v28 = vmax.f32 %v6638_v48, %v6712_v21 }
 0x186   : > { %v1473_v45 = vmax.f32 %v1448_v39, 0.0  ;;  %v1447_v7 = vadd.f32 %v6886_v34, %v1415_v5  ;;  %v1418_v56 = vmax.f32 %v1393_v40, %v5127_v41  ;;  %v1395_v62 = vmax.f32 %v9600_v0, %v6786_v32  ;;  %3435 = vmatprep.subr.mxu1 %v9511_v4  ;;  %v3335_v5 = vld [vmem:[%s9586_s3 + $0xd0] sm:$0xff] }
 0x187   : > { %v1255_v38 = vpop.f32.mrf.mxu0  ;;  %3436 = vmatpush2.msra.mxu1 %v3336_v30  ;;  %v1397_v40 = vmax.f32 %v9602_v16, %v6790_v8  ;;  %v1396_v8 = vmax.f32 %v9603_v49, %v6784_v12  ;;  %v3333_v30 = vld [vmem:[%s9586_s3 + $0xc0] sm:$0xff] }
 0x188   : > { %1499 = vst.msk [vmem:[#allocation2 + $0x10] sm:$0xff] %vm1496_vm1, %v1473_v45  ;;  %v1472_v42 = vmax.f32 %v1447_v7, 0.0  ;;  %v1450_v9 = vadd.f32 %v6886_v34, %v1418_v56  ;;  %v1417_v36 = vmax.f32 %v1392_v1, %v1255_v38  ;;  %3437 = vmatprep.subr.mxu1 %v9511_v4  ;;  %v9604_v45 = vmax.f32 %v6644_v51, %v6708_v19 }
 0x189   : > { %v5130_v61 = vpop.f32.mrf.mxu0  ;;  %3438 = vmatpush2.msra.mxu1 %v3335_v5  ;;  %v1398_v38 = vmax.f32 %v9605_v28, %v6788_v10 }
 0x18a   : > { %1498 = vst.msk [vmem:[#allocation2 + $0x8] sm:$0xff] %vm1496_vm1, %v1472_v42  ;;  %v1475_v11 = vmax.f32 %v1450_v9, 0.0  ;;  %v1449_v32 = vadd.f32 %v6886_v34, %v1417_v36  ;;  %v1420_v43 = vmax.f32 %v1395_v62, %v5130_v61  ;;  %3439 = vmatprep.subr.mxu1 %v9511_v4  ;;  %v1399_v7 = vmax.f32 %v9604_v45, %v6801_v22 }
 0x18b   : > { %v1265_v3 = vpop.f32.mrf.mxu0  ;;  %3440 = vmatpush2.msra.mxu1 %v3334_v20  ;;  %v9606_v22 = vmax.f32 %v6648_v53, %v6716_v23  ;;  %v9607_v53 = vmax.f32 %v6642_v50, %v6720_v25  ;;  %v9608_v50 = vmax.f32 %v6652_v55, %v6724_v27  ;;  %v9609_v20 = vmax.f32 %v6646_v52, %v6728_v29 }
 0x18c   : > { %1501 = vst.msk [vmem:[#allocation2 + $0x20] sm:$0xff] %vm1496_vm1, %v1475_v11  ;;  %v1474_v39 = vmax.f32 %v1449_v32, 0.0  ;;  %v1452_v44 = vadd.f32 %v6886_v34, %v1420_v43  ;;  %v1419_v13 = vmax.f32 %v1394_v47, %v1265_v3  ;;  %3441 = vmatprep.subr.mxu1 %v9511_v4  ;;  %v9610_v52 = vmax.f32 %v6656_v57, %v6732_v31 }
 0x18d   : > { %v5133_v14 = vpop.f32.mrf.mxu0  ;;  %v1401_v62 = vmax.f32 %v9606_v22, %v6813_v2  ;;  %v1400_v2 = vmax.f32 %v9607_v53, %v6795_v6  ;;  %3442 = vmatpush2.msra.mxu1 %v3333_v30  ;;  %v1403_v6 = vmax.f32 %v9608_v50, %v6825_v60  ;;  %v1402_v55 = vmax.f32 %v9609_v20, %v6807_v24  ;;  %v9615_v30 = vld [vmem:[#allocation16_spill] sm:$0xff] }
 0x18e   : > { %1500 = vst.msk [vmem:[#allocation2 + $0x18] sm:$0xff] %vm1496_vm1, %v1474_v39  ;;  %v1477_v15 = vmax.f32 %v1452_v44, 0.0  ;;  %v1451_v41 = vadd.f32 %v6886_v34, %v1419_v13  ;;  %v1422_v18 = vmax.f32 %v1397_v40, %v5133_v14  ;;  %3443 = vmatprep.subr.mxu1 %v9511_v4  ;;  %v1405_v24 = vmax.f32 %v9610_v52, %v6837_v63  ;;  %v9621_v20 = vld [vmem:[#allocation24_spill] sm:$0xff] }
 0x18f   : > { %v1275_v1 = vpop.f32.mrf.mxu0  ;;  %v9611_v57 = vmax.f32 %v6650_v54, %v6736_v33  ;;  %v9612_v22 = vmax.f32 %v6660_v59, %v6740_v35 }
 0x190   : > { %1503 = vst.msk [vmem:[#allocation2 + $0x30] sm:$0xff] %vm1496_vm1, %v1477_v15  ;;  %v1476_v56 = vmax.f32 %v1451_v41, 0.0  ;;  %v1454_v46 = vadd.f32 %v6886_v34, %v1422_v18  ;;  %v1421_v12 = vmax.f32 %v1396_v8, %v1275_v1 }
 0x191   : > { %v5136_v17 = vpop.f32.mrf.mxu0  ;;  %v1624_v36 = vld [vmem:[#allocation2 + $0xf] sm:$0xff]  ;;  %v1539_v37 = vld [vmem:[#allocation2 + $0x1] sm:$0xff]  ;;  %v1404_v63 = vmax.f32 %v9611_v57, %v6819_v26  ;;  %v1407_v54 = vmax.f32 %v9612_v22, %v6849_v58 }
 0x192   : > { %1502 = vst.msk [vmem:[#allocation2 + $0x28] sm:$0xff] %vm1496_vm1, %v1476_v56  ;;  %v1479_v0 = vmax.f32 %v1454_v46, 0.0  ;;  %v1453_v51 = vadd.f32 %v6886_v34, %v1421_v12  ;;  %v1424_v19 = vmax.f32 %v1399_v7, %v5136_v17  ;;  %v1573_v40 = vld [vmem:[#allocation2 + $0x3] sm:$0xff]  ;;  %v1607_v33 = vld [vmem:[#allocation2 + $0xe] sm:$0xff] }
 0x193   : > { %v1285_v42 = vpop.f32.mrf.mxu0  ;;  %v6984_v9 = vld [vmem:[#allocation2 + $0x20] sm:$0xff]  ;;  %v1540_v17 = vld [vmem:[#allocation2 + $0x9] sm:$0xff] }
 0x194   : > { %1505 = vst.msk [vmem:[#allocation2 + $0x40] sm:$0xff] %vm1496_vm1, %v1479_v0  ;;  %v1478_v61 = vmax.f32 %v1453_v51, 0.0  ;;  %v1456_v48 = vadd.f32 %v6886_v34, %v1424_v19  ;;  %v1423_v10 = vmax.f32 %v1398_v38, %v1285_v42  ;;  %v5242_v21 = vpack.i.bf16 %v1624_v36, %v6984_v9  ;;  %v1556_v27 = vld [vmem:[#allocation2 + $0x2] sm:$0xff]  ;;  %v1557_v58 = vld [vmem:[#allocation2 + $0xa] sm:$0xff] }
 0x195   : > { %v5139_v23 = vpop.f32.mrf.mxu0  ;;  %v6996_v47 = vld [vmem:[#allocation2 + $0x12] sm:$0xff]  ;;  %v1650_v11 = vld [vmem:[#allocation2 + $0x1d] sm:$0xff] }
 0x196   : > { %1504 = vst.msk [vmem:[#allocation2 + $0x38] sm:$0xff] %vm1496_vm1, %v1478_v61  ;;  %v1481_v32 = vmax.f32 %v1456_v48, 0.0  ;;  %v1455_v43 = vadd.f32 %v6886_v34, %v1423_v10  ;;  %v1426_v3 = vmax.f32 %v1401_v62, %v5139_v23  ;;  %5243 = vrot.lane.b32.xlu1 %v5242_v21, %s9509_s13  ;;  %v5247_v16 = vpack.i.bf16 %v1539_v37, %v6996_v47  ;;  %v7007_v39 = vld [vmem:[#allocation2 + $0x1c] sm:$0xff]  ;;  %v1590_v1 = vld [vmem:[#allocation2 + $0x4] sm:$0xff]  ;;  %v9614_v21 = vld [vmem:[#allocation9_spill] sm:$0xff] }
 0x197   : > { %v1295_v25 = vpop.f32.mrf.mxu0  ;;  %v5257_v5 = vpack.i.bf16 %v1573_v40, %v1650_v11  ;;  %v7016_v49 = vld [vmem:[#allocation2 + $0x1e] sm:$0xff]  ;;  %v5252_v18 = vpack.i.bf16 %v1556_v27, %v7007_v39  ;;  %v9616_v53 = vmax.f32 %v9614_v21, %v9615_v30  ;;  %v7053_v35 = vld [vmem:[#allocation2 + $0x30] sm:$0xff] }
 0x198   : > { %1507 = vst.msk [vmem:[#allocation2 + $0x50] sm:$0xff] %vm1496_vm1, %v1481_v32  ;;  %v1480_v44 = vmax.f32 %v1455_v43, 0.0  ;;  %v1458_v13 = vadd.f32 %v6886_v34, %v1426_v3  ;;  %v1425_v14 = vmax.f32 %v1400_v2, %v1295_v25  ;;  %5248 = vrot.lane.b32.xlu0 %v5247_v16, %s9561_s14  ;;  %v7026_v45 = vld [vmem:[#allocation2 + $0x1a] sm:$0xff]  ;;  %v5262_v12 = vpack.i.bf16 %v1590_v1, %v7016_v49  ;;  %v9618_v3 = vld [vmem:[#allocation12_spill] sm:$0xff]  ;;  %v9619_v16 = vld [vmem:[#allocation17_spill] sm:$0xff] }
 0x199   : > { %v5142_v60 = vpop.f32.mrf.mxu0  ;;  %v1626_v28 = vld [vmem:[#allocation2 + $0x1f] sm:$0xff]  ;;  %v5267_v19 = vpack.i.bf16 %v1540_v17, %v7026_v45  ;;  %v9617_v43 = vld [vmem:[#allocation26_spill] sm:$0xff]  ;;  %v9620_v50 = vmax.f32 %v9618_v3, %v9619_v16 }
 0x19a   : > { %1506 = vst.msk [vmem:[#allocation2 + $0x48] sm:$0xff] %vm1496_vm1, %v1480_v44  ;;  %v1483_v8 = vmax.f32 %v1458_v13, 0.0  ;;  %v1457_v15 = vadd.f32 %v6886_v34, %v1425_v14  ;;  %v1428_v41 = vmax.f32 %v1403_v6, %v5142_v60  ;;  %5258 = vrot.lane.b32.xlu1 %v5257_v5, %s9507_s15  ;;  %v7044_v62 = vld [vmem:[#allocation2 + $0x24] sm:$0xff]  ;;  %v5272_v48 = vpack.i.bf16 %v1607_v33, %v1626_v28  ;;  %v9613_v10 = vld [vmem:[#allocation23_spill] sm:$0xff]  ;;  %v9623_v60 = vld [vmem:[#allocation18_spill] sm:$0xff] }
 0x19b   : > { %v1305_v29 = vpop.f32.mrf.mxu0  ;;  %v1406_v2 = vmax.f32 %v9616_v53, %v9613_v10  ;;  %v5282_v32 = vpack.i.bf16 %v1557_v58, %v7044_v62  ;;  %v1409_v6 = vmax.f32 %v9620_v50, %v9617_v43  ;;  %v1651_v40 = vld [vmem:[#allocation2 + $0x25] sm:$0xff]  ;;  %v5277_v5 = vpack.i.bf16 %v1626_v28, %v7053_v35  ;;  %v9630_v22 = vld [vmem:[#allocation11_spill] sm:$0xff]  ;;  %v3331_v3 = vld [vmem:[%s9586_s3 + $0xb0] sm:$0xff] }
 0x19c   : > { %1509 = vst.msk [vmem:[#allocation2 + $0x60] sm:$0xff] %vm1496_vm1, %v1483_v8  ;;  %v1482_v7 = vmax.f32 %v1457_v15, 0.0  ;;  %v1460_v56 = vadd.f32 %v6886_v34, %v1428_v41  ;;  %v1427_v46 = vmax.f32 %v1402_v55, %v1305_v29  ;;  %5253 = vrot.lane.b32.xlu0 %v5252_v18, %s9526_s16  ;;  %v9622_v55 = vld [vmem:[#allocation10_spill] sm:$0xff]  ;;  %v1574_v41 = vld [vmem:[#allocation2 + $0xb] sm:$0xff] }
 0x19d   : > { %v5145_v31 = vpop.f32.mrf.mxu0  ;;  %v9624_v27 = vmax.f32 %v9622_v55, %v9623_v60  ;;  %v7071_v18 = vld [vmem:[#allocation2 + $0x2a] sm:$0xff]  ;;  %v5287_v1 = vpack.i.bf16 %v1574_v41, %v1651_v40  ;;  %v3332_v53 = vld [vmem:[%s9586_s3 + $0xb8] sm:$0xff] }
 0x19e   : > { %1508 = vst.msk [vmem:[#allocation2 + $0x58] sm:$0xff] %vm1496_vm1, %v1482_v7  ;;  %v1485_v38 = vmax.f32 %v1460_v56, 0.0  ;;  %v1459_v0 = vadd.f32 %v6886_v34, %v1427_v46  ;;  %v1430_v51 = vmax.f32 %v1405_v24, %v5145_v31  ;;  %5263 = vrot.lane.b32.xlu1 %v5262_v12, %s9534_s22  ;;  %v9625_v7 = vld [vmem:[#allocation28_spill] sm:$0xff]  ;;  %v9626_v56 = vld [vmem:[#allocation14_spill] sm:$0xff]  ;;  %v9627_v46 = vld [vmem:[#allocation19_spill] sm:$0xff]  ;;  %3444 = vmatpush2.msra.mxu1 %v3332_v53 }
 0x19f   : > { %v1315_v26 = vpop.f32.mrf.mxu0  ;;  %v1408_v8 = vmax.f32 %v9624_v27, %v9621_v20  ;;  %v9628_v12 = vmax.f32 %v9626_v56, %v9627_v46  ;;  %v7080_v31 = vld [vmem:[#allocation2 + $0x10] sm:$0xff]  ;;  %v7082_v17 = vld [vmem:[#allocation2 + $0x26] sm:$0xff]  ;;  %3445 = vmatprep.subr.mxu1 %v9511_v4 }
 0x1a0   : > { %1511 = vst.msk [vmem:[#allocation2 + $0x70] sm:$0xff] %vm1496_vm1, %v1485_v38  ;;  %v1484_v42 = vmax.f32 %v1459_v0, 0.0  ;;  %v1462_v36 = vadd.f32 %v6886_v34, %v1430_v51  ;;  %v1429_v61 = vmax.f32 %v1404_v63, %v1315_v26  ;;  %5268 = vrot.lane.b32.xlu0 %v5267_v19, %s9561_s14  ;;  %v5292_v51 = vpack.i.bf16 %v7080_v31, %v7071_v18  ;;  %v9629_v19 = vld [vmem:[#allocation25_spill] sm:$0xff]  ;;  %v1608_v27 = vld [vmem:[#allocation2 + $0x16] sm:$0xff] }
 0x1a1   : > { %v5148_v59 = vpop.f32.mrf.mxu0  ;;  %v1411_v57 = vmax.f32 %v9628_v12, %v9625_v7  ;;  %v9635_v58 = vld [vmem:[#allocation21_spill] sm:$0xff]  ;;  %3446 = vmatpush2.msra.mxu1 %v3331_v3  ;;  %v7197_v3 = vld [vmem:[#allocation2 + $0x40] sm:$0xff] }
 0x1a2   : > { %1510 = vst.msk [vmem:[#allocation2 + $0x68] sm:$0xff] %vm1496_vm1, %v1484_v42  ;;  %v1487_v23 = vmax.f32 %v1462_v36, 0.0  ;;  %v1461_v37 = vadd.f32 %v6886_v34, %v1429_v61  ;;  %v1432_v11 = vmax.f32 %v1407_v54, %v5148_v59  ;;  %5273 = vrot.lane.b32.xlu1 %v5272_v48, %s9532_s24  ;;  %v9631_v54 = vld [vmem:[#allocation20_spill] sm:$0xff]  ;;  %v1591_v36 = vld [vmem:[#allocation2 + $0xc] sm:$0xff]  ;;  %v9634_v59 = vld [vmem:[#allocation15_spill] sm:$0xff]  ;;  %3447 = vmatprep.subr.mxu1 %v9511_v4 }
 0x1a3   : > { %v1325_v25 = vpop.f32.mrf.mxu0  ;;  %v9632_v26 = vmax.f32 %v9630_v22, %v9631_v54  ;;  %v7093_v61 = vld [vmem:[#allocation2 + $0x22] sm:$0xff]  ;;  %v5297_v30 = vpack.i.bf16 %v1591_v36, %v7082_v17  ;;  %v7126_v55 = vld [vmem:[#allocation2 + $0x2c] sm:$0xff] }
 0x1a4   : > { %1513 = vst.msk [vmem:[#allocation2 + $0x80] sm:$0xff] %vm1496_vm1, %v1487_v23  ;;  %v1486_v44 = vmax.f32 %v1461_v37, 0.0  ;;  %v1464_v13 = vadd.f32 %v6886_v34, %v1432_v11  ;;  %v1431_v14 = vmax.f32 %v1406_v2, %v1325_v25  ;;  %5283 = vrot.lane.b32.xlu0 %v5282_v32, %s9526_s16  ;;  %v9633_v2 = vld [vmem:[#allocation29_spill] sm:$0xff]  ;;  %v9636_v23 = vmax.f32 %v9634_v59, %v9635_v58  ;;  %v3325_v36 = vld [vmem:[%s9586_s3 + $0x80] sm:$0xff] }
 0x1a5   : > { %v5151_v15 = vpop.f32.mrf.mxu0  ;;  %v1410_v33 = vmax.f32 %v9632_v26, %v9629_v19  ;;  %v7106_v32 = vld [vmem:[#allocation2 + $0x11] sm:$0xff]  ;;  %v7108_v43 = vld [vmem:[#allocation2 + $0x27] sm:$0xff]  ;;  %v5312_v7 = vpack.i.bf16 %v6996_v47, %v7126_v55  ;;  %v7164_v26 = vld [vmem:[#allocation2 + $0x19] sm:$0xff] }
 0x1a6   : > { %1512 = vst.msk [vmem:[#allocation2 + $0x78] sm:$0xff] %vm1496_vm1, %v1486_v44  ;;  %v1489_v52 = vmax.f32 %v1464_v13, 0.0  ;;  %v1463_v24 = vadd.f32 %v6886_v34, %v1431_v14  ;;  %v1434_v29 = vmax.f32 %v1409_v6, %v5151_v15  ;;  %5278 = vrot.lane.b32.xlu1 %v5277_v5, %s9509_s13  ;;  %v1413_v37 = vmax.f32 %v9636_v23, %v9633_v2  ;;  %v3330_v40 = vld [vmem:[%s9586_s3 + $0xa8] sm:$0xff]  ;;  %v9637_v44 = vld [vmem:[#allocation27_spill] sm:$0xff]  ;;  %v9639_v14 = vld [vmem:[#allocation22_spill] sm:$0xff] }
 0x1a7   : > { %v1335_v63 = vpop.f32.mrf.mxu0  ;;  %v5302_v25 = vpack.i.bf16 %v7106_v32, %v7093_v61  ;;  %v9638_v13 = vld [vmem:[#allocation13_spill] sm:$0xff]  ;;  %3448 = vmatpush2.msra.mxu1 %v3330_v40  ;;  %v7185_v2 = vld [vmem:[#allocation2 + $0x18] sm:$0xff] }
 0x1a8   : > { %1515 = vst.msk [vmem:[#allocation2 + $0x90] sm:$0xff] %vm1496_vm1, %v1489_v52  ;;  %v1488_v28 = vmax.f32 %v1463_v24, 0.0  ;;  %v1466_v38 = vadd.f32 %v6886_v34, %v1434_v29  ;;  %v1433_v0 = vmax.f32 %v1408_v8, %v1335_v63  ;;  %5288 = vrot.lane.b32.xlu0 %v5287_v1, %s9507_s15  ;;  %v9640_v5 = vmax.f32 %v9638_v13, %v9639_v14  ;;  %v3329_v24 = vld [vmem:[%s9586_s3 + $0xa0] sm:$0xff]  ;;  %v7136_v1 = vld [vmem:[#allocation2 + $0x28] sm:$0xff]  ;;  %v1625_v63 = vld [vmem:[#allocation2 + $0x17] sm:$0xff]  ;;  %s9641_s15 = smov 48  }
 0x1a9   : > { %v5154_v42 = vpop.f32.mrf.mxu0  ;;  %v5307_v52 = vpack.i.bf16 %v1608_v27, %v7108_v43  ;;  %3449 = vmatprep.subr.mxu1 %v9511_v4  ;;  %v1575_v19 = vld [vmem:[#allocation2 + $0x13] sm:$0xff] }
 0x1aa   : > { %1514 = vst.msk [vmem:[#allocation2 + $0x88] sm:$0xff] %vm1496_vm1, %v1488_v28  ;;  %v1491_v48 = vmax.f32 %v1466_v38, 0.0  ;;  %v1465_v10 = vadd.f32 %v6886_v34, %v1433_v0  ;;  %v1436_v21 = vmax.f32 %v1411_v57, %v5154_v42  ;;  %5293 = vrot.lane.b32.xlu1 %v5292_v51, %s6291_s25  ;;  %v1412_v20 = vmax.f32 %v9640_v5, %v9637_v44  ;;  %v3328_v57 = vld [vmem:[%s9586_s3 + $0x98] sm:$0xff]  ;;  %v7147_v28 = vld [vmem:[#allocation2 + $0x2d] sm:$0xff] }
 0x1ab   : > { %v1345_v11 = vpop.f32.mrf.mxu0  ;;  %3450 = vmatpush2.msra.mxu1 %v3329_v24  ;;  %v5317_v0 = vpack.i.bf16 %v1625_v63, %v7136_v1  ;;  %v3327_v51 = vld [vmem:[%s9586_s3 + $0x90] sm:$0xff]  ;;  %v5322_v54 = vpack.i.bf16 %v1575_v19, %v7147_v28  ;;  %v5332_v42 = vpack.i.bf16 %v7164_v26, %v7071_v18  ;;  %v7204_v40 = vld [vmem:[#allocation2 + $0x3a] sm:$0xff] }
 0x1ac   : > { %1517 = vst.msk [vmem:[#allocation2 + $0xa0] sm:$0xff] %vm1496_vm1, %v1491_v48  ;;  %v1490_v16 = vmax.f32 %v1465_v10, 0.0  ;;  %v1468_v50 = vadd.f32 %v6886_v34, %v1436_v21  ;;  %v1435_v6 = vmax.f32 %v1410_v33, %v1345_v11  ;;  %5298 = vrot.lane.b32.xlu0 %v5297_v30, %s9534_s22  ;;  %3451 = vmatprep.subr.mxu1 %v9511_v4  ;;  %v7166_v33 = vld [vmem:[#allocation2 + $0x2e] sm:$0xff]  ;;  %v7207_v13 = vld [vmem:[#allocation2 + $0x36] sm:$0xff] }
 0x1ad   : > { %v5157_v60 = vpop.f32.mrf.mxu0  ;;  %3452 = vmatpush2.msra.mxu1 %v3328_v57  ;;  %v7176_v48 = vld [vmem:[#allocation2 + $0x75] sm:$0xff]  ;;  %v7183_v53 = vld [vmem:[#allocation2 + $0x6d] sm:$0xff] }
 0x1ae   : > { %1516 = vst.msk [vmem:[#allocation2 + $0x98] sm:$0xff] %vm1496_vm1, %v1490_v16  ;;  %v1493_v8 = vmax.f32 %v1468_v50, 0.0  ;;  %v1467_v15 = vadd.f32 %v6886_v34, %v1435_v6  ;;  %v1438_v41 = vmax.f32 %v1413_v37, %v5157_v60  ;;  %5303 = vrot.lane.b32.xlu1 %v5302_v25, %s9561_s14  ;;  %3453 = vmatprep.subr.mxu1 %v9511_v4  ;;  %v1592_v10 = vld [vmem:[#allocation2 + $0x14] sm:$0xff]  ;;  %v7221_v60 = vld [vmem:[#allocation2 + $0x6a] sm:$0xff] }
 0x1af   : > { %v1355_v29 = vpop.f32.mrf.mxu0  ;;  %3454 = vmatpush2.msra.mxu1 %v3327_v51  ;;  %v7178_v21 = vld [vmem:[#allocation2 + $0x32] sm:$0xff]  ;;  %v5327_v30 = vpack.i.bf16 %v1592_v10, %v7166_v33  ;;  %v1576_v25 = vld [vmem:[#allocation2 + $0x1b] sm:$0xff] }
 0x1b0   : > { %1519 = vst.msk [vmem:[#allocation2 + $0xb0] sm:$0xff] %vm1496_vm1, %v1493_v8  ;;  %v1492_v56 = vmax.f32 %v1467_v15, 0.0  ;;  %v1470_v46 = vadd.f32 %v6886_v34, %v1438_v41  ;;  %v1437_v12 = vmax.f32 %v1412_v20, %v1355_v29  ;;  %5308 = vrot.lane.b32.xlu0 %v5307_v52, %s9532_s24  ;;  %3455 = vmatprep.subr.mxu1 %v9511_v4  ;;  %v1628_v59 = vld [vmem:[#allocation2 + $0x2f] sm:$0xff]  ;;  %v7227_v15 = vld [vmem:[#allocation2 + $0x37] sm:$0xff] }
 0x1b1   : > { %v5347_v23 = vpack.i.bf16 %v7185_v2, %v7178_v21  ;;  %v7192_v37 = vld [vmem:[#allocation2 + $0x34] sm:$0xff]  ;;  %v5337_v11 = vpack.i.bf16 %v7016_v49, %v1628_v59  ;;  %v5342_v6 = vpack.i.bf16 %v1628_v59, %v7197_v3  ;;  %v5362_v49 = vpack.i.bf16 %v6984_v9, %v7204_v40  ;;  %v7223_v27 = vld [vmem:[#allocation2 + $0x82] sm:$0xff] }
 0x1b2   : > { %1518 = vst.msk [vmem:[#allocation2 + $0xa8] sm:$0xff] %vm1496_vm1, %v1492_v56  ;;  %v1495_v47 = vmax.f32 %v1470_v46, 0.0  ;;  %v1469_v38 = vadd.f32 %v6886_v34, %v1437_v12  ;;  %5313 = vrot.lane.b32.xlu1 %v5312_v7, %s9526_s16  ;;  %v3326_v34 = vld [vmem:[%s9586_s3 + $0x88] sm:$0xff]  ;;  %v5352_v16 = vpack.i.bf16 %v7026_v45, %v7192_v37  ;;  %v1653_v50 = vld [vmem:[#allocation2 + $0x35] sm:$0xff]  ;;  %v5367_v20 = vpack.i.bf16 %v7007_v39, %v7207_v13  ;;  %v7240_v29 = vld [vmem:[#allocation2 + $0x7d] sm:$0xff] }
 0x1b3   : > { %3456 = vmatpush2.msra.mxu1 %v3326_v34  ;;  %v5357_v44 = vpack.i.bf16 %v1576_v25, %v1653_v50  ;;  %v7212_v14 = vld [vmem:[#allocation2 + $0x72] sm:$0xff]  ;;  %v7214_v45 = vld [vmem:[#allocation2 + $0x21] sm:$0xff]  ;;  %9643 = vst [vmem:[#allocation23_spill] sm:$0xff] %v7223_v27  ;;  %9646 = vst [vmem:[#allocation26_spill] sm:$0xff] %v7240_v29  ;;  %v5377_v63 = vpack.i.bf16 %v7082_v17, %v7227_v15  ;;  %v5422_v59 = vpack.i.bf16 %v7207_v13, %v7166_v33 }
 0x1b4   : > { %1521 = vst.msk [vmem:[#allocation2 + $0xc0] sm:$0xff] %vm1496_vm1, %v1495_v47  ;;  %v1494_v22 = vmax.f32 %v1469_v38, 0.0  ;;  %5318 = vrot.lane.b32.xlu0 %v5317_v0, %s9509_s13  ;;  %3457 = vmatprep.subr.mxu1 %v9511_v4  ;;  %s9642_s13 = smov 96   ;;  %v7216_v5 = vld [vmem:[#allocation2 + $0x76] sm:$0xff]  ;;  %v7225_v8 = vld [vmem:[#allocation2 + $0x85] sm:$0xff]  ;;  %v7229_v9 = vld [vmem:[#allocation2 + $0x6e] sm:$0xff]  ;;  %v5372_v39 = vpack.i.bf16 %v7214_v45, %v7178_v21 }
 0x1b5   : > { %3458 = vmatpush2.msra.mxu1 %v3325_v36  ;;  %9644 = vst [vmem:[#allocation9_spill] sm:$0xff] %v7225_v8  ;;  %v7231_v41 = vld [vmem:[#allocation2 + $0x86] sm:$0xff]  ;;  %v7238_v24 = vld [vmem:[#allocation2 + $0x7a] sm:$0xff]  ;;  %v5412_v36 = vpack.i.bf16 %v7192_v37, %v7126_v55 }
 0x1b6   : > { %1520 = vst.msk [vmem:[#allocation2 + $0xb8] sm:$0xff] %vm1496_vm1, %v1494_v22  ;;  %5323 = vrot.lane.b32.xlu1 %v5322_v54, %s9641_s15  ;;  %3545 = vmatprep.subr.mxu1 %v9511_v4  ;;  %9645 = vst [vmem:[#allocation16_spill] sm:$0xff] %v7231_v41  ;;  %v7244_v56 = vld [vmem:[#allocation2 + $0x3c] sm:$0xff]  ;;  %v7269_v54 = vld [vmem:[#allocation2 + $0x29] sm:$0xff] }
 0x1b7   : > { %v7246_v46 = vld [vmem:[#allocation2 + $0x7e] sm:$0xff]  ;;  %v5382_v0 = vpack.i.bf16 %v7093_v61, %v7244_v56  ;;  %v5402_v61 = vpack.i.bf16 %v7269_v54, %v7204_v40  ;;  %v7491_v12 = vld [vmem:[#allocation2 + $0x4b] sm:$0xff] }
 0x1b8   : > { %5333 = vrot.lane.b32.xlu0 %v5332_v42, %s9561_s14  ;;  %9647 = vst [vmem:[#allocation12_spill] sm:$0xff] %v7246_v46  ;;  %v7257_v38 = vld [vmem:[#allocation2 + $0x38] sm:$0xff]  ;;  %v1577_v22 = vld [vmem:[#allocation2 + $0x23] sm:$0xff] }
 0x1b9   : > { %v7262_v51 = vld [vmem:[#allocation2 + $0x3d] sm:$0xff]  ;;  %v5387_v19 = vpack.i.bf16 %v7108_v43, %v7257_v38 }
 0x1ba   : > { %5328 = vrot.lane.b32.xlu1 %v5327_v30, %s9534_s22  ;;  %v5392_v17 = vpack.i.bf16 %v1577_v22, %v7262_v51  ;;  %v7271_v34 = vld [vmem:[#allocation2 + $0x3e] sm:$0xff]  ;;  %v5417_v30 = vpack.i.bf16 %v1653_v50, %v7147_v28  ;;  %v1579_v22 = vld [vmem:[#allocation2 + $0x33] sm:$0xff] }
 0x1bb   : > { %v5397_v42 = vpack.i.bf16 %v7044_v62, %v7271_v34  ;;  %v1630_v43 = vld [vmem:[#allocation2 + $0x3f] sm:$0xff]  ;;  %v7289_v62 = vld [vmem:[#allocation2 + $0x50] sm:$0xff] }
 0x1bc   : > { %5348 = vrot.lane.b32.xlu0 %v5347_v23, %s6291_s25  ;;  %v5407_v10 = vpack.i.bf16 %v7166_v33, %v1630_v43  ;;  %v5427_v23 = vpack.i.bf16 %v7197_v3, %v7257_v38  ;;  %v7303_v33 = vld [vmem:[#allocation2 + $0x44] sm:$0xff]  ;;  %v7413_v47 = vld [vmem:[#allocation2 + $0x5c] sm:$0xff] }
 0x1bd   : > { %v5442_v25 = vpack.i.bf16 %v7071_v18, %v7303_v33 }
 0x1be   : > { %5338 = vrot.lane.b32.xlu1 %v5337_v11, %s9532_s24  ;;  %v7294_v11 = vld [vmem:[#allocation2 + $0x42] sm:$0xff] }
 0x1bf   : > { %v5437_v28 = vpack.i.bf16 %v7136_v1, %v7294_v11 }
 0x1c0   : > { %5353 = vrot.lane.b32.xlu0 %v5352_v16, %s9526_s16  ;;  %v5432_v16 = vpack.i.bf16 %v1630_v43, %v7289_v62  ;;  %v7338_v43 = vld [vmem:[#allocation2 + $0x48] sm:$0xff] }
 0x1c2   : > { %5343 = vrot.lane.b32.xlu1 %v5342_v6, %s9642_s13  ;;  %v7298_v6 = vld [vmem:[#allocation2 + $0x4a] sm:$0xff] }
 0x1c3   : > { %v5452_v50 = vpack.i.bf16 %v7053_v35, %v7298_v6  ;;  %v7319_v35 = vld [vmem:[#allocation2 + $0x46] sm:$0xff] }
 0x1c4   : > { %5358 = vrot.lane.b32.xlu0 %v5357_v44, %s9641_s15  ;;  %v7311_v44 = vld [vmem:[#allocation2 + $0x31] sm:$0xff] }
 0x1c5   : > { %v5462_v1 = vpack.i.bf16 %v7311_v44, %v7294_v11 }
 0x1c6   : > { %5363 = vrot.lane.b32.xlu1 %v5362_v49, %s6291_s25  ;;  %v1655_v49 = vld [vmem:[#allocation2 + $0x45] sm:$0xff] }
 0x1c8   : > { %5368 = vrot.lane.b32.xlu0 %v5367_v20, %s9534_s22  ;;  %v1578_v20 = vld [vmem:[#allocation2 + $0x2b] sm:$0xff] }
 0x1ca   : > { %5373 = vrot.lane.b32.xlu1 %v5372_v39, %s9561_s14  ;;  %v7316_v39 = vld [vmem:[#allocation2 + $0x4c] sm:$0xff] }
 0x1cb   : > { %v5472_v18 = vpack.i.bf16 %v7178_v21, %v7316_v39 }
 0x1cc   : > { %5378 = vrot.lane.b32.xlu0 %v5377_v63, %s9532_s24  ;;  %v5447_v63 = vpack.i.bf16 %v1578_v20, %v1655_v49  ;;  %v5527_v20 = vpack.i.bf16 %v7319_v35, %v7271_v34 }
 0x1ce   : > { %5383 = vrot.lane.b32.xlu1 %v5382_v0, %s9526_s16  ;;  %v7324_v0 = vld [vmem:[#allocation2 + $0x4d] sm:$0xff] }
 0x1d0   : > { %5388 = vrot.lane.b32.xlu0 %v5387_v19, %s9642_s13  ;;  %v5457_v19 = vpack.i.bf16 %v7126_v55, %v7319_v35 }
 0x1d2   : > { %5393 = vrot.lane.b32.xlu1 %v5392_v17, %s9641_s15  ;;  %v7329_v17 = vld [vmem:[#allocation2 + $0x47] sm:$0xff] }
 0x1d3   : > { %v5467_v21 = vpack.i.bf16 %v7207_v13, %v7329_v17  ;;  %v7350_v13 = vld [vmem:[#allocation2 + $0x41] sm:$0xff] }
 0x1d4   : > { %5403 = vrot.lane.b32.xlu0 %v5402_v61, %s9561_s14  ;;  %v5482_v61 = vpack.i.bf16 %v1579_v22, %v7324_v0  ;;  %9649 = vst [vmem:[#allocation24_spill] sm:$0xff] %v7350_v13  ;;  %v7380_v22 = vld [vmem:[#allocation2 + $0x60] sm:$0xff] }
 0x1d6   : > { %5398 = vrot.lane.b32.xlu1 %v5397_v42, %s9534_s22  ;;  %v7333_v42 = vld [vmem:[#allocation2 + $0x4e] sm:$0xff] }
 0x1d7   : > { %v5487_v55 = vpack.i.bf16 %v7192_v37, %v7333_v42 }
 0x1d8   : > { %5413 = vrot.lane.b32.xlu0 %v5412_v36, %s9561_s14  ;;  %v1632_v36 = vld [vmem:[#allocation2 + $0x4f] sm:$0xff] }
 0x1da   : > { %5408 = vrot.lane.b32.xlu1 %v5407_v10, %s9532_s24  ;;  %v5477_v10 = vpack.i.bf16 %v7227_v15, %v7338_v43  ;;  %v5507_v15 = vpack.i.bf16 %v7294_v11, %v7204_v40 }
 0x1dc   : > { %5418 = vrot.lane.b32.xlu0 %v5417_v30, %s9526_s16  ;;  %v5497_v30 = vpack.i.bf16 %v7271_v34, %v1632_v36 }
 0x1de   : > { %5423 = vrot.lane.b32.xlu1 %v5422_v59, %s9641_s15  ;;  %v7348_v59 = vld [vmem:[#allocation2 + $0x39] sm:$0xff] }
 0x1df   : > { %9648 = vst [vmem:[#allocation17_spill] sm:$0xff] %v7348_v59  ;;  %v5502_v37 = vpack.i.bf16 %v7350_v13, %v7348_v59 }
 0x1e0   : > { %5428 = vrot.lane.b32.xlu0 %v5427_v23, %s9534_s22  ;;  %v5492_v23 = vpack.i.bf16 %v7348_v59, %v7298_v6 }
 0x1e2   : > { %5433 = vrot.lane.b32.xlu1 %v5432_v16, %s9642_s13  ;;  %v7358_v16 = vld [vmem:[#allocation2 + $0x43] sm:$0xff] }
 0x1e4   : > { %5438 = vrot.lane.b32.xlu0 %v5437_v28, %s6291_s25  ;;  %v1580_v28 = vld [vmem:[#allocation2 + $0x3b] sm:$0xff] }
 0x1e6   : > { %5453 = vrot.lane.b32.xlu1 %v5452_v50, %s6291_s25  ;;  %v5512_v50 = vpack.i.bf16 %v7358_v16, %v1580_v28 }
 0x1e8   : > { %5443 = vrot.lane.b32.xlu0 %v5442_v25, %s9526_s16  ;;  %v5517_v25 = vpack.i.bf16 %v7303_v33, %v7244_v56 }
 0x1ea   : > { %5463 = vrot.lane.b32.xlu1 %v5462_v1, %s9561_s14  ;;  %v5522_v1 = vpack.i.bf16 %v1655_v49, %v7262_v51  ;;  %v7385_v49 = vld [vmem:[#allocation2 + $0x54] sm:$0xff] }
 0x1ec   : > { %5448 = vrot.lane.b32.xlu0 %v5447_v63, %s9641_s15  ;;  %v7373_v63 = vld [vmem:[#allocation2 + $0x52] sm:$0xff] }
 0x1ed   : > { %v5542_v51 = vpack.i.bf16 %v7257_v38, %v7373_v63 }
 0x1ee   : > { %5473 = vrot.lane.b32.xlu1 %v5472_v18, %s9526_s16 }
 0x1f0   : > { %5458 = vrot.lane.b32.xlu0 %v5457_v19, %s9534_s22  ;;  %v5532_v19 = vpack.i.bf16 %v7289_v62, %v7338_v43 }
 0x1f2   : > { %5483 = vrot.lane.b32.xlu1 %v5482_v61, %s9641_s15 }
 0x1f4   : > { %5468 = vrot.lane.b32.xlu0 %v5467_v21, %s9532_s24  ;;  %v5537_v21 = vpack.i.bf16 %v1632_v36, %v7380_v22 }
 0x1f6   : > { %5488 = vrot.lane.b32.xlu1 %v5487_v55, %s9534_s22  ;;  %v7389_v55 = vld [vmem:[#allocation2 + $0x5a] sm:$0xff] }
 0x1f7   : > { %v5557_v36 = vpack.i.bf16 %v7197_v3, %v7389_v55 }
 0x1f8   : > { %5478 = vrot.lane.b32.xlu0 %v5477_v10, %s9642_s13 }
 0x1fa   : > { %5498 = vrot.lane.b32.xlu1 %v5497_v30, %s9532_s24  ;;  %v5547_v30 = vpack.i.bf16 %v7204_v40, %v7385_v49 }
 0x1fc   : > { %5493 = vrot.lane.b32.xlu0 %v5492_v23, %s9561_s14 }
 0x1fe   : > { %5503 = vrot.lane.b32.xlu1 %v5502_v37, %s9532_s24 }
 0x200   : > { %5508 = vrot.lane.b32.xlu0 %v5507_v15, %s9642_s13  ;;  %v7394_v15 = vld [vmem:[#allocation2 + $0x55] sm:$0xff] }
 0x202   : > { %5513 = vrot.lane.b32.xlu1 %v5512_v50, %s6291_s25 }
 0x204   : > { %5518 = vrot.lane.b32.xlu0 %v5517_v25, %s9561_s14 }
 0x206   : > { %5523 = vrot.lane.b32.xlu1 %v5522_v1, %s9526_s16  ;;  %v1522_v1 = vld [vmem:[#allocation2] sm:$0xff] }
 0x208   : > { %v7375_v18 = vpop.permute.xlu1 %5243  ;;  %5528 = vrot.lane.b32.xlu0 %v5527_v20, %s9641_s15 }
 0x20a   : > { %v5249_v61 = vpop.permute.xlu0 %5248  ;;  %5533 = vrot.lane.b32.xlu1 %v5532_v19, %s9534_s22  ;;  %v5552_v19 = vpack.i.bf16 %v1580_v28, %v7394_v15 }
 0x20b   : > { %v5251_v23 = vunpack.i.h.bf16 %v5249_v61  ;;  %v5250_v37 = vunpack.i.l.bf16 %v5249_v61 }
 0x20c   : > { %v5259_v34 = vpop.permute.xlu1 %5258  ;;  %5543 = vrot.lane.b32.xlu0 %v5542_v51, %s6291_s25  ;;  %v7406_v51 = vld [vmem:[#allocation2 + $0x56] sm:$0xff] }
 0x20d   : > { %v2565_v40 = vsel %vm1496_vm1, %v1522_v1, %v5251_v23  ;;  %v2689_v61 = vsel %vm1496_vm1, %v7106_v32, %v5250_v37  ;;  %v5260_v28 = vunpack.i.l.bf16 %v5259_v34 }
 0x20e   : > { %v5254_v10 = vpop.permute.xlu0 %5253  ;;  %5538 = vrot.lane.b32.xlu1 %v5537_v21, %s9642_s13 }
 0x20f   : > { %v5256_v38 = vunpack.i.h.bf16 %v5254_v10  ;;  %v5255_v50 = vunpack.i.l.bf16 %v5254_v10 }
 0x210   : > { %v5264_v25 = vpop.permute.xlu1 %5263  ;;  %5548 = vrot.lane.b32.xlu0 %v5547_v30, %s9526_s16  ;;  %v5567_v30 = vpack.i.bf16 %v7350_v13, %v7373_v63 }
 0x211   : > { %v2582_v21 = vsel %vm498_vm0, %v2565_v40, %v5256_v38  ;;  %v2706_v10 = vsel %vm498_vm0, %v2689_v61, %v5255_v50  ;;  %v5266_v23 = vunpack.i.h.bf16 %v5264_v25  ;;  %v5265_v32 = vunpack.i.l.bf16 %v5264_v25  ;;  %v7421_v40 = vld [vmem:[#allocation2 + $0x57] sm:$0xff] }
 0x212   : > { %v7399_v20 = vpop.permute.xlu0 %5268  ;;  %5558 = vrot.lane.b32.xlu1 %v5557_v36, %s6291_s25  ;;  %v5261_v36 = vunpack.i.h.bf16 %v5259_v34  ;;  %v5562_v38 = vpack.i.bf16 %v7244_v56, %v7406_v51  ;;  %v2723_v34 = vsel %vm2599_vm2, %v2706_v10, %v5260_v28  ;;  %v5577_v25 = vpack.i.bf16 %v7294_v11, %v7413_v47 }
 0x213   : > { %v2740_v10 = vsel %vm2617_vm3, %v2723_v34, %v5265_v32  ;;  %v5246_v28 = vunpack.i.h.bf16 %v7375_v18  ;;  %v7447_v34 = vld [vmem:[#allocation2 + $0x5e] sm:$0xff] }
 0x214   : > { %v5274_v3 = vpop.permute.xlu1 %5273  ;;  %5553 = vrot.lane.b32.xlu0 %v5552_v19, %s9641_s15  ;;  %v2600_v50 = vsel %vm2599_vm2, %v2582_v21, %v5261_v36  ;;  %v5572_v21 = vpack.i.bf16 %v7319_v35, %v7421_v40  ;;  %v7439_v36 = vld [vmem:[#allocation2 + $0x58] sm:$0xff] }
 0x215   : > { %v5276_v1 = vunpack.i.h.bf16 %v5274_v3  ;;  %v5275_v19 = vunpack.i.l.bf16 %v5274_v3  ;;  %v2618_v56 = vsel %vm2617_vm3, %v2600_v50, %v5266_v23  ;;  %v5245_v23 = vunpack.i.l.bf16 %v7375_v18 }
 0x216   : > { %v7415_v37 = vpop.permute.xlu0 %5283  ;;  %5568 = vrot.lane.b32.xlu1 %v5567_v30, %s9561_s14  ;;  %v7429_v30 = vld [vmem:[#allocation2 + $0x5d] sm:$0xff] }
 0x217   : > { %v2757_v3 = vsel %vm2635_vm4, %v2740_v10, %v5275_v19  ;;  %v2636_v11 = vsel %vm2635_vm4, %v2618_v56, %v5276_v1  ;;  %v5587_v50 = vpack.i.bf16 %v7358_v16, %v7429_v30  ;;  %v5592_v10 = vpack.i.bf16 %v7303_v33, %v7447_v34 }
 0x218   : > { %v7424_v61 = vpop.permute.xlu1 %5278  ;;  %5563 = vrot.lane.b32.xlu0 %v5562_v38, %s9534_s22  ;;  %v2774_v1 = vsel %vm2653_vm5, %v2757_v3, %v5245_v23  ;;  %v2654_v18 = vsel %vm2653_vm5, %v2636_v11, %v5246_v28  ;;  %v7463_v3 = vld [vmem:[#allocation2 + $0x5f] sm:$0xff]  ;;  %v7468_v28 = vld [vmem:[#allocation2 + $0x51] sm:$0xff] }
 0x219   : > { %v5602_v33 = vpack.i.bf16 %v7333_v42, %v7463_v3 }
 0x21a   : > { %v7432_v57 = vpop.permute.xlu0 %5288  ;;  %5578 = vrot.lane.b32.xlu1 %v5577_v25, %s9526_s16  ;;  %v5582_v25 = vpack.i.bf16 %v7329_v17, %v7439_v36 }
 0x21c   : > { %v5294_v38 = vpop.permute.xlu1 %5293  ;;  %5573 = vrot.lane.b32.xlu0 %v5572_v21, %s9532_s24 }
 0x21d   : > { %v5296_v35 = vunpack.i.h.bf16 %v5294_v38  ;;  %v5295_v32 = vunpack.i.l.bf16 %v5294_v38  ;;  %v7461_v38 = vld [vmem:[#allocation2 + $0x49] sm:$0xff] }
 0x21e   : > { %v5299_v19 = vpop.permute.xlu0 %5298  ;;  %5588 = vrot.lane.b32.xlu1 %v5587_v50, %s9641_s15  ;;  %9650 = vst [vmem:[#allocation10_spill] sm:$0xff] %v7461_v38  ;;  %v5597_v11 = vpack.i.bf16 %v7461_v38, %v7389_v55 }
 0x21f   : > { %v2791_v56 = vsel %vm2671_vm6, %v2774_v1, %v5295_v32  ;;  %v2672_v21 = vsel %vm2671_vm6, %v2654_v18, %v5296_v35  ;;  %v5607_v35 = vpack.i.bf16 %v7468_v28, %v7461_v38  ;;  %v5271_v32 = vunpack.i.h.bf16 %v7399_v20 }
 0x220   : > { %3459 = vmatprep.mubr.f32.mxu1 %v2791_v56  ;;  %v7456_v16 = vpop.permute.xlu1 %5303  ;;  %5583 = vrot.lane.b32.xlu0 %v5582_v25, %s9642_s13  ;;  %v5270_v1 = vunpack.i.l.bf16 %v7399_v20  ;;  %v7480_v25 = vld [vmem:[#allocation2 + $0x53] sm:$0xff]  ;;  %v5286_v18 = vunpack.i.h.bf16 %v7415_v37  ;;  %v5285_v56 = vunpack.i.l.bf16 %v7415_v37  ;;  %v1523_v20 = vld [vmem:[#allocation2 + $0x8] sm:$0xff]  ;;  %v5301_v58 = vunpack.i.h.bf16 %v5299_v19 }
 0x221   : > { %3460 = vmatmul.mubr.f32.vlgmr.msra.gmra.mxu1 %v2672_v21  ;;  %v5300_v7 = vunpack.i.l.bf16 %v5299_v19  ;;  %v5617_v37 = vpack.i.bf16 %v7480_v25, %v7491_v12  ;;  %v2566_v4 = vsel %vm1496_vm1, %v1523_v20, %v5271_v32  ;;  %v5627_v32 = vpack.i.bf16 %v7394_v15, %v7324_v0 }
 0x222   : > { %v5309_v17 = vpop.permute.xlu0 %5308  ;;  %5593 = vrot.lane.b32.xlu1 %v5592_v10, %s9534_s22  ;;  %v5612_v10 = vpack.i.bf16 %v7373_v63, %v7298_v6  ;;  %v2583_v38 = vsel %vm498_vm0, %v2566_v4, %v5286_v18 }
 0x223   : > { %v5311_v41 = vunpack.i.h.bf16 %v5309_v17  ;;  %v5310_v8 = vunpack.i.l.bf16 %v5309_v17 }
 0x224   : > { %v7470_v23 = vpop.permute.xlu1 %5313  ;;  %5598 = vrot.lane.b32.xlu0 %v5597_v11, %s9561_s14  ;;  %v5291_v11 = vunpack.i.h.bf16 %v7432_v57 }
 0x225   : > { %v5316_v15 = vunpack.i.h.bf16 %v7470_v23 }
 0x226   : > { %v5319_v50 = vpop.permute.xlu0 %5318  ;;  %5603 = vrot.lane.b32.xlu1 %v5602_v33, %s9532_s24  ;;  %v5290_v33 = vunpack.i.l.bf16 %v7432_v57  ;;  %v2690_v57 = vsel %vm1496_vm1, %v7164_v26, %v5270_v1  ;;  %v2601_v27 = vsel %vm2599_vm2, %v2583_v38, %v5291_v11  ;;  %v5632_v26 = vpack.i.bf16 %v7406_v51, %v7333_v42 }
 0x227   : > { %v2707_v19 = vsel %vm498_vm0, %v2690_v57, %v5285_v56  ;;  %v5321_v13 = vunpack.i.h.bf16 %v5319_v50  ;;  %v5320_v59 = vunpack.i.l.bf16 %v5319_v50  ;;  %v2619_v17 = vsel %vm2617_vm3, %v2601_v27, %v5301_v58 }
 0x228   : > { %v7484_v21 = vpop.permute.xlu1 %5323  ;;  %5608 = vrot.lane.b32.xlu0 %v5607_v35, %s9532_s24  ;;  %v5622_v35 = vpack.i.bf16 %v7385_v49, %v7316_v39  ;;  %v2724_v46 = vsel %vm2599_vm2, %v2707_v19, %v5290_v33  ;;  %v5306_v1 = vunpack.i.h.bf16 %v7456_v16  ;;  %v5305_v50 = vunpack.i.l.bf16 %v7456_v16  ;;  %v7539_v19 = vld [vmem:[#allocation2 + $0x62] sm:$0xff] }
 0x229   : > { %v2741_v4 = vsel %vm2617_vm3, %v2724_v46, %v5300_v7  ;;  %v2637_v0 = vsel %vm2635_vm4, %v2619_v17, %v5311_v41  ;;  %v5315_v42 = vunpack.i.l.bf16 %v7470_v23  ;;  %v5326_v46 = vunpack.i.h.bf16 %v7484_v21  ;;  %v7528_v41 = vld [vmem:[#allocation2 + $0x70] sm:$0xff] }
 0x22a   : > { %v7493_v52 = vpop.permute.xlu0 %5333  ;;  %5613 = vrot.lane.b32.xlu1 %v5612_v10, %s9642_s13  ;;  %v2758_v11 = vsel %vm2635_vm4, %v2741_v4, %v5310_v8  ;;  %v2655_v7 = vsel %vm2653_vm5, %v2637_v0, %v5321_v13  ;;  %v5325_v16 = vunpack.i.l.bf16 %v7484_v21  ;;  %v2567_v13 = vsel %vm1496_vm1, %v7080_v31, %v5306_v1 }
 0x22b   : > { %v2775_v27 = vsel %vm2653_vm5, %v2758_v11, %v5320_v59  ;;  %v5637_v59 = vpack.i.bf16 %v7380_v22, %v7439_v36  ;;  %v2691_v21 = vsel %vm1496_vm1, %v7214_v45, %v5305_v50  ;;  %v5281_v11 = vunpack.i.h.bf16 %v7424_v61 }
 0x22c   : > { %v5329_v10 = vpop.permute.xlu1 %5328  ;;  %5618 = vrot.lane.b32.xlu0 %v5617_v37, %s6291_s25  ;;  %v5280_v0 = vunpack.i.l.bf16 %v7424_v61 }
 0x22d   : > { %v5331_v20 = vunpack.i.h.bf16 %v5329_v10  ;;  %v5330_v37 = vunpack.i.l.bf16 %v5329_v10  ;;  %v2584_v10 = vsel %vm498_vm0, %v2567_v13, %v5316_v15  ;;  %v7589_v13 = vld [vmem:[#allocation2 + $0x66] sm:$0xff] }
 0x22e   : > { %v5349_v18 = vpop.permute.xlu0 %5348  ;;  %5623 = vrot.lane.b32.xlu1 %v5622_v35, %s9561_s14  ;;  %v2602_v31 = vsel %vm2599_vm2, %v2584_v10, %v5326_v46  ;;  %v5667_v10 = vpack.i.bf16 %v7316_v39, %v7589_v13  ;;  %v5697_v39 = vpack.i.bf16 %v7385_v49, %v7229_v9 }
 0x22f   : > { %v5351_v38 = vunpack.i.h.bf16 %v5349_v18  ;;  %v5350_v56 = vunpack.i.l.bf16 %v5349_v18  ;;  %v2620_v4 = vsel %vm2617_vm3, %v2602_v31, %v5331_v20  ;;  %v5647_v18 = vpack.i.bf16 %v7338_v43, %v7539_v19 }
 0x230   : > { %v5339_v58 = vpop.permute.xlu1 %5338  ;;  %5628 = vrot.lane.b32.xlu0 %v5627_v32, %s9526_s16  ;;  %v2708_v32 = vsel %vm498_vm0, %v2691_v21, %v5315_v42  ;;  %v5662_v42 = vpack.i.bf16 %v7289_v62, %v7221_v60  ;;  %v5672_v20 = vpack.i.bf16 %v7468_v28, %v7539_v19 }
 0x231   : > { %v2792_v33 = vsel %vm2671_vm6, %v2775_v27, %v5350_v56  ;;  %v2673_v8 = vsel %vm2671_vm6, %v2655_v7, %v5351_v38  ;;  %v5341_v35 = vunpack.i.h.bf16 %v5339_v58  ;;  %v5340_v57 = vunpack.i.l.bf16 %v5339_v58  ;;  %v7558_v56 = vld [vmem:[#allocation2 + $0x64] sm:$0xff] }
 0x232   : > { %v7530_v23 = vpop.permute.xlu0 %5353  ;;  %3464 = vmatprep.mubr.f32.mxu1 %v2792_v33  ;;  %5633 = vrot.lane.b32.xlu1 %v5632_v26, %s9641_s15  ;;  %v5642_v26 = vpack.i.bf16 %v7463_v3, %v7528_v41  ;;  %v2725_v45 = vsel %vm2599_vm2, %v2708_v32, %v5325_v16  ;;  %v5652_v46 = vpack.i.bf16 %v7298_v6, %v7558_v56  ;;  %v7601_v32 = vld [vmem:[#allocation2 + $0x67] sm:$0xff] }
 0x233   : > { %3465 = vmatmul.mubr.f32.gmra.mxu1 %v2673_v8  ;;  %v2742_v1 = vsel %vm2617_vm3, %v2725_v45, %v5330_v37  ;;  %v2638_v3 = vsel %vm2635_vm4, %v2620_v4, %v5341_v35  ;;  %v7575_v8 = vld [vmem:[#allocation2 + $0x65] sm:$0xff]  ;;  %v5355_v49 = vunpack.i.l.bf16 %v7530_v23 }
 0x234   : > { %v7543_v17 = vpop.permute.xlu1 %5343  ;;  %5638 = vrot.lane.b32.xlu0 %v5637_v59, %s9534_s22  ;;  %v2759_v38 = vsel %vm2635_vm4, %v2742_v1, %v5340_v57  ;;  %v2656_v16 = vsel %vm2653_vm5, %v2638_v3, %v5281_v11  ;;  %v7582_v37 = vld [vmem:[#allocation2 + $0x6c] sm:$0xff]  ;;  %v5657_v59 = vpack.i.bf16 %v7491_v12, %v7575_v8  ;;  %v5692_v12 = vpack.i.bf16 %v7480_v25, %v7183_v53  ;;  %v7629_v3 = vld [vmem:[#allocation2 + $0x61] sm:$0xff] }
 0x235   : > { %v2776_v43 = vsel %vm2653_vm5, %v2759_v38, %v5280_v0  ;;  %v5682_v35 = vpack.i.bf16 %v7373_v63, %v7582_v37  ;;  %v5677_v63 = vpack.i.bf16 %v7406_v51, %v7601_v32  ;;  %v7613_v45 = vld [vmem:[#allocation2 + $0x68] sm:$0xff]  ;;  %v5336_v51 = vunpack.i.h.bf16 %v7493_v52  ;;  %9652 = vst [vmem:[#allocation28_spill] sm:$0xff] %v7629_v3 }
 0x236   : > { %v7552_v50 = vpop.permute.xlu0 %5358  ;;  %5643 = vrot.lane.b32.xlu1 %v5642_v26, %s9642_s13  ;;  %v7620_v1 = vld [vmem:[#allocation2 + $0x6f] sm:$0xff]  ;;  %v5687_v25 = vpack.i.bf16 %v7421_v40, %v7613_v45  ;;  %v5335_v38 = vunpack.i.l.bf16 %v7493_v52  ;;  %v7631_v11 = vld [vmem:[#allocation2 + $0x63] sm:$0xff]  ;;  %v5356_v0 = vunpack.i.h.bf16 %v7530_v23  ;;  %v7640_v40 = vld [vmem:[#allocation2 + $0x59] sm:$0xff] }
 0x237   : > { %9653 = vst [vmem:[#allocation14_spill] sm:$0xff] %v7631_v11  ;;  %v5360_v23 = vunpack.i.l.bf16 %v7552_v50 }
 0x238   : > { %v5364_v15 = vpop.permute.xlu1 %5363  ;;  %5648 = vrot.lane.b32.xlu0 %v5647_v18, %s6291_s25 }
 0x239   : > { %v5366_v58 = vunpack.i.h.bf16 %v5364_v15  ;;  %v5365_v27 = vunpack.i.l.bf16 %v5364_v15 }
 0x23a   : > { %v7566_v7 = vpop.permute.xlu0 %5368  ;;  %5663 = vrot.lane.b32.xlu1 %v5662_v42, %s6291_s25  ;;  %v5707_v42 = vpack.i.bf16 %v7447_v34, %v7620_v1 }
 0x23b   : > { %v2793_v61 = vsel %vm2671_vm6, %v2776_v43, %v5365_v27  ;;  %v2674_v33 = vsel %vm2671_vm6, %v2656_v16, %v5366_v58  ;;  %v5361_v58 = vunpack.i.h.bf16 %v7552_v50  ;;  %v5702_v27 = vpack.i.bf16 %v7640_v40, %v7221_v60  ;;  %v7647_v43 = vld [vmem:[#allocation2 + $0x5b] sm:$0xff] }
 0x23c   : > { %v7577_v62 = vpop.permute.xlu1 %5373  ;;  %3469 = vmatprep.mubr.f32.mxu1 %v2793_v61  ;;  %5653 = vrot.lane.b32.xlu0 %v5652_v46, %s9526_s16  ;;  %9654 = vst [vmem:[#allocation19_spill] sm:$0xff] %v7647_v43  ;;  %v5712_v16 = vpack.i.bf16 %v7629_v3, %v7640_v40  ;;  %v5717_v61 = vpack.i.bf16 %v7539_v19, %v7389_v55  ;;  %v5371_v50 = vunpack.i.h.bf16 %v7566_v7 }
 0x23d   : > { %3470 = vmatmul.mubr.f32.gmra.mxu1 %v2674_v33  ;;  %v5722_v33 = vpack.i.bf16 %v7631_v11, %v7647_v43 }
 0x23e   : > { %v7584_v6 = vpop.permute.xlu0 %5378  ;;  %5673 = vrot.lane.b32.xlu1 %v5672_v20, %s9561_s14  ;;  %v2568_v20 = vsel %vm1496_vm1, %v7185_v2, %v5336_v51  ;;  %v5727_v2 = vpack.i.bf16 %v7558_v56, %v7413_v47  ;;  %v5376_v51 = vunpack.i.h.bf16 %v7577_v62 }
 0x240   : > { %v7591_v21 = vpop.permute.xlu1 %5383  ;;  %5658 = vrot.lane.b32.xlu0 %v5657_v59, %s9641_s15  ;;  %v2692_v59 = vsel %vm1496_vm1, %v7269_v54, %v5335_v38  ;;  %v5370_v54 = vunpack.i.l.bf16 %v7566_v7 }
 0x242   : > { %v7596_v57 = vpop.permute.xlu0 %5388  ;;  %5683 = vrot.lane.b32.xlu1 %v5682_v35, %s9526_s16  ;;  %v5375_v35 = vunpack.i.l.bf16 %v7577_v62  ;;  %v5386_v62 = vunpack.i.h.bf16 %v7591_v21 }
 0x244   : > { %v7603_v26 = vpop.permute.xlu1 %5393  ;;  %5668 = vrot.lane.b32.xlu0 %v5667_v10, %s9534_s22  ;;  %v2585_v10 = vsel %vm498_vm0, %v2568_v20, %v5356_v0  ;;  %v2693_v7 = vsel %vm1496_vm1, %v7311_v44, %v5375_v35 }
 0x245   : > { %v5395_v38 = vunpack.i.l.bf16 %v7603_v26 }
 0x246   : > { %v7608_v31 = vpop.permute.xlu0 %5403  ;;  %5693 = vrot.lane.b32.xlu1 %v5692_v12, %s9641_s15  ;;  %v2709_v12 = vsel %vm498_vm0, %v2692_v59, %v5355_v49  ;;  %v5381_v49 = vunpack.i.h.bf16 %v7584_v6 }
 0x247   : > { %v2726_v0 = vsel %vm2599_vm2, %v2709_v12, %v5360_v23  ;;  %v5396_v12 = vunpack.i.h.bf16 %v7603_v26 }
 0x248   : > { %v7615_v4 = vpop.permute.xlu1 %5398  ;;  %5678 = vrot.lane.b32.xlu0 %v5677_v63, %s9532_s24  ;;  %v5385_v63 = vunpack.i.l.bf16 %v7591_v21 }
 0x249   : > { %v5400_v20 = vunpack.i.l.bf16 %v7615_v4  ;;  %v5401_v35 = vunpack.i.h.bf16 %v7615_v4 }
 0x24a   : > { %v7622_v18 = vpop.permute.xlu0 %5413  ;;  %5698 = vrot.lane.b32.xlu1 %v5697_v39, %s9534_s22  ;;  %v2710_v23 = vsel %vm498_vm0, %v2693_v7, %v5385_v63 }
 0x24b   : > { %9651 = vst [vmem:[#allocation18_spill] sm:$0xff] %v7622_v18  ;;  %v2727_v21 = vsel %vm2599_vm2, %v2710_v23, %v5395_v38  ;;  %v5345_v38 = vunpack.i.l.bf16 %v7543_v17  ;;  %v8025_v18 = vld [vmem:[#allocation2 + $0x97] sm:$0xff] }
 0x24c   : > { %v7635_v15 = vpop.permute.xlu1 %5408  ;;  %5688 = vrot.lane.b32.xlu0 %v5687_v25, %s9642_s13  ;;  %v2603_v25 = vsel %vm2599_vm2, %v2585_v10, %v5361_v58  ;;  %v5391_v10 = vunpack.i.h.bf16 %v7596_v57  ;;  %v2744_v63 = vsel %vm2617_vm3, %v2727_v21, %v5400_v20 }
 0x24d   : > { %v2621_v58 = vsel %vm2617_vm3, %v2603_v25, %v5371_v50  ;;  %v5410_v59 = vunpack.i.l.bf16 %v7635_v15  ;;  %v6147_v50 = vld [vmem:[#allocation2 + $0x20] sm:$0xff]  ;;  %v5411_v25 = vunpack.i.h.bf16 %v7635_v15 }
 0x24e   : > { %v7650_v46 = vpop.permute.xlu0 %5418  ;;  %5708 = vrot.lane.b32.xlu1 %v5707_v42, %s9532_s24  ;;  %v5380_v42 = vunpack.i.l.bf16 %v7584_v6  ;;  %v5390_v6 = vunpack.i.l.bf16 %v7596_v57  ;;  %v2569_v44 = vsel %vm1496_vm1, %v6147_v50, %v5376_v51 }
 0x24f   : > { %9655 = vst [vmem:[#allocation25_spill] sm:$0xff] %v7650_v46  ;;  %v2761_v51 = vsel %vm2635_vm4, %v2744_v63, %v5410_v59  ;;  %v7741_v63 = vld [vmem:[#allocation2 + $0x74] sm:$0xff] }
 0x250   : > { %v7668_v39 = vpop.permute.xlu1 %5423  ;;  %5703 = vrot.lane.b32.xlu0 %v5702_v27, %s9561_s14 }
 0x251   : > { %9656 = vst [vmem:[#allocation11_spill] sm:$0xff] %v7668_v39 }
 0x252   : > { %v7681_v27 = vpop.permute.xlu0 %5428  ;;  %5713 = vrot.lane.b32.xlu1 %v5712_v16, %s9532_s24  ;;  %v2743_v16 = vsel %vm2617_vm3, %v2726_v0, %v5370_v54  ;;  %v2586_v54 = vsel %vm498_vm0, %v2569_v44, %v5386_v62 }
 0x253   : > { %9657 = vst [vmem:[#allocation20_spill] sm:$0xff] %v7681_v27  ;;  %v2760_v26 = vsel %vm2635_vm4, %v2743_v16, %v5380_v42  ;;  %v2604_v4 = vsel %vm2599_vm2, %v2586_v54, %v5396_v12  ;;  %v9658_v12 = vpack.i.bf16 %v7575_v8, %v7429_v30  ;;  %v5346_v16 = vunpack.i.h.bf16 %v7543_v17  ;;  %v7732_v8 = vld [vmem:[#allocation2 + $0x80] sm:$0xff] }
 0x254   : > { %v7693_v52 = vpop.permute.xlu1 %5433  ;;  %5718 = vrot.lane.b32.xlu0 %v5717_v61, %s9642_s13  ;;  %v2639_v61 = vsel %vm2635_vm4, %v2621_v58, %v5381_v49  ;;  %v2777_v15 = vsel %vm2653_vm5, %v2760_v26, %v5390_v6  ;;  %v2622_v42 = vsel %vm2617_vm3, %v2604_v4, %v5401_v35  ;;  %v5742_v30 = vpack.i.bf16 %v7528_v41, %v7613_v45  ;;  %v7775_v4 = vld [vmem:[#allocation2 + $0x77] sm:$0xff] }
 0x255   : > { %v2640_v6 = vsel %vm2635_vm4, %v2622_v42, %v5411_v25  ;;  %v5752_v35 = vpack.i.bf16 %v7439_v36, %v7212_v14  ;;  %v5747_v25 = vpack.i.bf16 %v7620_v1, %v7732_v8  ;;  %v5767_v36 = vpack.i.bf16 %v7380_v22, %v7238_v24 }
 0x256   : > { %v5439_v57 = vpop.permute.xlu0 %5438  ;;  %5723 = vrot.lane.b32.xlu1 %v5722_v33, %s6291_s25  ;;  %v2657_v33 = vsel %vm2653_vm5, %v2639_v61, %v5391_v10  ;;  %v5737_v10 = vpack.i.bf16 %v7589_v13, %v7447_v34  ;;  %v2658_v21 = vsel %vm2653_vm5, %v2640_v6, %v5346_v16  ;;  %v5757_v61 = vpack.i.bf16 %v7389_v55, %v7741_v63 }
 0x257   : > { %v5441_v0 = vunpack.i.h.bf16 %v5439_v57  ;;  %v5440_v7 = vunpack.i.l.bf16 %v5439_v57  ;;  %v5762_v1 = vpack.i.bf16 %v7647_v43, %v7176_v48  ;;  %v5777_v55 = vpack.i.bf16 %v7629_v3, %v7212_v14  ;;  %v8052_v3 = vld [vmem:[#allocation2 + $0x83] sm:$0xff] }
 0x258   : > { %v5454_v20 = vpop.permute.xlu1 %5453  ;;  %5728 = vrot.lane.b32.xlu0 %v5727_v2, %s9561_s14  ;;  %v2778_v2 = vsel %vm2653_vm5, %v2761_v51, %v5345_v38  ;;  %v7768_v51 = vld [vmem:[#allocation2 + $0x7c] sm:$0xff]  ;;  %v5772_v22 = vpack.i.bf16 %v7413_v47, %v7216_v5  ;;  %v5782_v42 = vpack.i.bf16 %v7589_v13, %v7775_v4  ;;  %v5797_v47 = vpack.i.bf16 %v7631_v11, %v7240_v29  ;;  %v9662_v13 = vld [vmem:[#allocation12_spill] sm:$0xff] }
 0x259   : > { %v5455_v49 = vunpack.i.l.bf16 %v5454_v20  ;;  %v2794_v58 = vsel %vm2671_vm6, %v2777_v15, %v5440_v7  ;;  %v2675_v62 = vsel %vm2671_vm6, %v2657_v33, %v5441_v0  ;;  %v5456_v23 = vunpack.i.h.bf16 %v5454_v20 }
 0x25a   : > { %v7715_v59 = vpop.permute.xlu0 %5443  ;;  %3474 = vmatprep.mubr.f32.mxu1 %v2794_v58  ;;  %5733 = vrot.lane.b32.xlu1 %v9658_v12, %s9526_s16  ;;  %v5787_v15 = vpack.i.bf16 %v7539_v19, %v7768_v51  ;;  %v5406_v6 = vunpack.i.h.bf16 %v7608_v31  ;;  %v5405_v16 = vunpack.i.l.bf16 %v7608_v31 }
 0x25b   : > { %3475 = vmatmul.mubr.f32.gmra.mxu1 %v2675_v62  ;;  %v2795_v50 = vsel %vm2671_vm6, %v2778_v2, %v5455_v49  ;;  %v2676_v17 = vsel %vm2671_vm6, %v2658_v21, %v5456_v23  ;;  %v7787_v49 = vld [vmem:[#allocation2 + $0x78] sm:$0xff]  ;;  %v5802_v2 = vpack.i.bf16 %v7558_v56, %v9662_v13  ;;  %v5446_v21 = vunpack.i.h.bf16 %v7715_v59 }
 0x25c   : > { %v7727_v44 = vpop.permute.xlu1 %5463  ;;  %3479 = vmatprep.mubr.f32.mxu1 %v2795_v50  ;;  %5738 = vrot.lane.b32.xlu0 %v5737_v10, %s9641_s15  ;;  %v5792_v62 = vpack.i.bf16 %v7601_v32, %v7787_v49  ;;  %v1638_v23 = vld [vmem:[#allocation2 + $0x7f] sm:$0xff]  ;;  %v7804_v10 = vld [vmem:[#allocation2 + $0x69] sm:$0xff] }
 0x25d   : > { %v7808_v50 = vld [vmem:[#allocation2 + $0x90] sm:$0xff]  ;;  %v7810_v32 = vld [vmem:[#allocation2 + $0x84] sm:$0xff]  ;;  %v5807_v56 = vpack.i.bf16 %v7804_v10, %v7238_v24  ;;  %v5466_v31 = vunpack.i.h.bf16 %v7727_v44 }
 0x25e   : > { %v7735_v34 = vpop.permute.xlu0 %5448  ;;  %5743 = vrot.lane.b32.xlu1 %v5742_v30, %s9534_s22  ;;  %v7812_v30 = vld [vmem:[#allocation2 + $0x8a] sm:$0xff] }
 0x25f   : > { %3480 = vmatmul.mubr.f32.gmra.mxu1 %v2676_v17  ;;  %v5445_v17 = vunpack.i.l.bf16 %v7715_v59  ;;  %v9665_v59 = vld [vmem:[#allocation23_spill] sm:$0xff] }
 0x260   : > { %v7745_v57 = vpop.permute.xlu1 %5473  ;;  %5753 = vrot.lane.b32.xlu0 %v5752_v35, %s6291_s25 }
 0x262   : > { %v7748_v26 = vpop.permute.xlu0 %5458  ;;  %5748 = vrot.lane.b32.xlu1 %v5747_v25, %s9642_s13  ;;  %v5812_v25 = vpack.i.bf16 %v7229_v9, %v1638_v23 }
 0x264   : > { %v7753_v54 = vpop.permute.xlu1 %5483  ;;  %5758 = vrot.lane.b32.xlu0 %v5757_v61, %s9526_s16  ;;  %v5465_v61 = vunpack.i.l.bf16 %v7727_v44  ;;  %v6148_v44 = vld [vmem:[#allocation2 + $0x28] sm:$0xff] }
 0x266   : > { %v7758_v0 = vpop.permute.xlu0 %5468  ;;  %5768 = vrot.lane.b32.xlu1 %v5767_v36, %s6291_s25  ;;  %v5451_v36 = vunpack.i.h.bf16 %v7735_v34 }
 0x268   : > { %v7763_v7 = vpop.permute.xlu1 %5488  ;;  %5763 = vrot.lane.b32.xlu0 %v5762_v1, %s9641_s15  ;;  %v5450_v1 = vunpack.i.l.bf16 %v7735_v34 }
 0x26a   : > { %v7770_v38 = vpop.permute.xlu0 %5478  ;;  %5778 = vrot.lane.b32.xlu1 %v5777_v55, %s9561_s14 }
 0x26c   : > { %v7777_v20 = vpop.permute.xlu1 %5498  ;;  %5773 = vrot.lane.b32.xlu0 %v5772_v22, %s9534_s22  ;;  %v5822_v22 = vpack.i.bf16 %v7613_v45, %v9665_v59 }
 0x26e   : > { %v7782_v33 = vpop.permute.xlu0 %5493  ;;  %5788 = vrot.lane.b32.xlu1 %v5787_v15, %s9526_s16  ;;  %v5817_v15 = vpack.i.bf16 %v1638_v23, %v7808_v50 }
 0x270   : > { %v7789_v58 = vpop.permute.xlu1 %5503  ;;  %5783 = vrot.lane.b32.xlu0 %v5782_v42, %s9532_s24  ;;  %v5827_v42 = vpack.i.bf16 %v7221_v60, %v7810_v32 }
 0x271   : > { %9659 = vst [vmem:[#allocation29_spill] sm:$0xff] %v7789_v58  ;;  %v6156_v58 = vld [vmem:[#allocation2 + $0x7a] sm:$0xff] }
 0x272   : > { %v7796_v19 = vpop.permute.xlu0 %5508  ;;  %5798 = vrot.lane.b32.xlu1 %v5797_v47, %s9641_s15  ;;  %v5837_v47 = vpack.i.bf16 %v7528_v41, %v7812_v30  ;;  %v6149_v41 = vld [vmem:[#allocation2 + $0x30] sm:$0xff] }
 0x273   : > { %9660 = vst [vmem:[#allocation15_spill] sm:$0xff] %v7796_v19  ;;  %v5471_v19 = vunpack.i.h.bf16 %v7758_v0 }
 0x274   : > { %v7799_v12 = vpop.permute.xlu1 %5513  ;;  %5793 = vrot.lane.b32.xlu0 %v5792_v62, %s9642_s13  ;;  %v2570_v62 = vsel %vm1496_vm1, %v6148_v44, %v5406_v6  ;;  %v2571_v6 = vsel %vm1496_vm1, %v6149_v41, %v5466_v31 }
 0x275   : > { %9661 = vst [vmem:[#allocation21_spill] sm:$0xff] %v7799_v12  ;;  %v5461_v12 = vunpack.i.h.bf16 %v7748_v26  ;;  %v2587_v45 = vsel %vm498_vm0, %v2570_v62, %v5446_v21  ;;  %v5475_v62 = vunpack.i.l.bf16 %v7745_v57 }
 0x276   : > { %v7816_v35 = vpop.permute.xlu0 %5518  ;;  %5803 = vrot.lane.b32.xlu1 %v5802_v2, %s9534_s22  ;;  %v9666_v2 = vld [vmem:[#allocation17_spill] sm:$0xff] }
 0x277   : > { %9663 = vst [vmem:[#allocation27_spill] sm:$0xff] %v7816_v35  ;;  %v2694_v34 = vsel %vm1496_vm1, %v9666_v2, %v5405_v16  ;;  %v9668_v16 = vld [vmem:[#allocation24_spill] sm:$0xff]  ;;  %v5480_v2 = vunpack.i.l.bf16 %v7770_v38 }
 0x278   : > { %v7826_v55 = vpop.permute.xlu1 %5523  ;;  %5808 = vrot.lane.b32.xlu0 %v5807_v56, %s9561_s14  ;;  %v5460_v56 = vunpack.i.l.bf16 %v7748_v26  ;;  %v2711_v23 = vsel %vm498_vm0, %v2694_v34, %v5445_v17  ;;  %v2695_v44 = vsel %vm1496_vm1, %v9668_v16, %v5465_v61  ;;  %v2605_v26 = vsel %vm2599_vm2, %v2587_v45, %v5451_v36 }
 0x279   : > { %9664 = vst [vmem:[#allocation13_spill] sm:$0xff] %v7826_v55  ;;  %v5470_v55 = vunpack.i.l.bf16 %v7758_v0  ;;  %v2728_v21 = vsel %vm2599_vm2, %v2711_v23, %v5450_v1  ;;  %v5476_v17 = vunpack.i.h.bf16 %v7745_v57  ;;  %v5481_v0 = vunpack.i.h.bf16 %v7770_v38 }
 0x27a   : > { %v7845_v35 = vpop.permute.xlu0 %5528  ;;  %5813 = vrot.lane.b32.xlu1 %v5812_v25, %s9532_s24  ;;  %v2623_v25 = vsel %vm2617_vm3, %v2605_v26, %v5461_v12  ;;  %v2745_v31 = vsel %vm2617_vm3, %v2728_v21, %v5460_v56  ;;  %v5486_v61 = vunpack.i.h.bf16 %v7753_v54  ;;  %v5485_v36 = vunpack.i.l.bf16 %v7753_v54 }
 0x27b   : > { %9667 = vst [vmem:[#allocation22_spill] sm:$0xff] %v7845_v35  ;;  %v5491_v1 = vunpack.i.h.bf16 %v7763_v7  ;;  %v5490_v57 = vunpack.i.l.bf16 %v7763_v7  ;;  %v2762_v38 = vsel %vm2635_vm4, %v2745_v31, %v5470_v55  ;;  %v2641_v23 = vsel %vm2635_vm4, %v2623_v25, %v5471_v19  ;;  %v7882_v25 = vld [vmem:[#allocation2 + $0x6b] sm:$0xff] }
 0x27c   : > { %v7857_v34 = vpop.permute.xlu1 %5533  ;;  %5823 = vrot.lane.b32.xlu0 %v5822_v22, %s6291_s25  ;;  %v5501_v22 = vunpack.i.h.bf16 %v7777_v20  ;;  %v5500_v12 = vunpack.i.l.bf16 %v7777_v20  ;;  %v2588_v16 = vsel %vm498_vm0, %v2571_v6, %v5476_v17  ;;  %v2712_v54 = vsel %vm498_vm0, %v2695_v44, %v5475_v62 }
 0x27d   : > { %9669 = vst [vmem:[#allocation23_spill] sm:$0xff] %v7857_v34  ;;  %v2779_v7 = vsel %vm2653_vm5, %v2762_v38, %v5480_v2  ;;  %v2659_v55 = vsel %vm2653_vm5, %v2641_v23, %v5481_v0  ;;  %v2606_v19 = vsel %vm2599_vm2, %v2588_v16, %v5486_v61  ;;  %v7890_v0 = vld [vmem:[#allocation2 + $0x71] sm:$0xff]  ;;  %v5436_v61 = vunpack.i.h.bf16 %v7693_v52 }
 0x27e   : > { %v5544_v45 = vpop.permute.xlu0 %5543  ;;  %5818 = vrot.lane.b32.xlu1 %v5817_v15, %s9642_s13  ;;  %v2729_v15 = vsel %vm2599_vm2, %v2712_v54, %v5485_v36  ;;  %v2624_v6 = vsel %vm2617_vm3, %v2606_v19, %v5491_v1  ;;  %v5435_v36 = vunpack.i.l.bf16 %v7693_v52  ;;  %v7901_v23 = vld [vmem:[#allocation2 + $0x8c] sm:$0xff] }
 0x27f   : > { %v5546_v56 = vunpack.i.h.bf16 %v5544_v45  ;;  %v5545_v41 = vunpack.i.l.bf16 %v5544_v45  ;;  %v2746_v44 = vsel %vm2617_vm3, %v2729_v15, %v5490_v57  ;;  %v2642_v31 = vsel %vm2635_vm4, %v2624_v6, %v5501_v22  ;;  %v7897_v57 = vld [vmem:[#allocation2 + $0x82] sm:$0xff]  ;;  %9670 = vst [vmem:[#allocation17_spill] sm:$0xff] %v7901_v23  ;;  %v6153_v19 = vld [vmem:[#allocation2 + $0x72] sm:$0xff] }
 0x280   : > { %v7873_v26 = vpop.permute.xlu1 %5538  ;;  %5828 = vrot.lane.b32.xlu0 %v5827_v42, %s9526_s16  ;;  %v6150_v42 = vld [vmem:[#allocation2 + $0x85] sm:$0xff]  ;;  %v2763_v2 = vsel %vm2635_vm4, %v2746_v44, %v5500_v12  ;;  %v5857_v15 = vpack.i.bf16 %v6153_v19, %v7901_v23  ;;  %v6154_v6 = vld [vmem:[#allocation2 + $0x76] sm:$0xff]  ;;  %v9672_v19 = vmov 0.0  }
 0x281   : > { %v2796_v20 = vsel %vm2671_vm6, %v2779_v7, %v5545_v41  ;;  %v2677_v21 = vsel %vm2671_vm6, %v2659_v55, %v5546_v56  ;;  %v5832_v62 = vpack.i.bf16 %v7882_v25, %v6150_v42  ;;  %v2780_v22 = vsel %vm2653_vm5, %v2763_v2, %v5435_v36  ;;  %v7907_v12 = vld [vmem:[#allocation2 + $0x86] sm:$0xff]  ;;  %v7926_v42 = vld [vmem:[#allocation2 + $0x73] sm:$0xff] }
 0x282   : > { %v7886_v17 = vpop.permute.xlu0 %5548  ;;  %3484 = vmatprep.mubr.f32.mxu1 %v2796_v20  ;;  %5838 = vrot.lane.b32.xlu1 %v5837_v47, %s6291_s25  ;;  %v5847_v47 = vpack.i.bf16 %v7890_v0, %v7897_v57  ;;  %v5842_v52 = vpack.i.bf16 %v7582_v37, %v7907_v12  ;;  %v2660_v41 = vsel %vm2653_vm5, %v2642_v31, %v5436_v61  ;;  %v7914_v7 = vld [vmem:[#allocation2 + $0x87] sm:$0xff]  ;;  %v9686_v23 = vld [vmem:[#allocation10_spill] sm:$0xff] }
 0x283   : > { %3485 = vmatmul.mubr.f32.gmra.mxu1 %v2677_v21  ;;  %v7920_v20 = vld [vmem:[#allocation2 + $0x8d] sm:$0xff]  ;;  %v5852_v44 = vpack.i.bf16 %v6154_v6, %v7914_v7  ;;  %v6155_v6 = vld [vmem:[#allocation2 + $0x7e] sm:$0xff] }
 0x284   : > { %v5559_v1 = vpop.permute.xlu1 %5558  ;;  %5833 = vrot.lane.b32.xlu0 %v5832_v62, %s9641_s15  ;;  %9671 = vst [vmem:[#allocation24_spill] sm:$0xff] %v7920_v20  ;;  %v7928_v62 = vld [vmem:[#allocation2 + $0x88] sm:$0xff]  ;;  %v5867_v31 = vpack.i.bf16 %v7926_v42, %v7920_v20  ;;  %v8031_v20 = vld [vmem:[#allocation2 + $0x98] sm:$0xff] }
 0x285   : > { %v5561_v45 = vunpack.i.h.bf16 %v5559_v1  ;;  %v5560_v38 = vunpack.i.l.bf16 %v5559_v1  ;;  %v7935_v61 = vld [vmem:[#allocation2 + $0x8e] sm:$0xff]  ;;  %v5862_v1 = vpack.i.bf16 %v7775_v4, %v7928_v62 }
 0x286   : > { %v7903_v56 = vpop.permute.xlu0 %5553  ;;  %5848 = vrot.lane.b32.xlu1 %v5847_v47, %s9561_s14 }
 0x287   : > { %v2797_v16 = vsel %vm2671_vm6, %v2780_v22, %v5560_v38  ;;  %v2678_v54 = vsel %vm2671_vm6, %v2660_v41, %v5561_v45  ;;  %v5872_v45 = vpack.i.bf16 %v7741_v63, %v7935_v61  ;;  %v7947_v38 = vld [vmem:[#allocation2 + $0x79] sm:$0xff]  ;;  %v1640_v22 = vld [vmem:[#allocation2 + $0x8f] sm:$0xff]  ;;  %v5556_v43 = vunpack.i.h.bf16 %v7903_v56 }
 0x288   : > { %v7916_v55 = vpop.permute.xlu1 %5568  ;;  %3489 = vmatprep.mubr.f32.mxu1 %v2797_v16  ;;  %5843 = vrot.lane.b32.xlu0 %v5842_v52, %s9534_s22  ;;  %v3356_v52 = vld [vmem:[%s9586_s3 + $0x178] sm:$0xff]  ;;  %v3355_v41 = vld [vmem:[%s9586_s3 + $0x170] sm:$0xff]  ;;  %v5877_v4 = vpack.i.bf16 %v7947_v38, %v7812_v30 }
 0x289   : > { %3490 = vmatmul.mubr.f32.gmra.mxu1 %v2678_v54  ;;  %v7960_v54 = vld [vmem:[#allocation2 + $0x92] sm:$0xff] }
 0x28a   : > { %v7922_v21 = vpop.permute.xlu0 %5563  ;;  %5858 = vrot.lane.b32.xlu1 %v5857_v15, %s9526_s16  ;;  %3546 = vmatpush1.msra.mxu1 %v3356_v52  ;;  %v5892_v52 = vpack.i.bf16 %v7787_v49, %v7960_v54  ;;  %s9679_s16 = smov 32  }
 0x28b   : > { %3547 = vmatprep.subr.mxu1 %v9672_v19 }
 0x28c   : > { %v7930_v2 = vpop.permute.xlu1 %5578  ;;  %5853 = vrot.lane.b32.xlu0 %v5852_v44, %s9532_s24  ;;  %v5882_v44 = vpack.i.bf16 %v6155_v6, %v1640_v22  ;;  %3548 = vmatpush1.msra.mxu1 %v3355_v41  ;;  %v3353_v41 = vld [vmem:[%s9586_s3 + $0x160] sm:$0xff] }
 0x28d   : > { %3549 = vmatprep.subr.mxu1 %v9672_v19 }
 0x28e   : > { %v7937_v36 = vpop.permute.xlu0 %5573  ;;  %5868 = vrot.lane.b32.xlu1 %v5867_v31, %s9641_s15  ;;  %v7966_v31 = vld [vmem:[#allocation2 + $0xa0] sm:$0xff] }
 0x28f   : > { %9673 = vst [vmem:[#allocation30_spill] sm:$0xff] %v7966_v31  ;;  %v5887_v34 = vpack.i.bf16 %v1640_v22, %v7966_v31  ;;  %v3351_v22 = vld [vmem:[%s9586_s3 + $0x150] sm:$0xff]  ;;  %v5495_v31 = vunpack.i.l.bf16 %v7782_v33 }
 0x290   : > { %v7942_v47 = vpop.permute.xlu1 %5588  ;;  %5863 = vrot.lane.b32.xlu0 %v5862_v1, %s9642_s13  ;;  %v3354_v1 = vld [vmem:[%s9586_s3 + $0x168] sm:$0xff] }
 0x291   : > { %3550 = vmatpush1.msra.mxu1 %v3354_v1  ;;  %v3352_v1 = vld [vmem:[%s9586_s3 + $0x158] sm:$0xff] }
 0x292   : > { %v7955_v16 = vpop.permute.xlu0 %5583  ;;  %5873 = vrot.lane.b32.xlu1 %v5872_v45, %s9534_s22  ;;  %3551 = vmatprep.subr.mxu1 %v9672_v19  ;;  %s6293_s22 = smov [#allocation3]  }
 0x293   : > { %3552 = vmatpush1.msra.mxu1 %v3353_v41  ;;  %v3350_v41 = vld [vmem:[%s9586_s3 + $0x148] sm:$0xff] }
 0x294   : > { %v7963_v15 = vpop.permute.xlu1 %5593  ;;  %5878 = vrot.lane.b32.xlu0 %v5877_v4, %s9561_s14  ;;  %v7977_v4 = vld [vmem:[#allocation2 + $0x94] sm:$0xff]  ;;  %3553 = vmatprep.subr.mxu1 %v9672_v19 }
 0x295   : > { %9674 = vst [vmem:[#allocation31_spill] sm:$0xff] %v7977_v4  ;;  %v5897_v27 = vpack.i.bf16 %v6156_v58, %v7977_v4  ;;  %3554 = vmatpush1.msra.mxu1 %v3352_v1  ;;  %v8013_v1 = vld [vmem:[#allocation2 + $0x81] sm:$0xff] }
 0x296   : > { %v7972_v45 = vpop.permute.xlu0 %5598  ;;  %5883 = vrot.lane.b32.xlu1 %v5882_v44, %s9532_s24  ;;  %v7987_v44 = vld [vmem:[#allocation2 + $0x9a] sm:$0xff]  ;;  %3555 = vmatprep.subr.mxu1 %v9672_v19  ;;  %s6196_s24 = sshll.u32 %s6293_s22, 4  ;;  %s6197_s24 = int_to_ptr.vmem [resolvable:$false] %s6196_s24 }
 0x297   : > { %9675 = vst [vmem:[#allocation32_spill] sm:$0xff] %v7987_v44  ;;  %v5907_v58 = vpack.i.bf16 %v7732_v8, %v7987_v44  ;;  %3556 = vmatpush1.msra.mxu1 %v3351_v22  ;;  %v8027_v22 = vld [vmem:[#allocation2 + $0x9d] sm:$0xff]  ;;  %v5496_v44 = vunpack.i.h.bf16 %v7782_v33  ;;  %v5917_v33 = vpack.i.bf16 %v8013_v1, %v7960_v54  ;;  %s6198_s29 = scalar_lea.vmem %s6197_s24, 32 }
 0x298   : > { %v7983_v6 = vpop.permute.xlu1 %5603  ;;  %5893 = vrot.lane.b32.xlu0 %v5892_v52, %s6291_s25  ;;  %v7997_v52 = vld [vmem:[#allocation2 + $0x95] sm:$0xff]  ;;  %3557 = vmatprep.subr.mxu1 %v9672_v19  ;;  %9683 = vst [vmem:[#allocation39_spill] sm:$0xff] %v8027_v22  ;;  %v8054_v4 = vld [vmem:[#allocation2 + $0x9e] sm:$0xff] }
 0x299   : > { %9677 = vst [vmem:[#allocation34_spill] sm:$0xff] %v7997_v52  ;;  %3558 = vmatpush1.msra.mxu1 %v3350_v41  ;;  %v5550_v41 = vunpack.i.l.bf16 %v7886_v17 }
 0x29a   : > { %v7993_v35 = vpop.permute.xlu0 %5608  ;;  %5888 = vrot.lane.b32.xlu1 %v5887_v34, %s9642_s13  ;;  %v8011_v34 = vld [vmem:[#allocation2 + $0x7b] sm:$0xff]  ;;  %3559 = vmatprep.subr.mxu1 %v9672_v19 }
 0x29b   : > { %9676 = vst [vmem:[#allocation33_spill] sm:$0xff] %v7993_v35  ;;  %v8015_v35 = vld [vmem:[#allocation2 + $0x96] sm:$0xff] }
 0x29c   : > { %v8006_v39 = vpop.permute.xlu1 %5613  ;;  %5898 = vrot.lane.b32.xlu0 %v5897_v27, %s9679_s16  ;;  %9680 = vst [vmem:[#allocation36_spill] sm:$0xff] %v8015_v35  ;;  %v8023_v27 = vld [vmem:[#allocation2 + $0x9c] sm:$0xff]  ;;  %v5912_v11 = vpack.i.bf16 %v7768_v51, %v8015_v35 }
 0x29d   : > { %9678 = vst [vmem:[#allocation35_spill] sm:$0xff] %v8006_v39  ;;  %v5902_v39 = vpack.i.bf16 %v8011_v34, %v7997_v52  ;;  %9682 = vst [vmem:[#allocation38_spill] sm:$0xff] %v8023_v27  ;;  %v5551_v52 = vunpack.i.h.bf16 %v7886_v17  ;;  %v5927_v29 = vpack.i.bf16 %v7897_v57, %v8023_v27  ;;  %v6157_v27 = vld [vmem:[#allocation2 + $0x38] sm:$0xff]  ;;  %v5566_v57 = vunpack.i.h.bf16 %v7922_v21 }
 0x29e   : > { %v8018_v46 = vpop.permute.xlu0 %5618  ;;  %5908 = vrot.lane.b32.xlu1 %v5907_v58, %s6291_s25  ;;  %v3349_v58 = vld [vmem:[%s9586_s3 + $0x140] sm:$0xff]  ;;  %v2572_v35 = vsel %vm1496_vm1, %v6157_v27, %v5496_v44 }
 0x29f   : > { %9681 = vst [vmem:[#allocation37_spill] sm:$0xff] %v8018_v46  ;;  %v3348_v46 = vld [vmem:[%s9586_s3 + $0x138] sm:$0xff]  ;;  %3560 = vmatpush1.msra.mxu1 %v3349_v58  ;;  %v5922_v58 = vpack.i.bf16 %v7907_v12, %v8025_v18  ;;  %v3347_v18 = vld [vmem:[%s9586_s3 + $0x130] sm:$0xff]  ;;  %v2589_v12 = vsel %vm498_vm0, %v2572_v35, %v5551_v52  ;;  %v5590_v35 = vunpack.i.l.bf16 %v7942_v47  ;;  %v3345_v52 = vld [vmem:[%s9586_s3 + $0x120] sm:$0xff] }
 0x2a0   : > { %v8042_v13 = vpop.permute.xlu1 %5623  ;;  %5903 = vrot.lane.b32.xlu0 %v5902_v39, %s9641_s15  ;;  %3561 = vmatprep.subr.mxu1 %v9672_v19  ;;  %v5555_v39 = vunpack.i.l.bf16 %v7903_v56  ;;  %v2696_v56 = vsel %vm1496_vm1, %v9686_v23, %v5495_v31  ;;  %v5580_v23 = vunpack.i.l.bf16 %v7930_v2  ;;  %v2607_v27 = vsel %vm2599_vm2, %v2589_v12, %v5556_v43 }
 0x2a1   : > { %9684 = vst [vmem:[#allocation40_spill] sm:$0xff] %v8042_v13  ;;  %v5937_v13 = vpack.i.bf16 %v8052_v3, %v8027_v22  ;;  %3562 = vmatpush1.msra.mxu1 %v3348_v46  ;;  %v3346_v46 = vld [vmem:[%s9586_s3 + $0x128] sm:$0xff]  ;;  %v2713_v44 = vsel %vm498_vm0, %v2696_v56, %v5550_v41  ;;  %v5565_v22 = vunpack.i.l.bf16 %v7922_v21  ;;  %v5581_v41 = vunpack.i.h.bf16 %v7930_v2  ;;  %v6158_v21 = vld [vmem:[#allocation2 + $0x40] sm:$0xff]  ;;  %v3344_v2 = vld [vmem:[%s9586_s3 + $0x118] sm:$0xff] }
 0x2a2   : > { %v8058_v17 = vpop.permute.xlu0 %5628  ;;  %5918 = vrot.lane.b32.xlu1 %v5917_v33, %s9561_s14  ;;  %v5570_v33 = vunpack.i.l.bf16 %v7916_v55  ;;  %3563 = vmatprep.subr.mxu1 %v9672_v19  ;;  %v5575_v56 = vunpack.i.l.bf16 %v7937_v36  ;;  %v5595_v43 = vunpack.i.l.bf16 %v7963_v15  ;;  %s9694_s14 = smov 16  }
 0x2a3   : > { %9685 = vst [vmem:[#allocation41_spill] sm:$0xff] %v8058_v17  ;;  %v5571_v17 = vunpack.i.h.bf16 %v7916_v55  ;;  %3564 = vmatpush1.msra.mxu1 %v3347_v18 }
 0x2a4   : > { %v8082_v31 = vpop.permute.xlu1 %5633  ;;  %5913 = vrot.lane.b32.xlu0 %v5912_v11, %s9688_s30  ;;  %3565 = vmatprep.subr.mxu1 %v9672_v19  ;;  %v2730_v11 = vsel %vm2599_vm2, %v2713_v44, %v5555_v39  ;;  %v2697_v55 = vsel %vm1496_vm1, %v7468_v28, %v5570_v33  ;;  %v5605_v39 = vunpack.i.l.bf16 %v7983_v6  ;;  %v2625_v28 = vsel %vm2617_vm3, %v2607_v27, %v5566_v57 }
 0x2a5   : > { %9687 = vst [vmem:[#allocation10_spill] sm:$0xff] %v8082_v31  ;;  %3566 = vmatpush1.msra.mxu1 %v3346_v46  ;;  %v2573_v12 = vsel %vm1496_vm1, %v6158_v21, %v5571_v17  ;;  %v5576_v31 = vunpack.i.h.bf16 %v7937_v36  ;;  %v2714_v44 = vsel %vm498_vm0, %v2697_v55, %v5580_v23  ;;  %v5586_v46 = vunpack.i.h.bf16 %v7955_v16 }
 0x2a6   : > { %v8099_v18 = vpop.permute.xlu0 %5638  ;;  %5928 = vrot.lane.b32.xlu1 %v5927_v29, %s9679_s16  ;;  %3567 = vmatprep.subr.mxu1 %v9672_v19  ;;  %v5591_v29 = vunpack.i.h.bf16 %v7942_v47  ;;  %v5585_v17 = vunpack.i.l.bf16 %v7955_v16  ;;  %v2747_v36 = vsel %vm2617_vm3, %v2730_v11, %v5565_v22  ;;  %v2731_v33 = vsel %vm2599_vm2, %v2714_v44, %v5590_v35  ;;  %v3343_v47 = vld [vmem:[%s9586_s3 + $0x110] sm:$0xff] }
 0x2a7   : > { %9689 = vst [vmem:[#allocation42_spill] sm:$0xff] %v8099_v18  ;;  %3568 = vmatpush1.msra.mxu1 %v3345_v52  ;;  %v5596_v18 = vunpack.i.h.bf16 %v7963_v15  ;;  %v2590_v16 = vsel %vm498_vm0, %v2573_v12, %v5581_v41  ;;  %v2748_v23 = vsel %vm2617_vm3, %v2731_v33, %v5595_v43  ;;  %v2764_v22 = vsel %vm2635_vm4, %v2747_v36, %v5575_v56  ;;  %v1670_v52 = vld [vmem:[#allocation2 + $0x9f] sm:$0xff]  ;;  %v8145_v44 = vld [vmem:[#allocation2 + $0xaa] sm:$0xff] }
 0x2a8   : > { %v8115_v21 = vpop.permute.xlu1 %5643  ;;  %5923 = vrot.lane.b32.xlu0 %v5922_v58, %s9690_s12  ;;  %3569 = vmatprep.subr.mxu1 %v9672_v19  ;;  %v5606_v58 = vunpack.i.h.bf16 %v7983_v6  ;;  %v2643_v27 = vsel %vm2635_vm4, %v2625_v28, %v5576_v31  ;;  %v2765_v35 = vsel %vm2635_vm4, %v2748_v23, %v5605_v39  ;;  %v5540_v11 = vunpack.i.l.bf16 %v7873_v26  ;;  %v3342_v36 = vld [vmem:[%s9586_s3 + $0x108] sm:$0xff] }
 0x2a9   : > { %3570 = vmatpush1.msra.mxu1 %v3344_v2  ;;  %v2608_v41 = vsel %vm2599_vm2, %v2590_v16, %v5591_v29  ;;  %v2781_v56 = vsel %vm2653_vm5, %v2764_v22, %v5585_v17  ;;  %v2661_v43 = vsel %vm2653_vm5, %v2643_v27, %v5586_v46  ;;  %v5947_v46 = vpack.i.bf16 %v7935_v61, %v1670_v52  ;;  %v8162_v16 = vld [vmem:[#allocation2 + $0xa2] sm:$0xff] }
 0x2aa   : > { %v5649_v55 = vpop.permute.xlu0 %5648  ;;  %5938 = vrot.lane.b32.xlu1 %v5937_v13, %s9641_s15  ;;  %3571 = vmatprep.subr.mxu1 %v9672_v19  ;;  %v9691_v13 = vpack.i.bf16 %v7914_v7, %v8031_v20  ;;  %v2626_v31 = vsel %vm2617_vm3, %v2608_v41, %v5596_v18  ;;  %v9692_v7 = vpack.i.bf16 %v7810_v32, %v8054_v4  ;;  %v5541_v33 = vunpack.i.h.bf16 %v7873_v26  ;;  %v3341_v26 = vld [vmem:[%s9586_s3 + $0x100] sm:$0xff]  ;;  %v3358_v27 = vld [vmem:[%s9586_s3 + $0x188] sm:$0xff] }
 0x2ab   : > { %v5651_v57 = vunpack.i.h.bf16 %v5649_v55  ;;  %v5650_v15 = vunpack.i.l.bf16 %v5649_v55  ;;  %3572 = vmatpush1.msra.mxu1 %v3343_v47  ;;  %v2782_v18 = vsel %vm2653_vm5, %v2765_v35, %v5540_v11  ;;  %v2644_v17 = vsel %vm2635_vm4, %v2626_v31, %v5606_v58  ;;  %v3357_v52 = vld [vmem:[%s9586_s3 + $0x180] sm:$0xff] }
 0x2ac   : > { %v5664_v6 = vpop.permute.xlu1 %5663  ;;  %5933 = vrot.lane.b32.xlu0 %v9691_v13, %s9642_s13  ;;  %3573 = vmatprep.subr.mxu1 %v9672_v19  ;;  %v5962_v55 = vpack.i.bf16 %v7808_v50, %v8145_v44  ;;  %v2662_v58 = vsel %vm2653_vm5, %v2644_v17, %v5541_v33  ;;  %v9693_v41 = vpack.i.bf16 %v7212_v14, %v7221_v60 }
 0x2ad   : > { %v5665_v12 = vunpack.i.l.bf16 %v5664_v6  ;;  %v2798_v39 = vsel %vm2671_vm6, %v2781_v56, %v5650_v15  ;;  %v2679_v2 = vsel %vm2671_vm6, %v2661_v43, %v5651_v57  ;;  %v5666_v29 = vunpack.i.h.bf16 %v5664_v6  ;;  %3574 = vmatpush1.msra.mxu1 %v3342_v36 }
 0x2ae   : > { %v8148_v28 = vpop.permute.xlu0 %5653  ;;  %3494 = vmatprep.mubr.f32.mxu1 %v2798_v39  ;;  %5943 = vrot.lane.b32.xlu1 %v9692_v7, %s9688_s30  ;;  %v5952_v15 = vpack.i.bf16 %v7928_v62, %v8162_v16  ;;  %v5957_v6 = vpack.i.bf16 %v7890_v0, %v7804_v10  ;;  %v5977_v56 = vpack.i.bf16 %v7741_v63, %v7582_v37 }
 0x2af   : > { %3495 = vmatmul.mubr.f32.gmra.mxu1 %v2679_v2  ;;  %v2799_v47 = vsel %vm2671_vm6, %v2782_v18, %v5665_v12  ;;  %v2680_v57 = vsel %vm2671_vm6, %v2662_v58, %v5666_v29  ;;  %3575 = vmatprep.subr.mxu1 %v9672_v19  ;;  %v5972_v14 = vpack.i.bf16 %v7926_v42, %v7882_v25  ;;  %v5655_v29 = vunpack.i.l.bf16 %v8148_v28 }
 0x2b0   : > { %v8164_v23 = vpop.permute.xlu1 %5673  ;;  %3499 = vmatprep.mubr.f32.mxu1 %v2799_v47  ;;  %5948 = vrot.lane.b32.xlu0 %v5947_v46, %s9690_s12  ;;  %v9695_v37 = vpack.i.bf16 %v7216_v5, %v7229_v9  ;;  %v9696_v12 = vpack.i.bf16 %v7176_v48, %v7183_v53  ;;  %v5997_v25 = vpack.i.bf16 %v8013_v1, %v7947_v38  ;;  %v5601_v48 = vunpack.i.h.bf16 %v7972_v45 }
 0x2b1   : > { %3576 = vmatpush1.msra.mxu1 %v3341_v26  ;;  %v5992_v39 = vpack.i.bf16 %v7732_v8, %v7787_v49  ;;  %v6007_v5 = vpack.i.bf16 %v8052_v3, %v8011_v34  ;;  %v5600_v53 = vunpack.i.l.bf16 %v7972_v45  ;;  %v5656_v9 = vunpack.i.h.bf16 %v8148_v28  ;;  %v8246_v49 = vld [vmem:[#allocation2 + $0x91] sm:$0xff] }
 0x2b2   : > { %v8173_v22 = vpop.permute.xlu0 %5658  ;;  %5963 = vrot.lane.b32.xlu1 %v5962_v55, %s6291_s25  ;;  %3605 = vmatprep.subr.mxu1 %v9672_v19  ;;  %v5676_v7 = vunpack.i.h.bf16 %v8164_v23  ;;  %v5675_v18 = vunpack.i.l.bf16 %v8164_v23  ;;  %v6012_v45 = vpack.i.bf16 %v7810_v32, %v7768_v51  ;;  %v9697_v36 = vpack.i.bf16 %v9665_v59, %v7238_v24  ;;  %v8264_v23 = vld [vmem:[#allocation2 + $0x89] sm:$0xff]  ;;  %v9699_v24 = vld [vmem:[#allocation31_spill] sm:$0xff] }
 0x2b3   : > { %3500 = vmatmul.mubr.f32.gmra.mxu1 %v2680_v57  ;;  %v5661_v3 = vunpack.i.h.bf16 %v8173_v22  ;;  %v5660_v34 = vunpack.i.l.bf16 %v8173_v22  ;;  %v6027_v33 = vpack.i.bf16 %v7808_v50, %v7928_v62  ;;  %v6037_v47 = vpack.i.bf16 %v7960_v54, %v7812_v30  ;;  %v6159_v51 = vld [vmem:[#allocation2 + $0x48] sm:$0xff]  ;;  %v6160_v62 = vld [vmem:[#allocation2 + $0x50] sm:$0xff] }
 0x2b4   : > { %v8183_v35 = vpop.permute.xlu1 %5683  ;;  %5953 = vrot.lane.b32.xlu0 %v5952_v15, %s6291_s25  ;;  %3606 = vmatpush2.msra.mxu1 %v3358_v27  ;;  %v2574_v32 = vsel %vm1496_vm1, %v6159_v51, %v5601_v48  ;;  %v2698_v55 = vsel %vm1496_vm1, %v7640_v40, %v5600_v53  ;;  %v6032_v58 = vpack.i.bf16 %v8246_v49, %v8264_v23  ;;  %v9698_v26 = vld [vmem:[#allocation17_spill] sm:$0xff]  ;;  %v9700_v54 = vld [vmem:[#allocation28_spill] sm:$0xff]  ;;  %v9702_v40 = vld [vmem:[#allocation26_spill] sm:$0xff] }
 0x2b5   : > { %3607 = vmatprep.subr.mxu1 %v9672_v19  ;;  %v6047_v59 = vpack.i.bf16 %v9699_v24, %v9698_v26  ;;  %v2591_v22 = vsel %vm498_vm0, %v2574_v32, %v5656_v9  ;;  %v2715_v50 = vsel %vm498_vm0, %v2698_v55, %v5655_v29  ;;  %v2575_v30 = vsel %vm1496_vm1, %v6160_v62, %v5676_v7  ;;  %v9701_v27 = vld [vmem:[#allocation9_spill] sm:$0xff]  ;;  %v9705_v53 = vld [vmem:[#allocation19_spill] sm:$0xff]  ;;  %v9707_v62 = vld [vmem:[#allocation12_spill] sm:$0xff] }
 0x2b6   : > { %v8190_v11 = vpop.permute.xlu0 %5668  ;;  %5968 = vrot.lane.b32.xlu1 %v9693_v41, %s9642_s13  ;;  %3608 = vmatpush2.msra.mxu1 %v3357_v52  ;;  %v2699_v57 = vsel %vm1496_vm1, %v9700_v54, %v5675_v18  ;;  %v9703_v52 = vpack.i.bf16 %v9701_v27, %v9702_v40  ;;  %v2732_v41 = vsel %vm2599_vm2, %v2715_v50, %v5660_v34  ;;  %v1691_v24 = vld [vmem:[#allocation2 + $0xa1] sm:$0xff] }
 0x2b7   : > { %3776 = vmatprep.subr.mxu1 %v9672_v19  ;;  %v5671_v46 = vunpack.i.h.bf16 %v8190_v11  ;;  %v5670_v28 = vunpack.i.l.bf16 %v8190_v11  ;;  %v2609_v11 = vsel %vm2599_vm2, %v2591_v22, %v5661_v3 }
 0x2b8   : > { %v8199_v13 = vpop.permute.xlu1 %5693  ;;  %5958 = vrot.lane.b32.xlu0 %v5957_v6, %s9690_s12 }
 0x2b9   : > { %v5696_v18 = vunpack.i.h.bf16 %v8199_v13  ;;  %v5695_v3 = vunpack.i.l.bf16 %v8199_v13 }
 0x2ba   : > { %v8205_v43 = vpop.permute.xlu0 %5678  ;;  %5978 = vrot.lane.b32.xlu1 %v5977_v56, %s9694_s14 }
 0x2bb   : > { %v5680_v34 = vunpack.i.l.bf16 %v8205_v43 }
 0x2bc   : > { %v8210_v60 = vpop.permute.xlu1 %5698  ;;  %5973 = vrot.lane.b32.xlu0 %v5972_v14, %s6291_s25  ;;  %v5686_v14 = vunpack.i.h.bf16 %v8183_v35 }
 0x2bd   : > { %v5701_v32 = vunpack.i.h.bf16 %v8210_v60  ;;  %v5700_v55 = vunpack.i.l.bf16 %v8210_v60 }
 0x2be   : > { %v8213_v31 = vpop.permute.xlu0 %5688  ;;  %5988 = vrot.lane.b32.xlu1 %v9695_v37, %s9641_s15  ;;  %v5685_v37 = vunpack.i.l.bf16 %v8183_v35  ;;  %v5681_v35 = vunpack.i.h.bf16 %v8205_v43  ;;  %v9706_v43 = vld [vmem:[#allocation16_spill] sm:$0xff] }
 0x2bf   : > { %v5691_v22 = vunpack.i.h.bf16 %v8213_v31  ;;  %v5690_v13 = vunpack.i.l.bf16 %v8213_v31  ;;  %v9708_v54 = vpack.i.bf16 %v9706_v43, %v9707_v62  ;;  %v1690_v62 = vld [vmem:[#allocation2 + $0x99] sm:$0xff] }
 0x2c0   : > { %v8219_v63 = vpop.permute.xlu1 %5708  ;;  %5983 = vrot.lane.b32.xlu0 %v9696_v12, %s9679_s16  ;;  %v2627_v12 = vsel %vm2617_vm3, %v2609_v11, %v5671_v46 }
 0x2c1   : > { %v5710_v60 = vunpack.i.l.bf16 %v8219_v63 }
 0x2c2   : > { %v8227_v42 = vpop.permute.xlu0 %5703  ;;  %5998 = vrot.lane.b32.xlu1 %v5997_v25, %s9690_s12  ;;  %v2749_v25 = vsel %vm2617_vm3, %v2732_v41, %v5670_v28  ;;  %v2645_v41 = vsel %vm2635_vm4, %v2627_v12, %v5681_v35 }
 0x2c3   : > { %v2766_v31 = vsel %vm2635_vm4, %v2749_v25, %v5680_v34  ;;  %v2663_v12 = vsel %vm2653_vm5, %v2645_v41, %v5691_v22  ;;  %v8332_v34 = vld [vmem:[#allocation2 + $0x8b] sm:$0xff]  ;;  %v9711_v22 = vld [vmem:[#allocation34_spill] sm:$0xff] }
 0x2c4   : > { %v8232_v2 = vpop.permute.xlu1 %5713  ;;  %5993 = vrot.lane.b32.xlu0 %v5992_v39, %s9688_s30  ;;  %v1683_v41 = vld [vmem:[#allocation2 + $0xa5] sm:$0xff] }
 0x2c6   : > { %v8243_v8 = vpop.permute.xlu0 %5718  ;;  %6008 = vrot.lane.b32.xlu1 %v6007_v5, %s6291_s25  ;;  %v9704_v5 = vld [vmem:[#allocation14_spill] sm:$0xff] }
 0x2c8   : > { %v8254_v17 = vpop.permute.xlu1 %5723  ;;  %6003 = vrot.lane.b32.xlu0 %v9697_v36, %s9642_s13 }
 0x2ca   : > { %v5729_v15 = vpop.permute.xlu0 %5728  ;;  %6018 = vrot.lane.b32.xlu1 %v9703_v52, %s9679_s16  ;;  %v5711_v52 = vunpack.i.h.bf16 %v8219_v63  ;;  %v2716_v63 = vsel %vm498_vm0, %v2699_v57, %v5685_v37 }
 0x2cb   : > { %v5731_v6 = vunpack.i.h.bf16 %v5729_v15  ;;  %v5730_v56 = vunpack.i.l.bf16 %v5729_v15 }
 0x2cc   : > { %v5734_v39 = vpop.permute.xlu1 %5733  ;;  %6013 = vrot.lane.b32.xlu0 %v6012_v45, %s9694_s14 }
 0x2cd   : > { %v3197_v48 = vsel %vm1496_vm1, %v9704_v5, %v5731_v6  ;;  %v3196_v9 = vsel %vm1496_vm1, %v9705_v53, %v5730_v56  ;;  %v5736_v29 = vunpack.i.h.bf16 %v5734_v39  ;;  %v5735_v7 = vunpack.i.l.bf16 %v5734_v39 }
 0x2ce   : > { %v5739_v46 = vpop.permute.xlu0 %5738  ;;  %6028 = vrot.lane.b32.xlu1 %v6027_v33, %s9688_s30  ;;  %v2592_v53 = vsel %vm498_vm0, %v2575_v30, %v5686_v14 }
 0x2cf   : > { %v3213_v45 = vsel %vm498_vm0, %v3196_v9, %v5735_v7  ;;  %v3214_v28 = vsel %vm498_vm0, %v3197_v48, %v5736_v29  ;;  %v5741_v36 = vunpack.i.h.bf16 %v5739_v46  ;;  %v5740_v51 = vunpack.i.l.bf16 %v5739_v46  ;;  %v1677_v48 = vld [vmem:[#allocation2 + $0x93] sm:$0xff] }
 0x2d0   : > { %v5744_v50 = vpop.permute.xlu1 %5743  ;;  %6023 = vrot.lane.b32.xlu0 %v9708_v54, %s9641_s15  ;;  %v2610_v25 = vsel %vm2599_vm2, %v2592_v53, %v5696_v18  ;;  %v2733_v29 = vsel %vm2599_vm2, %v2716_v63, %v5695_v3  ;;  %v5646_v3 = vunpack.i.h.bf16 %v8115_v21  ;;  %v5645_v46 = vunpack.i.l.bf16 %v8115_v21  ;;  %v8374_v63 = vld [vmem:[#allocation2 + $0xa4] sm:$0xff] }
 0x2d1   : > { %v3230_v33 = vsel %vm2599_vm2, %v3213_v45, %v5740_v51  ;;  %v3231_v15 = vsel %vm2599_vm2, %v3214_v28, %v5741_v36  ;;  %v5746_v27 = vunpack.i.h.bf16 %v5744_v50  ;;  %v5745_v40 = vunpack.i.l.bf16 %v5744_v50  ;;  %v9709_v28 = vld [vmem:[#allocation36_spill] sm:$0xff] }
 0x2d2   : > { %v5754_v11 = vpop.permute.xlu0 %5753  ;;  %6038 = vrot.lane.b32.xlu1 %v6037_v47, %s9642_s13  ;;  %v2783_v47 = vsel %vm2653_vm5, %v2766_v31, %v5690_v13  ;;  %v2628_v30 = vsel %vm2617_vm3, %v2610_v25, %v5701_v32  ;;  %v2750_v57 = vsel %vm2617_vm3, %v2733_v29, %v5700_v55  ;;  %v6057_v36 = vpack.i.bf16 %v9709_v28, %v7935_v61  ;;  %v9710_v55 = vld [vmem:[#allocation24_spill] sm:$0xff]  ;;  %v1688_v28 = vld [vmem:[#allocation2 + $0xb0] sm:$0xff] }
 0x2d3   : > { %v8316_v6 = vsel %vm2617_vm3, %v3230_v33, %v5745_v40  ;;  %v8319_v56 = vsel %vm2617_vm3, %v3231_v15, %v5746_v27  ;;  %v5756_v39 = vunpack.i.h.bf16 %v5754_v11  ;;  %v5755_v5 = vunpack.i.l.bf16 %v5754_v11  ;;  %v1679_v33 = vld [vmem:[#allocation2 + $0xa3] sm:$0xff]  ;;  %v9712_v27 = vld [vmem:[#allocation30_spill] sm:$0xff] }
 0x2d4   : > { %v8323_v9 = vpop.permute.xlu1 %5748  ;;  %6033 = vrot.lane.b32.xlu0 %v6032_v58, %s9690_s12  ;;  %v6042_v58 = vpack.i.bf16 %v1677_v48, %v8332_v34  ;;  %v2767_v37 = vsel %vm2635_vm4, %v2750_v57, %v5710_v60  ;;  %v2646_v18 = vsel %vm2635_vm4, %v2628_v30, %v5711_v52  ;;  %v6052_v13 = vpack.i.bf16 %v9711_v22, %v9710_v55  ;;  %v8363_v52 = vld [vmem:[#allocation2 + $0x9b] sm:$0xff] }
 0x2d5   : > { %v2800_v7 = vsel %vm2671_vm6, %v2783_v47, %v5755_v5  ;;  %v2681_v35 = vsel %vm2671_vm6, %v2663_v12, %v5756_v39  ;;  %v2784_v32 = vsel %vm2653_vm5, %v2767_v37, %v5645_v46  ;;  %v2664_v21 = vsel %vm2653_vm5, %v2646_v18, %v5646_v3  ;;  %v9713_v5 = vld [vmem:[#allocation32_spill] sm:$0xff]  ;;  %v9714_v47 = vld [vmem:[#allocation39_spill] sm:$0xff] }
 0x2d6   : > { %v8336_v14 = vpop.permute.xlu0 %5758  ;;  %3504 = vmatprep.mubr.f32.mxu1 %v2800_v7  ;;  %6048 = vrot.lane.b32.xlu1 %v6047_v59, %s9694_s14  ;;  %v6067_v54 = vpack.i.bf16 %v1691_v24, %v1690_v62  ;;  %v6062_v40 = vpack.i.bf16 %v9712_v27, %v8031_v20  ;;  %v6077_v11 = vpack.i.bf16 %v1679_v33, %v8363_v52  ;;  %v5706_v25 = vunpack.i.h.bf16 %v8227_v42  ;;  %v1687_v7 = vld [vmem:[#allocation2 + $0xa8] sm:$0xff]  ;;  %v6162_v62 = vld [vmem:[#allocation2 + $0x60] sm:$0xff] }
 0x2d7   : > { %3505 = vmatmul.mubr.f32.gmra.mxu1 %v2681_v35  ;;  %v6072_v48 = vpack.i.bf16 %v8162_v16, %v9713_v5  ;;  %v6087_v12 = vpack.i.bf16 %v1683_v41, %v9714_v47  ;;  %v5705_v29 = vunpack.i.l.bf16 %v8227_v42  ;;  %v1685_v35 = vld [vmem:[#allocation2 + $0xa6] sm:$0xff]  ;;  %v5761_v30 = vunpack.i.h.bf16 %v8336_v14 }
 0x2d8   : > { %v5769_v45 = vpop.permute.xlu1 %5768  ;;  %6043 = vrot.lane.b32.xlu0 %v6042_v58, %s6291_s25  ;;  %v5760_v57 = vunpack.i.l.bf16 %v8336_v14  ;;  %v9715_v58 = vld [vmem:[#allocation38_spill] sm:$0xff] }
 0x2d9   : > { %v5771_v51 = vunpack.i.h.bf16 %v5769_v45  ;;  %v5770_v26 = vunpack.i.l.bf16 %v5769_v45  ;;  %v6082_v37 = vpack.i.bf16 %v8374_v63, %v9715_v58  ;;  %v6161_v14 = vld [vmem:[#allocation2 + $0x58] sm:$0xff]  ;;  %v2700_v24 = vsel %vm1496_vm1, %v7804_v10, %v5705_v29 }
 0x2da   : > { %v8350_v59 = vpop.permute.xlu0 %5763  ;;  %6058 = vrot.lane.b32.xlu1 %v6057_v36, %s9641_s15  ;;  %v6097_v36 = vpack.i.bf16 %v1688_v28, %v1687_v7 }
 0x2db   : > { %v2801_v50 = vsel %vm2671_vm6, %v2784_v32, %v5770_v26  ;;  %v2682_v43 = vsel %vm2671_vm6, %v2664_v21, %v5771_v51  ;;  %v5766_v18 = vunpack.i.h.bf16 %v8350_v59  ;;  %v5765_v3 = vunpack.i.l.bf16 %v8350_v59 }
 0x2dc   : > { %v5779_v61 = vpop.permute.xlu1 %5778  ;;  %3509 = vmatprep.mubr.f32.mxu1 %v2801_v50  ;;  %6053 = vrot.lane.b32.xlu0 %v6052_v13, %s9679_s16  ;;  %v6092_v51 = vpack.i.bf16 %v1685_v35, %v8054_v4  ;;  %v2576_v26 = vsel %vm1496_vm1, %v6161_v14, %v5706_v25  ;;  %v2717_v59 = vsel %vm498_vm0, %v2700_v24, %v5760_v57  ;;  %v1692_v35 = vld [vmem:[#allocation2 + $0xa9] sm:$0xff]  ;;  %v5751_v24 = vunpack.i.h.bf16 %v8323_v9 }
 0x2dd   : > { %3510 = vmatmul.mubr.f32.gmra.mxu1 %v2682_v43  ;;  %v5781_v46 = vunpack.i.h.bf16 %v5779_v61  ;;  %v5780_v45 = vunpack.i.l.bf16 %v5779_v61  ;;  %v2593_v22 = vsel %vm498_vm0, %v2576_v26, %v5761_v30  ;;  %v2734_v43 = vsel %vm2599_vm2, %v2717_v59, %v5765_v3  ;;  %v1693_v3 = vld [vmem:[#allocation2 + $0xb1] sm:$0xff] }
 0x2de   : > { %v5774_v15 = vpop.permute.xlu0 %5773  ;;  %6068 = vrot.lane.b32.xlu1 %v6067_v54, %s9690_s12  ;;  %v2611_v4 = vsel %vm2599_vm2, %v2593_v22, %v5766_v18 }
 0x2df   : > { %v5776_v32 = vunpack.i.h.bf16 %v5774_v15  ;;  %v5775_v55 = vunpack.i.l.bf16 %v5774_v15  ;;  %v2577_v61 = vsel %vm1496_vm1, %v6162_v62, %v5781_v46  ;;  %v2701_v10 = vsel %vm1496_vm1, %v7890_v0, %v5780_v45 }
 0x2e0   : > { %v8365_v60 = vpop.permute.xlu1 %5788  ;;  %6063 = vrot.lane.b32.xlu0 %v6062_v40, %s9688_s30 }
 0x2e1   : > { %v8369_v31 = vpop.f32.mrf.mxu1  ;;  %v5791_v54 = vunpack.i.h.bf16 %v8365_v60  ;;  %v5790_v33 = vunpack.i.l.bf16 %v8365_v60  ;;  %v2751_v41 = vsel %vm2617_vm3, %v2734_v43, %v5775_v55 }
 0x2e2   : > { %v5784_v39 = vpop.permute.xlu0 %5783  ;;  %6078 = vrot.lane.b32.xlu1 %v6077_v11, %s6291_s25  ;;  %v2629_v11 = vsel %vm2617_vm3, %v2611_v4, %v5776_v32  ;;  %v5750_v32 = vunpack.i.l.bf16 %v8323_v9 }
 0x2e3   : > { %v3463_v53 = vpop.f32.mrf.mxu1  ;;  %v5786_v13 = vunpack.i.h.bf16 %v5784_v39  ;;  %v5785_v21 = vunpack.i.l.bf16 %v5784_v39  ;;  %v2594_v30 = vsel %vm498_vm0, %v2577_v61, %v5791_v54  ;;  %v2718_v57 = vsel %vm498_vm0, %v2701_v10, %v5790_v33  ;;  %v1695_v10 = vld [vmem:[#allocation2 + $0xb2] sm:$0xff] }
 0x2e4   : > { %v8376_v20 = vpop.permute.xlu1 %5798  ;;  %6073 = vrot.lane.b32.xlu0 %v6072_v48, %s9642_s13  ;;  %v1684_v33 = vld [vmem:[#allocation2 + $0xad] sm:$0xff] }
 0x2e5   : > { %v5801_v39 = vunpack.i.h.bf16 %v8376_v20  ;;  %v5800_v5 = vunpack.i.l.bf16 %v8376_v20  ;;  %v2768_v60 = vsel %vm2635_vm4, %v2751_v41, %v5785_v21  ;;  %v2647_v47 = vsel %vm2635_vm4, %v2629_v11, %v5786_v13  ;;  %v1697_v21 = vld [vmem:[#allocation2 + $0xb3] sm:$0xff] }
 0x2e6   : > { %v5794_v16 = vpop.permute.xlu0 %5793  ;;  %6088 = vrot.lane.b32.xlu1 %v6087_v12, %s9679_s16  ;;  %v1689_v41 = vld [vmem:[#allocation2 + $0xb8] sm:$0xff] }
 0x2e7   : > { %v5796_v15 = vunpack.i.h.bf16 %v5794_v16  ;;  %v5795_v27 = vunpack.i.l.bf16 %v5794_v16  ;;  %v2612_v58 = vsel %vm2599_vm2, %v2594_v30, %v5801_v39 }
 0x2e8   : > { %v5804_v42 = vpop.permute.xlu1 %5803  ;;  %6083 = vrot.lane.b32.xlu0 %v6082_v37, %s9694_s14  ;;  %v2735_v37 = vsel %vm2599_vm2, %v2718_v57, %v5800_v5 }
 0x2e9   : > { %v5806_v48 = vunpack.i.h.bf16 %v5804_v42  ;;  %v5805_v53 = vunpack.i.l.bf16 %v5804_v42  ;;  %v2785_v16 = vsel %vm2653_vm5, %v2768_v60, %v5795_v27  ;;  %v8448_v27 = vld [vmem:[#allocation2 + $0xac] sm:$0xff] }
 0x2ea   : > { %v8396_v50 = vpop.permute.xlu0 %5808  ;;  %6098 = vrot.lane.b32.xlu1 %v6097_v36, %s9688_s30 }
 0x2eb   : > { %v2630_v45 = vsel %vm2617_vm3, %v2612_v58, %v5806_v48  ;;  %v2752_v28 = vsel %vm2617_vm3, %v2735_v37, %v5805_v53  ;;  %v1686_v48 = vld [vmem:[#allocation2 + $0xae] sm:$0xff]  ;;  %v5810_v60 = vunpack.i.l.bf16 %v8396_v50 }
 0x2ec   : > { %v5814_v40 = vpop.permute.xlu1 %5813  ;;  %6093 = vrot.lane.b32.xlu0 %v6092_v51, %s9641_s15  ;;  %v8433_v51 = vld [vmem:[#allocation2 + $0xab] sm:$0xff] }
 0x2ed   : > { %v5816_v12 = vunpack.i.h.bf16 %v5814_v40  ;;  %v5815_v25 = vunpack.i.l.bf16 %v5814_v40  ;;  %v6163_v58 = vld [vmem:[#allocation2 + $0x68] sm:$0xff] }
 0x2ee   : > { %v5824_v0 = vpop.permute.xlu0 %5823  ;;  %3109 = vrot.lane.b32.xlu1 %v8145_v44, %s9642_s13  ;;  %v2665_v44 = vsel %vm2653_vm5, %v2647_v47, %v5796_v15  ;;  %v1696_v47 = vld [vmem:[#allocation2 + $0xba] sm:$0xff] }
 0x2ef   : > { %v5826_v29 = vunpack.i.h.bf16 %v5824_v0  ;;  %v5825_v7 = vunpack.i.l.bf16 %v5824_v0  ;;  %v2769_v14 = vsel %vm2635_vm4, %v2752_v28, %v5815_v25  ;;  %v2648_v26 = vsel %vm2635_vm4, %v2630_v45, %v5816_v12 }
 0x2f0   : > { %v8417_v20 = vpop.permute.xlu1 %5818  ;;  %3056 = vrot.lane.b32.xlu0 %v1692_v35, %s9690_s12  ;;  %v2786_v43 = vsel %vm2653_vm5, %v2769_v14, %v5750_v32  ;;  %v2666_v62 = vsel %vm2653_vm5, %v2648_v26, %v5751_v24  ;;  %v5811_v0 = vunpack.i.h.bf16 %v8396_v50  ;;  %v2702_v50 = vsel %vm1496_vm1, %v7947_v38, %v5810_v60  ;;  %v6164_v32 = vld [vmem:[#allocation2 + $0x70] sm:$0xff] }
 0x2f1   : > { %v2802_v18 = vsel %vm2671_vm6, %v2785_v16, %v5825_v7  ;;  %v2683_v46 = vsel %vm2671_vm6, %v2665_v44, %v5826_v29  ;;  %v1694_v16 = vld [vmem:[#allocation2 + $0xb9] sm:$0xff] }
 0x2f2   : > { %v8428_v42 = vpop.permute.xlu0 %5828  ;;  %3514 = vmatprep.mubr.f32.mxu1 %v2802_v18  ;;  %3058 = vrot.lane.b32.xlu1 %v1693_v3, %s9690_s12  ;;  %v2578_v37 = vsel %vm1496_vm1, %v6163_v58, %v5811_v0 }
 0x2f3   : > { %v8431_v36 = vpop.f32.mrf.mxu1  ;;  %3515 = vmatmul.mubr.f32.gmra.mxu1 %v2683_v46  ;;  %v5831_v12 = vunpack.i.h.bf16 %v8428_v42  ;;  %v5830_v25 = vunpack.i.l.bf16 %v8428_v42 }
 0x2f4   : > { %v5839_v55 = vpop.permute.xlu1 %5838  ;;  %3167 = vrot.lane.b32.xlu0 %v8433_v51, %s6291_s25 }
 0x2f5   : > { %v5841_v22 = vunpack.i.h.bf16 %v5839_v55  ;;  %v5840_v59 = vunpack.i.l.bf16 %v5839_v55  ;;  %v3468_v13 = vpop.f32.mrf.mxu1  ;;  %v2595_v46 = vsel %vm498_vm0, %v2578_v37, %v5831_v12  ;;  %v2719_v45 = vsel %vm498_vm0, %v2702_v50, %v5830_v25 }
 0x2f6   : > { %v5834_v4 = vpop.permute.xlu0 %5833  ;;  %3169 = vrot.lane.b32.xlu1 %v1697_v21, %s6291_s25  ;;  %v5821_v37 = vunpack.i.h.bf16 %v8417_v20  ;;  %v5820_v50 = vunpack.i.l.bf16 %v8417_v20 }
 0x2f7   : > { %v2803_v61 = vsel %vm2671_vm6, %v2786_v43, %v5840_v59  ;;  %v2684_v9 = vsel %vm2671_vm6, %v2666_v62, %v5841_v22  ;;  %v5836_v7 = vunpack.i.h.bf16 %v5834_v4  ;;  %v5835_v35 = vunpack.i.l.bf16 %v5834_v4  ;;  %v1698_v22 = vld [vmem:[#allocation2 + $0xbb] sm:$0xff] }
 0x2f8   : > { %v5849_v54 = vpop.permute.xlu1 %5848  ;;  %3519 = vmatprep.mubr.f32.mxu1 %v2803_v61  ;;  %3111 = vrot.lane.b32.xlu0 %v1695_v10, %s9642_s13 }
 0x2f9   : > { %3520 = vmatmul.mubr.f32.gmra.mxu1 %v2684_v9  ;;  %v5851_v30 = vunpack.i.h.bf16 %v5849_v54  ;;  %v5850_v57 = vunpack.i.l.bf16 %v5849_v54  ;;  %v2613_v26 = vsel %vm2599_vm2, %v2595_v46, %v5836_v7  ;;  %v2736_v24 = vsel %vm2599_vm2, %v2719_v45, %v5835_v35 }
 0x2fa   : > { %v5844_v15 = vpop.permute.xlu0 %5843  ;;  %2895 = vrot.lane.b32.xlu1 %v1684_v33, %s9679_s16 }
 0x2fb   : > { %v5846_v18 = vunpack.i.h.bf16 %v5844_v15  ;;  %v5845_v3 = vunpack.i.l.bf16 %v5844_v15  ;;  %v2579_v55 = vsel %vm1496_vm1, %v6164_v32, %v5851_v30  ;;  %v2703_v38 = vsel %vm1496_vm1, %v8013_v1, %v5850_v57 }
 0x2fc   : > { %v5859_v40 = vpop.permute.xlu1 %5858  ;;  %2842 = vrot.lane.b32.xlu0 %v8448_v27, %s9694_s14 }
 0x2fd   : > { %v8452_v11 = vpop.f32.mrf.mxu1  ;;  %v5861_v59 = vunpack.i.h.bf16 %v5859_v40  ;;  %v5860_v13 = vunpack.i.l.bf16 %v5859_v40  ;;  %v2631_v62 = vsel %vm2617_vm3, %v2613_v26, %v5846_v18  ;;  %v2753_v61 = vsel %vm2617_vm3, %v2736_v24, %v5845_v3 }
 0x2fe   : > { %v5854_v39 = vpop.permute.xlu0 %5853  ;;  %3002 = vrot.lane.b32.xlu1 %v1689_v41, %s9688_s30 }
 0x2ff   : > { %v3473_v5 = vpop.f32.mrf.mxu1  ;;  %v5856_v28 = vunpack.i.h.bf16 %v5854_v39  ;;  %v5855_v42 = vunpack.i.l.bf16 %v5854_v39  ;;  %v2596_v0 = vsel %vm498_vm0, %v2579_v55, %v5861_v59  ;;  %v2720_v60 = vsel %vm498_vm0, %v2703_v38, %v5860_v13  ;;  %v9716_v55 = vld [vmem:[#allocation18_spill] sm:$0xff] }
 0x300   : > { %v5869_v53 = vpop.permute.xlu1 %5868  ;;  %2948 = vrot.lane.b32.xlu0 %v1686_v48, %s9641_s15  ;;  %v5415_v38 = vunpack.i.l.bf16 %v9716_v55  ;;  %v5416_v13 = vunpack.i.h.bf16 %v9716_v55 }
 0x301   : > { %v5871_v10 = vunpack.i.h.bf16 %v5869_v53  ;;  %v5870_v9 = vunpack.i.l.bf16 %v5869_v53  ;;  %v2770_v41 = vsel %vm2635_vm4, %v2753_v61, %v5855_v42  ;;  %v2649_v1 = vsel %vm2635_vm4, %v2631_v62, %v5856_v28  ;;  %v9718_v61 = vld [vmem:[#allocation11_spill] sm:$0xff] }
 0x302   : > { %v5864_v29 = vpop.permute.xlu0 %5863  ;;  %3113 = vrot.lane.b32.xlu1 %v1696_v47, %s9642_s13 }
 0x303   : > { %v5866_v21 = vunpack.i.h.bf16 %v5864_v29  ;;  %v5865_v4 = vunpack.i.l.bf16 %v5864_v29  ;;  %v2614_v25 = vsel %vm2599_vm2, %v2596_v0, %v5871_v10  ;;  %v2737_v29 = vsel %vm2599_vm2, %v2720_v60, %v5870_v9 }
 0x304   : > { %v5874_v44 = vpop.permute.xlu1 %5873  ;;  %3060 = vrot.lane.b32.xlu0 %v1694_v16, %s9690_s12  ;;  %v5425_v10 = vunpack.i.l.bf16 %v9718_v61 }
 0x305   : > { %v5876_v54 = vunpack.i.h.bf16 %v5874_v44  ;;  %v5875_v33 = vunpack.i.l.bf16 %v5874_v44  ;;  %v2787_v12 = vsel %vm2653_vm5, %v2770_v41, %v5865_v4  ;;  %v2667_v53 = vsel %vm2653_vm5, %v2649_v1, %v5866_v21  ;;  %v6166_v41 = vld [vmem:[#allocation2 + $0x33] sm:$0xff] }
 0x306   : > { %v8467_v14 = vpop.permute.xlu0 %5878  ;;  %v3191_v1 = vsel %vm1496_vm1, %v6166_v41, %v5416_v13 }
 0x307   : > { %v2632_v30 = vsel %vm2617_vm3, %v2614_v25, %v5876_v54  ;;  %v2754_v57 = vsel %vm2617_vm3, %v2737_v29, %v5875_v33  ;;  %v5881_v54 = vunpack.i.h.bf16 %v8467_v14  ;;  %v5880_v33 = vunpack.i.l.bf16 %v8467_v14  ;;  %v9719_v25 = vld [vmem:[#allocation20_spill] sm:$0xff] }
 0x308   : > { %v5884_v43 = vpop.permute.xlu1 %5883  ;;  %3171 = vrot.lane.b32.xlu0 %v1698_v22, %s6291_s25  ;;  %v9717_v22 = vld [vmem:[#allocation25_spill] sm:$0xff]  ;;  %v5430_v29 = vunpack.i.l.bf16 %v9719_v25  ;;  %s9413_s25 = sand.u32 1, %s6274_s18  }
 0x309   : > { %v5886_v39 = vunpack.i.h.bf16 %v5884_v43  ;;  %v5885_v40 = vunpack.i.l.bf16 %v5884_v43  ;;  %v5420_v20 = vunpack.i.l.bf16 %v9717_v22  ;;  %v5421_v21 = vunpack.i.h.bf16 %v9717_v22  ;;  %v6165_v43 = vld [vmem:[#allocation2 + $0x2b] sm:$0xff]  ;;  %s382_s0 = scalar_lea.vmem [#allocation3], %s9413_s25  ;;  %s4519_s15 = scalar_lea.sflag [#allocation4], %s9413_s25 }
 0x30a   : > { %v5894_v15 = vpop.permute.xlu0 %5893  ;;  %v3190_v62 = vsel %vm1496_vm1, %v6165_v43, %v5415_v38  ;;  %v6168_v43 = vld [vmem:[#allocation2 + $0x80] sm:$0xff]  ;;  %s4535_s2 = sshll.u32 %s382_s0, 4  ;;  %s4536_s2 = int_to_ptr.vmem [resolvable:$true] %s4535_s2 }
 0x30b   : > { %v5896_v5 = vunpack.i.h.bf16 %v5894_v15  ;;  %v5895_v48 = vunpack.i.l.bf16 %v5894_v15  ;;  %v2771_v44 = vsel %vm2635_vm4, %v2754_v57, %v5885_v40  ;;  %v2650_v58 = vsel %vm2635_vm4, %v2632_v30, %v5886_v39  ;;  %v6167_v30 = vld [vmem:[#allocation2 + $0x78] sm:$0xff]  ;;  %s6192_s12 = scalar_lea.vmem %s4536_s2, 16  ;;  %p6199_p0 = scmp.lt.s32.totalorder %s4536_s2, %s6197_s24 }
 0x30c   : > { %v8481_v47 = vpop.permute.xlu1 %5888  ;;  %v2788_v28 = vsel %vm2653_vm5, %v2771_v44, %v5820_v50  ;;  %v2668_v42 = vsel %vm2653_vm5, %v2650_v58, %v5821_v37  ;;  %v3207_v9 = vsel %vm498_vm0, %v3190_v62, %v5420_v20  ;;  %v2580_v57 = vsel %vm1496_vm1, %v6167_v30, %v5881_v54  ;;  %v9720_v50 = vld [vmem:[#allocation29_spill] sm:$0xff]  ;;  %v9721_v30 = vld [vmem:[#allocation27_spill] sm:$0xff]  ;;  %p6193_p11 = scmp.ne.s32.totalorder %s4536_s2, %s6192_s12  ;;  %p6200_p1 = scmp.lt.s32.totalorder %s6198_s29, %s6192_s12 }
 0x30d   : > { %v2804_v7 = vsel %vm2671_vm6, %v2787_v12, %v5895_v48  ;;  %v2685_v35 = vsel %vm2671_vm6, %v2667_v53, %v5896_v5  ;;  %v8518_v48 = vsel %vm498_vm0, %v3191_v1, %v5421_v21  ;;  %v5426_v53 = vunpack.i.h.bf16 %v9718_v61 }
 0x30e   : > { %v5899_v16 = vpop.permute.xlu0 %5898  ;;  %3524 = vmatprep.mubr.f32.mxu1 %v2804_v7  ;;  %v8523_v14 = vsel %vm2599_vm2, %v3207_v9, %v5425_v10  ;;  %p6194_p12 = pnand %p6193_p11, %p6393_p5  ;;  %p6201_p2 = por %p6200_p1, %p6199_p0 }
 0x30f   : > { %3525 = vmatmul.mubr.f32.gmra.mxu1 %v2685_v35  ;;  %v5901_v39 = vunpack.i.h.bf16 %v5899_v16  ;;  %v5900_v40 = vunpack.i.l.bf16 %v5899_v16  ;;  %v2704_v16 = vsel %vm1496_vm1, %v8264_v23, %v5880_v33 }
 0x310   : > { %v5909_v18 = vpop.permute.xlu1 %5908  ;;  %p6195_p13 = pneg %p6194_p12 }
 0x311   : > { %v5911_v3 = vunpack.i.h.bf16 %v5909_v18  ;;  %v5910_v46 = vunpack.i.l.bf16 %v5909_v18  ;;  %v5505_v18 = vunpack.i.l.bf16 %v9720_v50 }
 0x312   : > { %v8495_v45 = vpop.permute.xlu0 %5903  ;;  %p6202_p3 = pnand %p6201_p2, %p6195_p13 }
 0x313   : > { %v2805_v26 = vsel %vm2671_vm6, %v2788_v28, %v5910_v46  ;;  %v2686_v24 = vsel %vm2671_vm6, %v2668_v42, %v5911_v3  ;;  %v5905_v0 = vunpack.i.l.bf16 %v8495_v45  ;;  %v2597_v3 = vsel %vm498_vm0, %v2580_v57, %v5901_v39 }
 0x314   : > { %v5919_v32 = vpop.permute.xlu1 %5918  ;;  %3529 = vmatprep.mubr.f32.mxu1 %v2805_v26  ;;  %v2721_v46 = vsel %vm498_vm0, %v2704_v16, %v5900_v40  ;;  %v5906_v26 = vunpack.i.h.bf16 %v8495_v45  ;;  %v5520_v57 = vunpack.i.l.bf16 %v9721_v30 }
 0x315   : > { %3530 = vmatmul.mubr.f32.gmra.mxu1 %v2686_v24  ;;  %v5920_v60 = vunpack.i.l.bf16 %v5919_v32  ;;  %v5921_v44 = vunpack.i.h.bf16 %v5919_v32  ;;  %v2738_v24 = vsel %vm2599_vm2, %v2721_v46, %v5905_v0 }
 0x316   : > { %v8503_v59 = vpop.permute.xlu0 %5913 }
 0x317   : > { %v2705_v55 = vsel %vm1496_vm1, %v8246_v49, %v5920_v60  ;;  %v5915_v38 = vunpack.i.l.bf16 %v8503_v59  ;;  %v5916_v62 = vunpack.i.h.bf16 %v8503_v59  ;;  %v2615_v59 = vsel %vm2599_vm2, %v2597_v3, %v5906_v26 }
 0x318   : > { %v5929_v4 = vpop.permute.xlu1 %5928 }
 0x319   : > { %v5930_v7 = vunpack.i.l.bf16 %v5929_v4  ;;  %v5931_v28 = vunpack.i.h.bf16 %v5929_v4  ;;  %v2581_v4 = vsel %vm1496_vm1, %v6168_v43, %v5921_v44  ;;  %v2633_v16 = vsel %vm2617_vm3, %v2615_v59, %v5916_v62  ;;  %v6169_v62 = vld [vmem:[#allocation2 + $0x3b] sm:$0xff]  ;;  %v9725_v59 = vld [vmem:[#allocation21_spill] sm:$0xff] }
 0x31a   : > { %v8512_v15 = vpop.permute.xlu0 %5923  ;;  %v5431_v43 = vunpack.i.h.bf16 %v9719_v25  ;;  %v5515_v61 = vunpack.i.l.bf16 %v9725_v59 }
 0x31b   : > { %v8515_v5 = vpop.f32.mrf.mxu1  ;;  %v2722_v22 = vsel %vm498_vm0, %v2705_v55, %v5930_v7  ;;  %v5925_v45 = vunpack.i.l.bf16 %v8512_v15  ;;  %v2598_v49 = vsel %vm498_vm0, %v2581_v4, %v5931_v28  ;;  %v5926_v54 = vunpack.i.h.bf16 %v8512_v15 }
 0x31c   : > { %v5939_v12 = vpop.permute.xlu1 %5938  ;;  %v5890_v15 = vunpack.i.l.bf16 %v8481_v47  ;;  %v5521_v4 = vunpack.i.h.bf16 %v9721_v30 }
 0x31d   : > { %v3478_v35 = vpop.f32.mrf.mxu1  ;;  %v5940_v58 = vunpack.i.l.bf16 %v5939_v12  ;;  %v5941_v23 = vunpack.i.h.bf16 %v5939_v12  ;;  %v2755_v12 = vsel %vm2617_vm3, %v2738_v24, %v5915_v38  ;;  %v2651_v3 = vsel %vm2635_vm4, %v2633_v16, %v5926_v54  ;;  %v9722_v38 = vld [vmem:[#allocation13_spill] sm:$0xff] }
 0x31e   : > { %v5934_v37 = vpop.permute.xlu0 %5933 }
 0x31f   : > { %v8532_v42 = vpop.f32.mrf.mxu1  ;;  %v2739_v10 = vsel %vm2599_vm2, %v2722_v22, %v5940_v58  ;;  %v2616_v1 = vsel %vm2599_vm2, %v2598_v49, %v5941_v23  ;;  %v5936_v39 = vunpack.i.h.bf16 %v5934_v37  ;;  %v5935_v40 = vunpack.i.l.bf16 %v5934_v37  ;;  %v9723_v49 = vld [vmem:[#allocation15_spill] sm:$0xff] }
 0x320   : > { %v5944_v32 = vpop.permute.xlu1 %5943  ;;  %v2772_v58 = vsel %vm2635_vm4, %v2755_v12, %v5925_v45  ;;  %v5525_v22 = vunpack.i.l.bf16 %v9722_v38  ;;  %v3192_v45 = vsel %vm1496_vm1, %v6169_v62, %v5520_v57  ;;  %v5510_v54 = vunpack.i.l.bf16 %v9723_v49  ;;  %v6170_v12 = vld [vmem:[#allocation2 + $0x43] sm:$0xff] }
 0x321   : > { %v5946_v20 = vunpack.i.h.bf16 %v5944_v32  ;;  %v5945_v13 = vunpack.i.l.bf16 %v5944_v32  ;;  %v3483_v21 = vpop.f32.mrf.mxu1  ;;  %v2789_v24 = vsel %vm2653_vm5, %v2772_v58, %v5935_v40  ;;  %v2669_v55 = vsel %vm2653_vm5, %v2651_v3, %v5936_v39  ;;  %v9724_v40 = vld [vmem:[#allocation22_spill] sm:$0xff]  ;;  %v9727_v57 = vld [vmem:[#allocation23_spill] sm:$0xff] }
 0x322   : > { %v5949_v9 = vpop.permute.xlu0 %5948  ;;  %v5506_v39 = vunpack.i.h.bf16 %v9720_v50  ;;  %v5511_v30 = vunpack.i.h.bf16 %v9723_v49  ;;  %v6171_v3 = vld [vmem:[#allocation2 + $0x3c] sm:$0xff] }
 0x323   : > { %v2756_v33 = vsel %vm2617_vm3, %v2739_v10, %v5945_v13  ;;  %v5950_v41 = vunpack.i.l.bf16 %v5949_v9  ;;  %v5951_v0 = vunpack.i.h.bf16 %v5949_v9  ;;  %v2634_v7 = vsel %vm2617_vm3, %v2616_v1, %v5946_v20 }
 0x324   : > { %v5964_v60 = vpop.permute.xlu1 %5963  ;;  %v5891_v20 = vunpack.i.h.bf16 %v8481_v47  ;;  %v3241_v47 = vsel %vm2617_vm3, %v8523_v14, %v5430_v29  ;;  %v3225_v1 = vsel %vm2599_vm2, %v8518_v48, %v5426_v53  ;;  %v5530_v14 = vunpack.i.l.bf16 %v9724_v40  ;;  %v9726_v53 = vld [vmem:[#allocation40_spill] sm:$0xff] }
 0x325   : > { %v2773_v35 = vsel %vm2635_vm4, %v2756_v33, %v5950_v41  ;;  %v5965_v37 = vunpack.i.l.bf16 %v5964_v60  ;;  %v2652_v32 = vsel %vm2635_vm4, %v2634_v7, %v5951_v0  ;;  %v5966_v10 = vunpack.i.h.bf16 %v5964_v60 }
 0x326   : > { %v5954_v44 = vpop.permute.xlu0 %5953  ;;  %v2790_v23 = vsel %vm2653_vm5, %v2773_v35, %v5890_v15  ;;  %v2670_v41 = vsel %vm2653_vm5, %v2652_v32, %v5891_v20  ;;  %v3258_v25 = vsel %vm2635_vm4, %v3241_v47, %v5505_v18  ;;  %v5526_v0 = vunpack.i.h.bf16 %v9722_v38  ;;  %v6172_v20 = vld [vmem:[#allocation2 + $0x4b] sm:$0xff] }
 0x327   : > { %v5956_v46 = vunpack.i.h.bf16 %v5954_v44  ;;  %v5955_v28 = vunpack.i.l.bf16 %v5954_v44  ;;  %v2807_v33 = vsel %vm2671_vm6, %v2790_v23, %v5965_v37  ;;  %v3209_v60 = vsel %vm498_vm0, %v3192_v45, %v5525_v22  ;;  %v9728_v37 = vld [vmem:[#allocation33_spill] sm:$0xff]  ;;  %v9730_v45 = vld [vmem:[#allocation35_spill] sm:$0xff] }
 0x328   : > { %v8557_v26 = vpop.permute.xlu1 %5968  ;;  %v3193_v48 = vsel %vm1496_vm1, %v6170_v12, %v5521_v4  ;;  %v5625_v7 = vunpack.i.l.bf16 %v9726_v53  ;;  %v2688_v50 = vsel %vm2671_vm6, %v2670_v41, %v5966_v10  ;;  %v3242_v18 = vsel %vm2617_vm3, %v3225_v1, %v5431_v43  ;;  %v9729_v23 = vld [vmem:[#allocation41_spill] sm:$0xff] }
 0x329   : > { %v2806_v13 = vsel %vm2671_vm6, %v2789_v24, %v5955_v28  ;;  %v2687_v21 = vsel %vm2671_vm6, %v2669_v55, %v5956_v46  ;;  %v5535_v15 = vunpack.i.l.bf16 %v9727_v57  ;;  %v3275_v16 = vsel %vm2653_vm5, %v3258_v25, %v5510_v54 }
 0x32a   : > { %v8570_v9 = vpop.permute.xlu0 %5958  ;;  %3534 = vmatprep.mubr.f32.mxu1 %v2806_v13  ;;  %v5531_v44 = vunpack.i.h.bf16 %v9724_v40  ;;  %v3226_v58 = vsel %vm2599_vm2, %v3209_v60, %v5530_v14  ;;  %v5610_v46 = vunpack.i.l.bf16 %v9728_v37  ;;  %v3259_v24 = vsel %vm2635_vm4, %v3242_v18, %v5506_v39  ;;  %v6173_v39 = vld [vmem:[#allocation2 + $0x44] sm:$0xff] }
 0x32b   : > { %3535 = vmatmul.mubr.f32.gmra.mxu1 %v2687_v21  ;;  %v3210_v55 = vsel %vm498_vm0, %v3193_v48, %v5526_v0  ;;  %v5630_v32 = vunpack.i.l.bf16 %v9729_v23  ;;  %v5516_v38 = vunpack.i.h.bf16 %v9725_v59  ;;  %v5626_v22 = vunpack.i.h.bf16 %v9726_v53  ;;  %v9732_v0 = vld [vmem:[#allocation37_spill] sm:$0xff] }
 0x32c   : > { %v8588_v29 = vpop.permute.xlu1 %5978  ;;  %3539 = vmatprep.mubr.f32.mxu1 %v2807_v33  ;;  %v3194_v13 = vsel %vm1496_vm1, %v6172_v20, %v5625_v7  ;;  %v3292_v43 = vsel %vm2671_vm6, %v3275_v16, %v5515_v61  ;;  %v5536_v4 = vunpack.i.h.bf16 %v9727_v57  ;;  %v3243_v62 = vsel %vm2617_vm3, %v3226_v58, %v5535_v15  ;;  %v9731_v33 = vld [vmem:[#allocation10_spill] sm:$0xff]  ;;  %v6175_v58 = vld [vmem:[#allocation2 + $0x4c] sm:$0xff] }
 0x32d   : > { %v5615_v10 = vunpack.i.l.bf16 %v9730_v45  ;;  %v3276_v47 = vsel %vm2653_vm5, %v3259_v24, %v5511_v30  ;;  %v3227_v49 = vsel %vm2599_vm2, %v3210_v55, %v5531_v44  ;;  %v5611_v54 = vunpack.i.h.bf16 %v9728_v37  ;;  %v6174_v59 = vld [vmem:[#allocation2 + $0x53] sm:$0xff] }
 0x32e   : > { %v8595_v35 = vpop.permute.xlu0 %5973  ;;  %v5635_v41 = vunpack.i.l.bf16 %v9731_v33  ;;  %v3260_v25 = vsel %vm2635_vm4, %v3243_v62, %v5610_v46  ;;  %v5631_v40 = vunpack.i.h.bf16 %v9729_v23  ;;  %v3211_v14 = vsel %vm498_vm0, %v3194_v13, %v5630_v32 }
 0x32f   : > { %3540 = vmatmul.mubr.f32.gmra.mxu1 %v2688_v50  ;;  %v5620_v60 = vunpack.i.l.bf16 %v9732_v0  ;;  %v3195_v61 = vsel %vm1496_vm1, %v6174_v59, %v5626_v22  ;;  %v3293_v48 = vsel %vm2671_vm6, %v3276_v47, %v5516_v38  ;;  %v3244_v53 = vsel %vm2617_vm3, %v3227_v49, %v5536_v4  ;;  %v9733_v50 = vld [vmem:[#allocation42_spill] sm:$0xff] }
 0x330   : > { %v8605_v28 = vpop.permute.xlu1 %5988  ;;  %4737 = vmatprep.mubr.msk.f32.mxu1 %vm1496_vm1, %v6171_v3  ;;  %v5616_v7 = vunpack.i.h.bf16 %v9730_v45  ;;  %v5640_v18 = vunpack.i.l.bf16 %v9733_v50  ;;  %v3277_v30 = vsel %vm2653_vm5, %v3260_v25, %v5615_v10  ;;  %v5636_v57 = vunpack.i.h.bf16 %v9731_v33  ;;  %v6176_v4 = vld [vmem:[#allocation2 + $0x54] sm:$0xff] }
 0x331   : > { %v3228_v15 = vsel %vm2599_vm2, %v3211_v14, %v5635_v41  ;;  %v5715_v16 = vunpack.i.l.bf16 %v8232_v2  ;;  %v3261_v37 = vsel %vm2635_vm4, %v3244_v53, %v5611_v54  ;;  %v3212_v46 = vsel %vm498_vm0, %v3195_v61, %v5631_v40  ;;  %v6177_v41 = vld [vmem:[#allocation2 + $0x5c] sm:$0xff] }
 0x332   : > { %v8614_v21 = vpop.permute.xlu0 %5983  ;;  %v5621_v3 = vunpack.i.h.bf16 %v9732_v0  ;;  %v3294_v55 = vsel %vm2671_vm6, %v3277_v30, %v5620_v60  ;;  %v5641_v23 = vunpack.i.h.bf16 %v9733_v50  ;;  %v3245_v32 = vsel %vm2617_vm3, %v3228_v15, %v5640_v18  ;;  %v6179_v30 = vld [vmem:[#allocation2 + $0x6b] sm:$0xff] }
 0x333   : > { %3610 = vmatmul.mubr.f32.vlgmr.msra.gmra.mxu1 %v3292_v43  ;;  %v5720_v38 = vunpack.i.l.bf16 %v8243_v8  ;;  %v3278_v22 = vsel %vm2653_vm5, %v3261_v37, %v5616_v7  ;;  %v3229_v20 = vsel %vm2599_vm2, %v3212_v46, %v5636_v57  ;;  %v5716_v13 = vunpack.i.h.bf16 %v8232_v2  ;;  %v6178_v7 = vld [vmem:[#allocation2 + $0x64] sm:$0xff] }
 0x334   : > { %v8624_v1 = vpop.permute.xlu1 %5998  ;;  %4738 = vmatprep.mubr.msk.f32.mxu1 %vm1496_vm1, %v6173_v39  ;;  %v3262_v62 = vsel %vm2635_vm4, %v3245_v32, %v5715_v16  ;;  %v5725_v45 = vunpack.i.l.bf16 %v8254_v17  ;;  %v3295_v47 = vsel %vm2671_vm6, %v3278_v22, %v5621_v3  ;;  %v3246_v49 = vsel %vm2617_vm3, %v3229_v20, %v5641_v23  ;;  %v6180_v3 = vld [vmem:[#allocation2 + $0x73] sm:$0xff] }
 0x335   : > { %v5721_v54 = vunpack.i.h.bf16 %v8243_v8  ;;  %v3279_v2 = vsel %vm2653_vm5, %v3262_v62, %v5720_v38  ;;  %v3263_v39 = vsel %vm2635_vm4, %v3246_v49, %v5716_v13  ;;  %v5726_v25 = vunpack.i.h.bf16 %v8254_v17  ;;  %v6181_v38 = vld [vmem:[#allocation2 + $0x6c] sm:$0xff] }
 0x336   : > { %v8632_v12 = vpop.permute.xlu0 %5993  ;;  %v5960_v40 = vunpack.i.l.bf16 %v8570_v9  ;;  %v5980_v14 = vunpack.i.l.bf16 %v8588_v29  ;;  %v3296_v8 = vsel %vm2671_vm6, %v3279_v2, %v5725_v45  ;;  %v5985_v60 = vunpack.i.l.bf16 %v8614_v21 }
 0x337   : > { %3615 = vmatmul.mubr.f32.gmra.mxu1 %v3293_v48  ;;  %v3280_v61 = vsel %vm2653_vm5, %v3263_v39, %v5721_v54  ;;  %v5961_v48 = vunpack.i.h.bf16 %v8570_v9  ;;  %v5981_v53 = vunpack.i.h.bf16 %v8588_v29  ;;  %v5986_v50 = vunpack.i.h.bf16 %v8614_v21 }
 0x338   : > { %v8642_v44 = vpop.permute.xlu1 %6008  ;;  %4739 = vmatprep.mubr.msk.f32.mxu1 %vm1496_vm1, %v6175_v58  ;;  %v3198_v57 = vsel %vm1496_vm1, %v6179_v30, %v5980_v14  ;;  %v5975_v15 = vunpack.i.l.bf16 %v8595_v35  ;;  %v3297_v58 = vsel %vm2671_vm6, %v3280_v61, %v5726_v25  ;;  %v3264_v9 = vsel %vm2635_vm4, %v8316_v6, %v5960_v40 }
 0x339   : > { %v5970_v29 = vunpack.i.l.bf16 %v8557_v26  ;;  %v3215_v37 = vsel %vm498_vm0, %v3198_v57, %v5985_v60  ;;  %v5995_v46 = vunpack.i.l.bf16 %v8632_v12  ;;  %v5971_v21 = vunpack.i.h.bf16 %v8557_v26 }
 0x33a   : > { %v8648_v24 = vpop.permute.xlu0 %6003  ;;  %v5990_v23 = vunpack.i.l.bf16 %v8605_v28  ;;  %v3265_v6 = vsel %vm2635_vm4, %v8319_v56, %v5961_v48  ;;  %v5976_v22 = vunpack.i.h.bf16 %v8595_v35  ;;  %v5996_v13 = vunpack.i.h.bf16 %v8632_v12  ;;  %v6183_v48 = vld [vmem:[#allocation2 + $0x7b] sm:$0xff] }
 0x33b   : > { %3620 = vmatmul.mubr.f32.gmra.mxu1 %v3294_v55  ;;  %v3199_v55 = vsel %vm1496_vm1, %v6180_v3, %v5981_v53  ;;  %v5991_v62 = vunpack.i.h.bf16 %v8605_v28  ;;  %v6005_v54 = vunpack.i.l.bf16 %v8648_v24  ;;  %v6000_v12 = vunpack.i.l.bf16 %v8624_v1  ;;  %v6182_v28 = vld [vmem:[#allocation2 + $0x74] sm:$0xff] }
 0x33c   : > { %v8657_v43 = vpop.permute.xlu1 %6018  ;;  %4740 = vmatprep.mubr.msk.f32.mxu1 %vm1496_vm1, %v6176_v4  ;;  %v3216_v20 = vsel %vm498_vm0, %v3199_v55, %v5986_v50  ;;  %v3281_v4 = vsel %vm2653_vm5, %v3264_v9, %v5970_v29  ;;  %v3232_v45 = vsel %vm2599_vm2, %v3215_v37, %v5990_v23  ;;  %v3282_v25 = vsel %vm2653_vm5, %v3265_v6, %v5971_v21  ;;  %v6185_v29 = vld [vmem:[#allocation2 + $0x83] sm:$0xff] }
 0x33d   : > { %v3298_v56 = vsel %vm2671_vm6, %v3281_v4, %v5975_v15  ;;  %v3249_v35 = vsel %vm2617_vm3, %v3232_v45, %v5995_v46  ;;  %v6006_v14 = vunpack.i.h.bf16 %v8648_v24  ;;  %v3299_v60 = vsel %vm2671_vm6, %v3282_v25, %v5976_v22  ;;  %v6186_v4 = vld [vmem:[#allocation2 + $0x84] sm:$0xff] }
 0x33e   : > { %v8662_v10 = vpop.permute.xlu0 %6013  ;;  %v6001_v61 = vunpack.i.h.bf16 %v8624_v1  ;;  %v6020_v30 = vunpack.i.l.bf16 %v8657_v43  ;;  %v6011_v24 = vunpack.i.h.bf16 %v8642_v44  ;;  %v6021_v15 = vunpack.i.h.bf16 %v8657_v43 }
 0x33f   : > { %3625 = vmatmul.mubr.f32.gmra.mxu1 %v3295_v47  ;;  %v6015_v47 = vunpack.i.l.bf16 %v8662_v10 }
 0x340   : > { %v8668_v33 = vpop.permute.xlu1 %6028  ;;  %4741 = vmatprep.mubr.msk.f32.mxu1 %vm1496_vm1, %v6177_v41  ;;  %v3233_v41 = vsel %vm2599_vm2, %v3216_v20, %v5991_v62 }
 0x341   : > { %v3250_v40 = vsel %vm2617_vm3, %v3233_v41, %v5996_v13  ;;  %v3200_v53 = vsel %vm1496_vm1, %v6183_v48, %v6015_v47  ;;  %v6030_v6 = vunpack.i.l.bf16 %v8668_v33  ;;  %v6031_v20 = vunpack.i.h.bf16 %v8668_v33 }
 0x342   : > { %v8675_v0 = vpop.permute.xlu0 %6023  ;;  %v3267_v9 = vsel %vm2635_vm4, %v3250_v40, %v6001_v61  ;;  %v3217_v21 = vsel %vm498_vm0, %v3200_v53, %v6020_v30 }
 0x343   : > { %v8679_v59 = vpop.f32.mrf.mxu1  ;;  %3630 = vmatmul.mubr.f32.gmra.mxu1 %v3296_v8  ;;  %v6016_v8 = vunpack.i.h.bf16 %v8662_v10  ;;  %v6010_v10 = vunpack.i.l.bf16 %v8642_v44  ;;  %v6026_v46 = vunpack.i.h.bf16 %v8675_v0  ;;  %v3284_v3 = vsel %vm2653_vm5, %v3267_v9, %v6006_v14  ;;  %v6187_v14 = vld [vmem:[#allocation2 + $0x8c] sm:$0xff] }
 0x344   : > { %v8684_v17 = vpop.permute.xlu1 %6038  ;;  %4742 = vmatprep.mubr.msk.f32.mxu1 %vm1496_vm1, %v6178_v7  ;;  %v6025_v7 = vunpack.i.l.bf16 %v8675_v0  ;;  %v3301_v62 = vsel %vm2671_vm6, %v3284_v3, %v6011_v24 }
 0x345   : > { %v3488_v18 = vpop.f32.mrf.mxu1  ;;  %v3201_v37 = vsel %vm1496_vm1, %v6185_v29, %v6016_v8  ;;  %v6188_v8 = vld [vmem:[#allocation2 + $0x93] sm:$0xff] }
 0x346   : > { %v8690_v16 = vpop.permute.xlu0 %6033  ;;  %v3266_v18 = vsel %vm2635_vm4, %v3249_v35, %v6000_v12  ;;  %v3234_v44 = vsel %vm2599_vm2, %v3217_v21, %v6025_v7  ;;  %v3218_v0 = vsel %vm498_vm0, %v3201_v37, %v6021_v15  ;;  %v6041_v7 = vunpack.i.h.bf16 %v8684_v17 }
 0x347   : > { %3635 = vmatmul.mubr.f32.gmra.mxu1 %v3297_v58  ;;  %v3283_v57 = vsel %vm2653_vm5, %v3266_v18, %v6005_v54  ;;  %v6184_v58 = vld [vmem:[#allocation2 + $0x7c] sm:$0xff]  ;;  %v6035_v43 = vunpack.i.l.bf16 %v8690_v16  ;;  %v3235_v45 = vsel %vm2599_vm2, %v3218_v0, %v6026_v46  ;;  %v6036_v47 = vunpack.i.h.bf16 %v8690_v16 }
 0x348   : > { %v8701_v32 = vpop.permute.xlu1 %6048  ;;  %4743 = vmatprep.mubr.msk.f32.mxu1 %vm1496_vm1, %v6181_v38  ;;  %v3300_v38 = vsel %vm2671_vm6, %v3283_v57, %v6010_v10  ;;  %v3251_v35 = vsel %vm2617_vm3, %v3234_v44, %v6030_v6 }
 0x349   : > { %v8709_v26 = vpop.f32.mrf.mxu1  ;;  %v6050_v55 = vunpack.i.l.bf16 %v8701_v32  ;;  %v3268_v41 = vsel %vm2635_vm4, %v3251_v35, %v6035_v43 }
 0x34a   : > { %v8715_v49 = vpop.permute.xlu0 %6043 }
 0x34b   : > { %v3493_v2 = vpop.f32.mrf.mxu1  ;;  %3640 = vmatmul.mubr.f32.gmra.mxu1 %v3298_v56  ;;  %v6051_v56 = vunpack.i.h.bf16 %v8701_v32  ;;  %v3202_v33 = vsel %vm1496_vm1, %v8332_v34, %v6050_v55  ;;  %v6045_v54 = vunpack.i.l.bf16 %v8715_v49  ;;  %v3252_v34 = vsel %vm2617_vm3, %v3235_v45, %v6031_v20 }
 0x34c   : > { %v8722_v39 = vpop.permute.xlu1 %6058  ;;  %4744 = vmatprep.mubr.msk.f32.mxu1 %vm1496_vm1, %v6182_v28  ;;  %v6040_v28 = vunpack.i.l.bf16 %v8684_v17  ;;  %v6046_v61 = vunpack.i.h.bf16 %v8715_v49  ;;  %v3269_v53 = vsel %vm2635_vm4, %v3252_v34, %v6036_v47  ;;  %v6189_v17 = vld [vmem:[#allocation2 + $0x94] sm:$0xff] }
 0x34d   : > { %v6060_v16 = vunpack.i.l.bf16 %v8722_v39  ;;  %v6061_v49 = vunpack.i.h.bf16 %v8722_v39  ;;  %v3286_v37 = vsel %vm2653_vm5, %v3269_v53, %v6041_v7 }
 0x34e   : > { %v6054_v50 = vpop.permute.xlu0 %6053  ;;  %v3285_v48 = vsel %vm2653_vm5, %v3268_v41, %v6040_v28  ;;  %v3303_v21 = vsel %vm2671_vm6, %v3286_v37, %v6046_v61 }
 0x34f   : > { %3645 = vmatmul.mubr.f32.gmra.mxu1 %v3299_v60  ;;  %v6055_v22 = vunpack.i.l.bf16 %v6054_v50  ;;  %v6056_v2 = vunpack.i.h.bf16 %v6054_v50  ;;  %v3203_v60 = vsel %vm1496_vm1, %v6188_v8, %v6051_v56  ;;  %v3302_v57 = vsel %vm2671_vm6, %v3285_v48, %v6045_v54  ;;  %v6191_v56 = vld [vmem:[#allocation2 + $0xa3] sm:$0xff] }
 0x350   : > { %v8739_v1 = vpop.permute.xlu1 %6068  ;;  %4745 = vmatprep.mubr.msk.f32.mxu1 %vm1496_vm1, %v6184_v58 }
 0x351   : > { %v3219_v25 = vsel %vm498_vm0, %v3202_v33, %v6055_v22  ;;  %v3220_v50 = vsel %vm498_vm0, %v3203_v60, %v6056_v2  ;;  %v6070_v9 = vunpack.i.l.bf16 %v8739_v1  ;;  %v6071_v20 = vunpack.i.h.bf16 %v8739_v1 }
 0x352   : > { %v6064_v23 = vpop.permute.xlu0 %6063  ;;  %v3236_v18 = vsel %vm2599_vm2, %v3219_v25, %v6060_v16  ;;  %v3237_v3 = vsel %vm2599_vm2, %v3220_v50, %v6061_v49 }
 0x353   : > { %3650 = vmatmul.mubr.f32.gmra.mxu1 %v3300_v38  ;;  %v6065_v40 = vunpack.i.l.bf16 %v6064_v23  ;;  %v6066_v24 = vunpack.i.h.bf16 %v6064_v23 }
 0x354   : > { %v8754_v13 = vpop.permute.xlu1 %6078  ;;  %4746 = vmatprep.mubr.msk.f32.mxu1 %vm1496_vm1, %v6186_v4  ;;  %v6190_v4 = vld [vmem:[#allocation2 + $0x9c] sm:$0xff] }
 0x355   : > { %v3253_v10 = vsel %vm2617_vm3, %v3236_v18, %v6065_v40  ;;  %v3254_v23 = vsel %vm2617_vm3, %v3237_v3, %v6066_v24  ;;  %v6081_v25 = vunpack.i.h.bf16 %v8754_v13  ;;  %v1699_v18 = vld [vmem:[#allocation2 + $0xb4] sm:$0xff] }
 0x356   : > { %v8765_v12 = vpop.permute.xlu0 %6073  ;;  %v3270_v39 = vsel %vm2635_vm4, %v3253_v10, %v6070_v9  ;;  %v3271_v1 = vsel %vm2635_vm4, %v3254_v23, %v6071_v20 }
 0x357   : > { %3655 = vmatmul.mubr.f32.gmra.mxu1 %v3301_v62  ;;  %v6075_v15 = vunpack.i.l.bf16 %v8765_v12  ;;  %v6076_v38 = vunpack.i.h.bf16 %v8765_v12 }
 0x358   : > { %v6089_v32 = vpop.permute.xlu1 %6088  ;;  %4747 = vmatprep.mubr.msk.f32.mxu1 %vm1496_vm1, %v6187_v14 }
 0x359   : > { %v6090_v44 = vunpack.i.l.bf16 %v6089_v32  ;;  %v3287_v22 = vsel %vm2653_vm5, %v3270_v39, %v6075_v15  ;;  %v6091_v12 = vunpack.i.h.bf16 %v6089_v32  ;;  %v3288_v28 = vsel %vm2653_vm5, %v3271_v1, %v6076_v38  ;;  %v1700_v15 = vld [vmem:[#allocation2 + $0xbc] sm:$0xff] }
 0x35a   : > { %v6084_v30 = vpop.permute.xlu0 %6083  ;;  %v3305_v32 = vsel %vm2671_vm6, %v3288_v28, %v6081_v25 }
 0x35b   : > { %v6085_v58 = vunpack.i.l.bf16 %v6084_v30  ;;  %3660 = vmatmul.mubr.f32.gmra.mxu1 %v3302_v57  ;;  %v6086_v43 = vunpack.i.h.bf16 %v6084_v30 }
 0x35c   : > { %v6099_v29 = vpop.permute.xlu1 %6098  ;;  %4748 = vmatprep.mubr.msk.f32.mxu1 %vm1496_vm1, %v6189_v17 }
 0x35d   : > { %v3204_v46 = vsel %vm1496_vm1, %v8363_v52, %v6085_v58  ;;  %v6080_v52 = vunpack.i.l.bf16 %v8754_v13  ;;  %v6100_v45 = vunpack.i.l.bf16 %v6099_v29  ;;  %v3205_v35 = vsel %vm1496_vm1, %v6191_v56, %v6086_v43 }
 0x35e   : > { %v6094_v55 = vpop.permute.xlu0 %6093  ;;  %v3221_v62 = vsel %vm498_vm0, %v3204_v46, %v6090_v44  ;;  %v3222_v16 = vsel %vm498_vm0, %v3205_v35, %v6091_v12  ;;  %v6101_v60 = vunpack.i.h.bf16 %v6099_v29 }
 0x35f   : > { %v6095_v6 = vunpack.i.l.bf16 %v6094_v55  ;;  %3665 = vmatmul.mubr.f32.gmra.mxu1 %v3303_v21  ;;  %v6096_v33 = vunpack.i.h.bf16 %v6094_v55  ;;  %v3304_v2 = vsel %vm2671_vm6, %v3287_v22, %v6080_v52 }
 0x360   : > { %v3110_v0 = vpop.permute.xlu1 %3109  ;;  %4749 = vmatprep.mubr.msk.f32.mxu1 %vm1496_vm1, %v6190_v4 }
 0x361   : > { %v3238_v47 = vsel %vm2599_vm2, %v3221_v62, %v6095_v6  ;;  %v3239_v34 = vsel %vm2599_vm2, %v3222_v16, %v6096_v33 }
 0x362   : > { %v3057_v54 = vpop.permute.xlu0 %3056  ;;  %v3255_v41 = vsel %vm2617_vm3, %v3238_v47, %v6100_v45  ;;  %v3256_v13 = vsel %vm2617_vm3, %v3239_v34, %v6101_v60  ;;  %v3696_v47 = vld [vmem:[%s9486_s5 + $0x8] sm:$0xff] }
 0x363   : > { %3670 = vmatmul.mubr.f32.gmra.mxu1 %v3304_v2  ;;  %v3272_v14 = vsel %vm2635_vm4, %v3255_v41, %v3057_v54 }
 0x364   : > { %4750 = vmatprep.mubr.msk.f32.mxu1 %vm1496_vm1, %v8374_v63  ;;  %v3059_v40 = vpop.permute.xlu1 %3058  ;;  %v3289_v63 = vsel %vm2653_vm5, %v3272_v14, %v3110_v0 }
 0x365   : > { %v3273_v48 = vsel %vm2635_vm4, %v3256_v13, %v3059_v40 }
 0x366   : > { %v3168_v8 = vpop.permute.xlu0 %3167 }
 0x367   : > { %3675 = vmatmul.mubr.f32.gmra.mxu1 %v3305_v32  ;;  %v3306_v7 = vsel %vm2671_vm6, %v3289_v63, %v3168_v8 }
 0x368   : > { %4751 = vmatprep.mubr.msk.f32.mxu1 %vm1496_vm1, %v8448_v27  ;;  %v3170_v61 = vpop.permute.xlu1 %3169 }
 0x36a   : > { %v3112_v53 = vpop.permute.xlu0 %3111 }
 0x36b   : > { %v3290_v50 = vsel %vm2653_vm5, %v3273_v48, %v3112_v53  ;;  %3680 = vmatmul.mubr.f32.gmra.mxu1 %v3306_v7 }
 0x36c   : > { %4752 = vmatprep.mubr.msk.f32.mxu1 %vm1496_vm1, %v1699_v18  ;;  %v2896_v30 = vpop.permute.xlu1 %2895  ;;  %v3307_v27 = vsel %vm2671_vm6, %v3290_v50, %v3170_v61 }
 0x36e   : > { %v2843_v57 = vpop.permute.xlu0 %2842 }
 0x36f   : > { %v3206_v24 = vsel %vm1496_vm1, %v8433_v51, %v2843_v57  ;;  %v8823_v10 = vpop.f32.mrf.mxu1  ;;  %3685 = vmatmul.mubr.f32.gmra.mxu1 %v3307_v27 }
 0x370   : > { %4753 = vmatprep.mubr.msk.f32.mxu1 %vm1496_vm1, %v1700_v15  ;;  %v3223_v9 = vsel %vm498_vm0, %v3206_v24, %v2896_v30  ;;  %v3003_v29 = vpop.permute.xlu1 %3002 }
 0x371   : > { %v3498_v58 = vpop.f32.mrf.mxu1 }
 0x372   : > { %v2949_v49 = vpop.permute.xlu0 %2948 }
 0x373   : > { %v3240_v17 = vsel %vm2599_vm2, %v3223_v9, %v2949_v49  ;;  %v8828_v37 = vpop.f32.mrf.mxu1 }
 0x374   : > { %v3257_v3 = vsel %vm2617_vm3, %v3240_v17, %v3003_v29  ;;  %v3114_v44 = vpop.permute.xlu1 %3113 }
 0x375   : > { %v3503_v46 = vpop.f32.mrf.mxu1 }
 0x376   : > { %v3061_v21 = vpop.permute.xlu0 %3060 }
 0x377   : > { %v3274_v51 = vsel %vm2635_vm4, %v3257_v3, %v3061_v21 }
 0x378   : > { %v3291_v55 = vsel %vm2653_vm5, %v3274_v51, %v3114_v44 }
 0x37a   : > { %v3172_v43 = vpop.permute.xlu0 %3171 }
 0x37b   : > { %v3308_v39 = vsel %vm2671_vm6, %v3291_v55, %v3172_v43 }
 0x37c   : > { %3690 = vmatmul.mubr.f32.gmra.mxu1 %v3308_v39 }
 0x37d   : > { %4754 = vmatprep.mubr.msk.f32.mxu1 %vm3727_vm7, %v3696_v47  ;;  %v3702_v47 = vld [vmem:[%s9486_s5 + $0x38] sm:$0xff] }
 0x397   : > { %v8834_v23 = vpop.f32.mrf.mxu1 }
 0x399   : > { %v3508_v38 = vpop.f32.mrf.mxu1 }
 0x39d   : > { %v3511_v6 = vpop.f32.mrf.mxu1 }
 0x39f   : > { %v3513_v22 = vpop.f32.mrf.mxu1 }
 0x3b3   : > { %v3516_v20 = vpop.f32.mrf.mxu1 }
 0x3b5   : > { %v3518_v52 = vpop.f32.mrf.mxu1 }
 0x3b9   : > { %v3521_v0 = vpop.f32.mrf.mxu1 }
 0x3bb   : > { %v3523_v4 = vpop.f32.mrf.mxu1 }
 0x3cf   : > { %v3526_v62 = vpop.f32.mrf.mxu1 }
 0x3d1   : > { %v3528_v45 = vpop.f32.mrf.mxu1 }
 0x3d2   : > { %v3699_v45 = vld [vmem:[%s9486_s5 + $0x20] sm:$0xff] }
 0x3d5   : > { %v3531_v56 = vpop.f32.mrf.mxu1 }
 0x3d7   : > { %v3533_v35 = vpop.f32.mrf.mxu1 }
 0x3d8   : > { %v3704_v35 = vld [vmem:[%s9486_s5 + $0x48] sm:$0xff] }
 0x3eb   : > { %v3536_v33 = vpop.f32.mrf.mxu1 }
 0x3ed   : > { %v3538_v54 = vpop.f32.mrf.mxu1 }
 0x3ee   : > { %v3706_v54 = vld [vmem:[%s9486_s5 + $0x58] sm:$0xff] }
 0x3ef   : > { %v8840_v2 = vpop.f32.mrf.mxu1 }
 0x3f1   : > { %v3543_v1 = vpop.f32.mrf.mxu1 }
 0x3f2   : > { %v3708_v1 = vld [vmem:[%s9486_s5 + $0x68] sm:$0xff] }
 0x3f3   : > { %v8842_v12 = vpop.f32.mrf.mxu1 }
 0x3f5   : > { %v3613_v41 = vpop.f32.mrf.mxu1 }
 0x3f6   : > { %v3710_v41 = vld [vmem:[%s9486_s5 + $0x78] sm:$0xff] }
 0x3f7   : > { %v8844_v28 = vpop.f32.mrf.mxu1 }
 0x3f9   : > { %v3618_v25 = vpop.f32.mrf.mxu1 }
 0x3fa   : > { %v3712_v25 = vld [vmem:[%s9486_s5 + $0x88] sm:$0xff] }
 0x3fb   : > { %v8846_v40 = vpop.f32.mrf.mxu1 }
 0x3fd   : > { %v3623_v16 = vpop.f32.mrf.mxu1 }
 0x3fe   : > { %v3714_v16 = vld [vmem:[%s9486_s5 + $0x98] sm:$0xff] }
 0x3ff   : > { %v3626_v14 = vpop.f32.mrf.mxu1 }
 0x401   : > { %v3628_v34 = vpop.f32.mrf.mxu1 }
 0x402   : > { %v3716_v34 = vld [vmem:[%s9486_s5 + $0xa8] sm:$0xff] }
 0x403   : > { %v3631_v8 = vpop.f32.mrf.mxu1 }
 0x405   : > { %v3633_v32 = vpop.f32.mrf.mxu1 }
 0x406   : > { %v3718_v32 = vld [vmem:[%s9486_s5 + $0xb8] sm:$0xff] }
 0x407   : > { %v3636_v60 = vpop.f32.mrf.mxu1 }
 0x409   : > { %v3638_v61 = vpop.f32.mrf.mxu1 }
 0x40a   : > { %v3720_v61 = vld [vmem:[%s9486_s5 + $0xc8] sm:$0xff] }
 0x40b   : > { %v3641_v13 = vpop.f32.mrf.mxu1 }
 0x40d   : > { %v3643_v63 = vpop.f32.mrf.mxu1 }
 0x40e   : > { %v3722_v63 = vld [vmem:[%s9486_s5 + $0xd8] sm:$0xff] }
 0x40f   : > { %v3646_v48 = vpop.f32.mrf.mxu1 }
 0x411   : > { %v3648_v53 = vpop.f32.mrf.mxu1 }
 0x412   : > { %v3724_v53 = vld [vmem:[%s9486_s5 + $0xe8] sm:$0xff] }
 0x413   : > { %v3651_v7 = vpop.f32.mrf.mxu1 }
 0x414   : > { %v3652_v4 = vadd.f32 %v3651_v7, %v8828_v37  ;;  %v3632_v37 = vadd.f32 %v3631_v8, %v8532_v42  ;;  %v3612_v42 = vadd.f32 %v8842_v12, %v8369_v31  ;;  %v3697_v31 = vld [vmem:[%s9486_s5 + $0x10] sm:$0xff]  ;;  %v3707_v12 = vld [vmem:[%s9486_s5 + $0x60] sm:$0xff] }
 0x415   : > { %v3653_v50 = vpop.f32.mrf.mxu1  ;;  %v3715_v8 = vld [vmem:[%s9486_s5 + $0xa0] sm:$0xff] }
 0x416   : > { %v3723_v7 = vld [vmem:[%s9486_s5 + $0xe0] sm:$0xff]  ;;  %v3726_v50 = vld [vmem:[%s9486_s5 + $0xf8] sm:$0xff] }
 0x417   : > { %v3656_v18 = vpop.f32.mrf.mxu1 }
 0x418   : > { %v3657_v22 = vadd.f32 %v3656_v18, %v8834_v23  ;;  %v3637_v23 = vadd.f32 %v3636_v60, %v8679_v59  ;;  %v3617_v59 = vadd.f32 %v8844_v28, %v8431_v36  ;;  %v3698_v36 = vld [vmem:[%s9486_s5 + $0x18] sm:$0xff]  ;;  %v3709_v28 = vld [vmem:[%s9486_s5 + $0x70] sm:$0xff] }
 0x419   : > { %v3658_v30 = vpop.f32.mrf.mxu1  ;;  %v3717_v60 = vld [vmem:[%s9486_s5 + $0xb0] sm:$0xff] }
 0x41a   : > { %v3725_v18 = vld [vmem:[%s9486_s5 + $0xf0] sm:$0xff]  ;;  %v4078_v30 = vld [vmem:[%s9487_s6 + $0xf8] sm:$0xff] }
 0x41b   : > { %v3661_v57 = vpop.f32.mrf.mxu1  ;;  %4881 = vmatprep.subr.mxu0 %v4078_v30 }
 0x41c   : > { %v3662_v38 = vadd.f32 %v3661_v57, %v3511_v6  ;;  %v3642_v6 = vadd.f32 %v3641_v13, %v8709_v26  ;;  %v3622_v26 = vadd.f32 %v8846_v40, %v8452_v11  ;;  %v3695_v11 = vld [vmem:[%s9486_s5] sm:$0xff]  ;;  %v4062_v57 = vld [vmem:[%s9487_s6 + $0x78] sm:$0xff] }
 0x41d   : > { %v3663_v27 = vpop.f32.mrf.mxu1  ;;  %v3711_v40 = vld [vmem:[%s9486_s5 + $0x80] sm:$0xff]  ;;  %4882 = vmatpush3.msra.mxu0 %v4062_v57 }
 0x41e   : > { %v3719_v13 = vld [vmem:[%s9486_s5 + $0xc0] sm:$0xff]  ;;  %v4077_v27 = vld [vmem:[%s9487_s6 + $0xf0] sm:$0xff] }
 0x41f   : > { %v3666_v24 = vpop.f32.mrf.mxu1  ;;  %4883 = vmatprep.subr.mxu0 %v4077_v27 }
 0x420   : > { %v3667_v39 = vadd.f32 %v3666_v24, %v3516_v20  ;;  %v3647_v20 = vadd.f32 %v3646_v48, %v8823_v10  ;;  %v3627_v10 = vadd.f32 %v3626_v14, %v8515_v5  ;;  %v3713_v14 = vld [vmem:[%s9486_s5 + $0x90] sm:$0xff] }
 0x421   : > { %v3668_v15 = vpop.f32.mrf.mxu1  ;;  %v3721_v48 = vld [vmem:[%s9486_s5 + $0xd0] sm:$0xff] }
 0x422   : > { %v4061_v24 = vld [vmem:[%s9487_s6 + $0x70] sm:$0xff]  ;;  %v4076_v15 = vld [vmem:[%s9487_s6 + $0xe8] sm:$0xff] }
 0x423   : > { %v3671_v58 = vpop.f32.mrf.mxu1  ;;  %4884 = vmatpush3.msra.mxu0 %v4061_v24 }
 0x424   : > { %v3672_v55 = vadd.f32 %v3671_v58, %v3521_v0  ;;  %4885 = vmatprep.subr.mxu0 %v4076_v15  ;;  %v4060_v58 = vld [vmem:[%s9487_s6 + $0x68] sm:$0xff]  ;;  %v9105_v15 = vld [vmem:[%s9485_s4] ss:$0 sm:$0xff] }
 0x425   : > { %v3673_v49 = vpop.f32.mrf.mxu1  ;;  %4886 = vmatpush3.msra.mxu0 %v4060_v58 }
 0x426   : > { %v4075_v49 = vld [vmem:[%s9487_s6 + $0xe0] sm:$0xff] }
 0x427   : > { %v3676_v9 = vpop.f32.mrf.mxu1  ;;  %4887 = vmatprep.subr.mxu0 %v4075_v49 }
 0x428   : > { %v3677_v43 = vadd.f32 %v3676_v9, %v3526_v62  ;;  %v3700_v62 = vld [vmem:[%s9486_s5 + $0x28] sm:$0xff]  ;;  %v4059_v9 = vld [vmem:[%s9487_s6 + $0x60] sm:$0xff] }
 0x429   : > { %v3678_v29 = vpop.f32.mrf.mxu1  ;;  %4888 = vmatpush3.msra.mxu0 %v4059_v9  ;;  %v4136_v9 = vld [vmem:[%s9487_s6 + $0x2c8] sm:$0xff] }
 0x42a   : > { %v4074_v29 = vld [vmem:[%s9487_s6 + $0xd8] sm:$0xff] }
 0x42b   : > { %v3681_v17 = vpop.f32.mrf.mxu1  ;;  %4889 = vmatprep.subr.mxu0 %v4074_v29  ;;  %v4065_v29 = vld [vmem:[%s9487_s6 + $0x90] sm:$0xff] }
 0x42c   : > { %v3682_v44 = vadd.f32 %v3681_v17, %v3531_v56  ;;  %v3701_v56 = vld [vmem:[%s9486_s5 + $0x30] sm:$0xff]  ;;  %v4058_v17 = vld [vmem:[%s9487_s6 + $0x58] sm:$0xff] }
 0x42d   : > { %v3683_v46 = vpop.f32.mrf.mxu1  ;;  %4890 = vmatpush3.msra.mxu0 %v4058_v17  ;;  %v4120_v17 = vld [vmem:[%s9487_s6 + $0x248] sm:$0xff] }
 0x42e   : > { %v4073_v46 = vld [vmem:[%s9487_s6 + $0xd0] sm:$0xff] }
 0x42f   : > { %v3686_v21 = vpop.f32.mrf.mxu1  ;;  %4891 = vmatprep.subr.mxu0 %v4073_v46 }
 0x430   : > { %v3687_v3 = vadd.f32 %v3686_v21, %v3536_v33  ;;  %v3703_v33 = vld [vmem:[%s9486_s5 + $0x40] sm:$0xff]  ;;  %v4057_v21 = vld [vmem:[%s9487_s6 + $0x50] sm:$0xff] }
 0x431   : > { %v3688_v51 = vpop.f32.mrf.mxu1  ;;  %4892 = vmatpush3.msra.mxu0 %v4057_v21  ;;  %v4049_v21 = vld [vmem:[%s9487_s6 + $0x10] sm:$0xff] }
 0x432   : > { %3777 = vmatpush1.msra.mxu1 %v3687_v3  ;;  %v4072_v3 = vld [vmem:[%s9487_s6 + $0xc8] sm:$0xff] }
 0x433   : > { %3778 = vmatprep.subr.mxu1 %v9672_v19  ;;  %v4056_v51 = vld [vmem:[%s9487_s6 + $0x48] sm:$0xff]  ;;  %4893 = vmatprep.subr.mxu0 %v4072_v3  ;;  %v4135_v3 = vld [vmem:[%s9487_s6 + $0x2c0] sm:$0xff] }
 0x434   : > { %3779 = vmatpush1.msra.mxu1 %v3682_v44  ;;  %v4071_v44 = vld [vmem:[%s9487_s6 + $0xc0] sm:$0xff]  ;;  %4894 = vmatpush3.msra.mxu0 %v4056_v51  ;;  %v4064_v51 = vld [vmem:[%s9487_s6 + $0x88] sm:$0xff] }
 0x435   : > { %3780 = vmatprep.subr.mxu1 %v9672_v19  ;;  %4895 = vmatprep.subr.mxu0 %v4071_v44 }
 0x436   : > { %3781 = vmatpush1.msra.mxu1 %v3677_v43  ;;  %v4055_v43 = vld [vmem:[%s9487_s6 + $0x40] sm:$0xff] }
 0x437   : > { %3782 = vmatprep.subr.mxu1 %v9672_v19  ;;  %4896 = vmatpush3.msra.mxu0 %v4055_v43 }
 0x438   : > { %3783 = vmatpush1.msra.mxu1 %v3672_v55  ;;  %v4070_v55 = vld [vmem:[%s9487_s6 + $0xb8] sm:$0xff] }
 0x439   : > { %3784 = vmatprep.subr.mxu1 %v9672_v19  ;;  %4897 = vmatprep.subr.mxu0 %v4070_v55  ;;  %v4119_v55 = vld [vmem:[%s9487_s6 + $0x240] sm:$0xff] }
 0x43a   : > { %3785 = vmatpush1.msra.mxu1 %v3667_v39  ;;  %v4054_v39 = vld [vmem:[%s9487_s6 + $0x38] sm:$0xff] }
 0x43b   : > { %3786 = vmatprep.subr.mxu1 %v9672_v19  ;;  %4898 = vmatpush3.msra.mxu0 %v4054_v39 }
 0x43c   : > { %v3691_v52 = vpop.f32.mrf.mxu1  ;;  %3787 = vmatpush1.msra.mxu1 %v3662_v38  ;;  %v4142_v38 = vld [vmem:[%s9487_s6 + $0x2f8] sm:$0xff] }
 0x43d   : > { %3788 = vmatprep.subr.mxu1 %v9672_v19  ;;  %v3692_v5 = vadd.f32 %v3691_v52, %v8840_v2  ;;  %v3705_v2 = vld [vmem:[%s9486_s5 + $0x50] sm:$0xff] }
 0x43e   : > { %v3693_v0 = vpop.f32.mrf.mxu1  ;;  %3789 = vmatpush1.msra.mxu1 %v3657_v22  ;;  %v4126_v22 = vld [vmem:[%s9487_s6 + $0x278] sm:$0xff]  ;;  %v4141_v52 = vld [vmem:[%s9487_s6 + $0x2f0] sm:$0xff] }
 0x43f   : > { %3790 = vmatprep.subr.mxu1 %v9672_v19  ;;  %v4069_v0 = vld [vmem:[%s9487_s6 + $0xb0] sm:$0xff] }
 0x440   : > { %3791 = vmatpush1.msra.mxu1 %v3652_v4  ;;  %v4125_v4 = vld [vmem:[%s9487_s6 + $0x270] sm:$0xff]  ;;  %4899 = vmatprep.subr.mxu0 %v4069_v0 }
 0x441   : > { %3792 = vmatprep.subr.mxu1 %v9672_v19 }
 0x442   : > { %3793 = vmatpush1.msra.mxu1 %v3647_v20  ;;  %v4140_v20 = vld [vmem:[%s9487_s6 + $0x2e8] sm:$0xff] }
 0x443   : > { %3794 = vmatprep.subr.mxu1 %v9672_v19 }
 0x444   : > { %3795 = vmatpush1.msra.mxu1 %v3642_v6  ;;  %v4053_v6 = vld [vmem:[%s9487_s6 + $0x30] sm:$0xff] }
 0x445   : > { %3796 = vmatprep.subr.mxu1 %v9672_v19  ;;  %4900 = vmatpush3.msra.mxu0 %v4053_v6  ;;  %v4118_v6 = vld [vmem:[%s9487_s6 + $0x238] sm:$0xff] }
 0x446   : > { %3797 = vmatpush1.msra.mxu1 %v3637_v23  ;;  %v4124_v23 = vld [vmem:[%s9487_s6 + $0x268] sm:$0xff] }
 0x447   : > { %3798 = vmatprep.subr.mxu1 %v9672_v19 }
 0x448   : > { %3799 = vmatpush1.msra.mxu1 %v3632_v37  ;;  %v4068_v37 = vld [vmem:[%s9487_s6 + $0xa8] sm:$0xff] }
 0x449   : > { %3800 = vmatprep.subr.mxu1 %v9672_v19  ;;  %4901 = vmatprep.subr.mxu0 %v4068_v37  ;;  %v4133_v37 = vld [vmem:[%s9487_s6 + $0x2b0] sm:$0xff] }
 0x44a   : > { %3801 = vmatpush1.msra.mxu1 %v3627_v10  ;;  %v4139_v10 = vld [vmem:[%s9487_s6 + $0x2e0] sm:$0xff] }
 0x44b   : > { %3802 = vmatprep.subr.mxu1 %v9672_v19 }
 0x44c   : > { %3803 = vmatpush1.msra.mxu1 %v3622_v26  ;;  %v4052_v26 = vld [vmem:[%s9487_s6 + $0x28] sm:$0xff] }
 0x44d   : > { %3804 = vmatprep.subr.mxu1 %v9672_v19  ;;  %4902 = vmatpush3.msra.mxu0 %v4052_v26 }
 0x44e   : > { %3805 = vmatpush1.msra.mxu1 %v3617_v59  ;;  %v4123_v59 = vld [vmem:[%s9487_s6 + $0x260] sm:$0xff] }
 0x44f   : > { %3806 = vmatprep.subr.mxu1 %v9672_v19 }
 0x450   : > { %3807 = vmatpush1.msra.mxu1 %v3612_v42  ;;  %v4067_v42 = vld [vmem:[%s9487_s6 + $0xa0] sm:$0xff] }
 0x451   : > { %3838 = vmatprep.subr.mxu1 %v9672_v19  ;;  %4903 = vmatprep.subr.mxu0 %v4067_v42  ;;  %v4117_v42 = vld [vmem:[%s9487_s6 + $0x230] sm:$0xff] }
 0x452   : > { %3839 = vmatpush2.msra.mxu1 %v3692_v5  ;;  %v4138_v5 = vld [vmem:[%s9487_s6 + $0x2d8] sm:$0xff] }
 0x453   : > { %3841 = vmatmul.mubr.f32.vlgmr.msra.gmra.mxu1 %v3695_v11  ;;  %4951 = vmatprep.subr.mxu1 %v4142_v38  ;;  %v4051_v11 = vld [vmem:[%s9487_s6 + $0x20] sm:$0xff] }
 0x454   : > { %4755 = vmatprep.mubr.msk.f32.mxu1 %vm3727_vm7, %v3698_v36  ;;  %4952 = vmatpush3.msra.mxu1 %v4126_v22  ;;  %v4122_v36 = vld [vmem:[%s9487_s6 + $0x258] sm:$0xff]  ;;  %v4048_v22 = vld [vmem:[%s9487_s6 + $0x8] sm:$0xff] }
 0x455   : > { %4953 = vmatprep.subr.mxu1 %v4141_v52  ;;  %4904 = vmatpush3.msra.mxu0 %v4051_v11  ;;  %v4134_v52 = vld [vmem:[%s9487_s6 + $0x2b8] sm:$0xff] }
 0x456   : > { %4954 = vmatpush3.msra.mxu1 %v4125_v4  ;;  %v4063_v4 = vld [vmem:[%s9487_s6 + $0x80] sm:$0xff] }
 0x457   : > { %3846 = vmatmul.mubr.f32.gmra.mxu1 %v3697_v31  ;;  %4955 = vmatprep.subr.mxu1 %v4140_v20  ;;  %v4066_v31 = vld [vmem:[%s9487_s6 + $0x98] sm:$0xff] }
 0x458   : > { %4756 = vmatprep.mubr.msk.f32.mxu1 %vm3727_vm7, %v3700_v62  ;;  %4956 = vmatpush3.msra.mxu1 %v4124_v23  ;;  %v4137_v62 = vld [vmem:[%s9487_s6 + $0x2d0] sm:$0xff]  ;;  %v4047_v23 = vld [vmem:[%s9487_s6] sm:$0xff] }
 0x459   : > { %4957 = vmatprep.subr.mxu1 %v4139_v10  ;;  %4905 = vmatprep.subr.mxu0 %v4066_v31 }
 0x45a   : > { %4958 = vmatpush3.msra.mxu1 %v4123_v59  ;;  %v4110_v59 = vld [vmem:[%s9487_s6 + $0x1f8] sm:$0xff] }
 0x45b   : > { %3851 = vmatmul.mubr.f32.gmra.mxu1 %v3699_v45  ;;  %v4050_v45 = vld [vmem:[%s9487_s6 + $0x18] sm:$0xff]  ;;  %4959 = vmatprep.subr.mxu1 %v4138_v5 }
 0x45c   : > { %4757 = vmatprep.mubr.msk.f32.mxu1 %vm3727_vm7, %v3702_v47  ;;  %v4121_v47 = vld [vmem:[%s9487_s6 + $0x250] sm:$0xff]  ;;  %4960 = vmatpush3.msra.mxu1 %v4122_v36 }
 0x45d   : > { %4961 = vmatprep.subr.mxu1 %v4137_v62  ;;  %4906 = vmatpush3.msra.mxu0 %v4050_v45 }
 0x45e   : > { %4962 = vmatpush3.msra.mxu1 %v4121_v47  ;;  %4907 = vmatprep.subr.mxu0 %v4065_v29  ;;  %v4132_v47 = vld [vmem:[%s9487_s6 + $0x2a8] sm:$0xff] }
 0x45f   : > { %3856 = vmatmul.mubr.f32.gmra.mxu1 %v3701_v56  ;;  %4963 = vmatprep.subr.mxu1 %v4136_v9 }
 0x460   : > { %4758 = vmatprep.mubr.msk.f32.mxu1 %vm3727_vm7, %v3704_v35  ;;  %4964 = vmatpush3.msra.mxu1 %v4120_v17 }
 0x461   : > { %4908 = vmatpush3.msra.mxu0 %v4049_v21  ;;  %4965 = vmatprep.subr.mxu1 %v4135_v3  ;;  %v4127_v21 = vld [vmem:[%s9487_s6 + $0x280] sm:$0xff] }
 0x462   : > { %4909 = vmatprep.subr.mxu0 %v4064_v51  ;;  %4966 = vmatpush3.msra.mxu1 %v4119_v55  ;;  %v4111_v3 = vld [vmem:[%s9487_s6 + $0x200] sm:$0xff] }
 0x463   : > { %3861 = vmatmul.mubr.f32.gmra.mxu1 %v3703_v33  ;;  %4910 = vmatpush3.msra.mxu0 %v4048_v22 }
 0x464   : > { %4759 = vmatprep.mubr.msk.f32.mxu1 %vm3727_vm7, %v3706_v54  ;;  %4967 = vmatprep.subr.mxu1 %v4134_v52 }
 0x465   : > { %4911 = vmatprep.subr.mxu0 %v4063_v4  ;;  %4968 = vmatpush3.msra.mxu1 %v4118_v6 }
 0x466   : > { %4912 = vmatpush3.msra.mxu0 %v4047_v23  ;;  %4969 = vmatprep.subr.mxu1 %v4133_v37 }
 0x467   : > { %3866 = vmatmul.mubr.f32.gmra.mxu1 %v3705_v2  ;;  %4916 = vmatprep.subr.mxu0 %v4110_v59 }
 0x468   : > { %4760 = vmatprep.mubr.msk.f32.mxu1 %vm3727_vm7, %v3708_v1  ;;  %4970 = vmatpush3.msra.mxu1 %v4117_v42 }
 0x469   : > { %4971 = vmatprep.subr.mxu1 %v4132_v47 }
 0x46b   : > { %3871 = vmatmul.mubr.f32.gmra.mxu1 %v3707_v12 }
 0x46c   : > { %4761 = vmatprep.mubr.msk.f32.mxu1 %vm3727_vm7, %v3710_v41 }
 0x46f   : > { %3876 = vmatmul.mubr.f32.gmra.mxu1 %v3709_v28 }
 0x470   : > { %4762 = vmatprep.mubr.msk.f32.mxu1 %vm3727_vm7, %v3712_v25 }
 0x473   : > { %3881 = vmatmul.mubr.f32.gmra.mxu1 %v3711_v40 }
 0x474   : > { %4763 = vmatprep.mubr.msk.f32.mxu1 %vm3727_vm7, %v3714_v16 }
 0x477   : > { %3886 = vmatmul.mubr.f32.gmra.mxu1 %v3713_v14 }
 0x478   : > { %4764 = vmatprep.mubr.msk.f32.mxu1 %vm3727_vm7, %v3716_v34 }
 0x47b   : > { %3891 = vmatmul.mubr.f32.gmra.mxu1 %v3715_v8 }
 0x47c   : > { %4765 = vmatprep.mubr.msk.f32.mxu1 %vm3727_vm7, %v3718_v32 }
 0x47f   : > { %3896 = vmatmul.mubr.f32.gmra.mxu1 %v3717_v60 }
 0x480   : > { %4766 = vmatprep.mubr.msk.f32.mxu1 %vm3727_vm7, %v3720_v61 }
 0x483   : > { %3901 = vmatmul.mubr.f32.gmra.mxu1 %v3719_v13 }
 0x484   : > { %4767 = vmatprep.mubr.msk.f32.mxu1 %vm3727_vm7, %v3722_v63 }
 0x487   : > { %3906 = vmatmul.mubr.f32.gmra.mxu1 %v3721_v48 }
 0x488   : > { %4768 = vmatprep.mubr.msk.f32.mxu1 %vm3727_vm7, %v3724_v53 }
 0x48b   : > { %3911 = vmatmul.mubr.f32.gmra.mxu1 %v3723_v7 }
 0x48c   : > { %4769 = vmatprep.mubr.msk.f32.mxu1 %vm3727_vm7, %v3726_v50 }
 0x48f   : > { %3916 = vmatmul.mubr.f32.gmra.mxu1 %v3725_v18 }
 0x513   : > { %v3842_v56 = vpop.f32.mrf.mxu1 }
 0x515   : > { %v3844_v35 = vpop.f32.mrf.mxu1 }
 0x517   : > { %v3847_v33 = vpop.f32.mrf.mxu1 }
 0x519   : > { %v3849_v54 = vpop.f32.mrf.mxu1 }
 0x51a   : > { %v4116_v54 = vld [vmem:[%s9487_s6 + $0x228] sm:$0xff] }
 0x51b   : > { %v3852_v2 = vpop.f32.mrf.mxu1  ;;  %4972 = vmatpush3.msra.mxu1 %v4116_v54  ;;  %v4109_v54 = vld [vmem:[%s9487_s6 + $0x1f0] sm:$0xff] }
 0x51d   : > { %v3854_v1 = vpop.f32.mrf.mxu1 }
 0x51f   : > { %v3857_v12 = vpop.f32.mrf.mxu1 }
 0x521   : > { %v3859_v41 = vpop.f32.mrf.mxu1 }
 0x523   : > { %v3862_v28 = vpop.f32.mrf.mxu1 }
 0x524   : > { %v3921_v18 = vmax.f32 %v3842_v56, %v3862_v28  ;;  %v4131_v28 = vld [vmem:[%s9487_s6 + $0x2a0] sm:$0xff] }
 0x525   : > { %v3864_v25 = vpop.f32.mrf.mxu1  ;;  %4973 = vmatprep.subr.mxu1 %v4131_v28 }
 0x527   : > { %v3867_v40 = vpop.f32.mrf.mxu1 }
 0x528   : > { %v3922_v58 = vmax.f32 %v3847_v33, %v3867_v40 }
 0x529   : > { %v3869_v16 = vpop.f32.mrf.mxu1 }
 0x52b   : > { %v3872_v14 = vpop.f32.mrf.mxu1 }
 0x52c   : > { %v3923_v39 = vmax.f32 %v3852_v2, %v3872_v14  ;;  %v4115_v14 = vld [vmem:[%s9487_s6 + $0x220] sm:$0xff] }
 0x52d   : > { %v3874_v34 = vpop.f32.mrf.mxu1  ;;  %4974 = vmatpush3.msra.mxu1 %v4115_v14 }
 0x52f   : > { %v3877_v8 = vpop.f32.mrf.mxu1 }
 0x530   : > { %v3924_v32 = vmax.f32 %v3857_v12, %v3877_v8 }
 0x531   : > { %v3879_v60 = vpop.f32.mrf.mxu1 }
 0x533   : > { %v3882_v61 = vpop.f32.mrf.mxu1 }
 0x534   : > { %v3925_v27 = vmax.f32 %v3921_v18, %v3882_v61  ;;  %v4129_v18 = vld [vmem:[%s9487_s6 + $0x290] sm:$0xff] }
 0x535   : > { %v3884_v13 = vpop.f32.mrf.mxu1 }
 0x537   : > { %v3887_v63 = vpop.f32.mrf.mxu1 }
 0x538   : > { %v3926_v44 = vmax.f32 %v3922_v58, %v3887_v63  ;;  %v4130_v63 = vld [vmem:[%s9487_s6 + $0x298] sm:$0xff] }
 0x539   : > { %v3889_v48 = vpop.f32.mrf.mxu1  ;;  %4975 = vmatprep.subr.mxu1 %v4130_v63 }
 0x53b   : > { %v3892_v53 = vpop.f32.mrf.mxu1 }
 0x53c   : > { %v3927_v10 = vmax.f32 %v3923_v39, %v3892_v53 }
 0x53d   : > { %v3894_v7 = vpop.f32.mrf.mxu1 }
 0x53f   : > { %v3897_v50 = vpop.f32.mrf.mxu1 }
 0x540   : > { %v9100_v30 = vmax.f32 %v3924_v32, %v3897_v50  ;;  %v4114_v50 = vld [vmem:[%s9487_s6 + $0x218] sm:$0xff] }
 0x541   : > { %v3899_v57 = vpop.f32.mrf.mxu1  ;;  %4976 = vmatpush3.msra.mxu1 %v4114_v50 }
 0x542   : > { %4977 = vmatprep.subr.mxu1 %v4129_v18  ;;  %v4090_v18 = vld [vmem:[%s9487_s6 + $0x158] sm:$0xff] }
 0x543   : > { %v3902_v24 = vpop.f32.mrf.mxu1 }
 0x544   : > { %v3929_v49 = vmax.f32 %v3925_v27, %v3902_v24  ;;  %v4113_v27 = vld [vmem:[%s9487_s6 + $0x210] sm:$0xff] }
 0x545   : > { %v3904_v46 = vpop.f32.mrf.mxu1  ;;  %4978 = vmatpush3.msra.mxu1 %v4113_v27 }
 0x546   : > { %v3940_v43 = vadd.f32 %v9105_v15, %v3929_v49  ;;  %v4112_v46 = vld [vmem:[%s9487_s6 + $0x208] sm:$0xff] }
 0x547   : > { %v3907_v38 = vpop.f32.mrf.mxu1 }
 0x548   : > { %v9138_v0 = vmax.f32 %v3940_v43, 0.0  ;;  %v3930_v20 = vmax.f32 %v3926_v44, %v3907_v38 }
 0x549   : > { %v3909_v26 = vpop.f32.mrf.mxu1 }
 0x54a   : > { %v3941_v5 = vadd.f32 %v9105_v15, %v3930_v20  ;;  %v3953_v11 = vrot.slane %v9138_v0, 2  ;;  %v3967_v36 = vrot.slane %v9138_v0, 6  ;;  %v3949_v31 = vrot.slane %v9138_v0, 1 }
 0x54b   : > { %v3912_v62 = vpop.f32.mrf.mxu1  ;;  %v3963_v45 = vrot.slane %v9138_v0, 5  ;;  %v3957_v12 = vrot.slane %v9138_v0, 3  ;;  %v3971_v41 = vrot.slane %v9138_v0, 7  ;;  %v3961_v20 = vrot.slane %v9138_v0, 4 }
 0x54c   : > { %v9163_v56 = vmax.f32 %v3941_v5, 0.0  ;;  %v3931_v35 = vmax.f32 %v3927_v10, %v3912_v62  ;;  %v6107_v33 = vpack.i.bf16 %v3953_v11, %v3967_v36 }
 0x54d   : > { %v3914_v2 = vpop.f32.mrf.mxu1  ;;  %v6102_v1 = vpack.i.bf16 %v3949_v31, %v3963_v45  ;;  %v6112_v48 = vpack.i.bf16 %v3957_v12, %v3971_v41  ;;  %v4093_v12 = vld [vmem:[%s9487_s6 + $0x170] sm:$0xff]  ;;  %v4108_v41 = vld [vmem:[%s9487_s6 + $0x1e8] sm:$0xff] }
 0x54e   : > { %v3942_v25 = vadd.f32 %v9105_v15, %v3931_v35  ;;  %6108 = vrot.lane.b32.xlu0 %v6107_v33, %s9688_s30  ;;  %v3976_v40 = vrot.slane %v9163_v56, 1  ;;  %v3990_v16 = vrot.slane %v9163_v56, 5  ;;  %v3984_v8 = vrot.slane %v9163_v56, 3 }
 0x54f   : > { %6103 = vrot.lane.b32.xlu1 %v6102_v1, %s9679_s16  ;;  %v3917_v34 = vpop.f32.mrf.mxu1  ;;  %v3998_v13 = vrot.slane %v9163_v56, 7  ;;  %v3980_v53 = vrot.slane %v9163_v56, 2  ;;  %v3994_v7 = vrot.slane %v9163_v56, 6  ;;  %v3988_v2 = vrot.slane %v9163_v56, 4 }
 0x550   : > { %v9182_v32 = vmax.f32 %v3942_v25, 0.0  ;;  %v3932_v60 = vmax.f32 %v9100_v30, %v3917_v34  ;;  %v6117_v61 = vpack.i.bf16 %v3976_v40, %v3990_v16  ;;  %v4092_v40 = vld [vmem:[%s9487_s6 + $0x168] sm:$0xff] }
 0x551   : > { %v3919_v30 = vpop.f32.mrf.mxu1  ;;  %v6127_v24 = vpack.i.bf16 %v3984_v8, %v3998_v13  ;;  %v6122_v9 = vpack.i.bf16 %v3980_v53, %v3994_v7  ;;  %v4107_v8 = vld [vmem:[%s9487_s6 + $0x1e0] sm:$0xff]  ;;  %v4106_v7 = vld [vmem:[%s9487_s6 + $0x1d8] sm:$0xff] }
 0x552   : > { %v9198_v57 = vadd.f32 %v9105_v15, %v3932_v60  ;;  %6118 = vrot.lane.b32.xlu0 %v6117_v61, %s9679_s16  ;;  %v4019_v58 = vrot.slane %v9182_v32, 2  ;;  %v4033_v49 = vrot.slane %v9182_v32, 6  ;;  %v4128_v15 = vld [vmem:[%s9487_s6 + $0x288] sm:$0xff]  ;;  %v4015_v29 = vrot.slane %v9182_v32, 1  ;;  %v4091_v13 = vld [vmem:[%s9487_s6 + $0x160] sm:$0xff] }
 0x553   : > { %6113 = vrot.lane.b32.xlu1 %v6112_v48, %s9642_s13  ;;  %v4029_v17 = vrot.slane %v9182_v32, 5  ;;  %4979 = vmatprep.subr.mxu1 %v4128_v15  ;;  %v4023_v43 = vrot.slane %v9182_v32, 3  ;;  %v4037_v55 = vrot.slane %v9182_v32, 7  ;;  %v4027_v63 = vrot.slane %v9182_v32, 4 }
 0x554   : > { %4980 = vmatpush3.msra.mxu1 %v4112_v46  ;;  %v6137_v51 = vpack.i.bf16 %v4019_v58, %v4033_v49 }
 0x555   : > { %4981 = vmatprep.subr.mxu1 %v4127_v21  ;;  %v6132_v44 = vpack.i.bf16 %v4015_v29, %v4029_v17  ;;  %v6142_v39 = vpack.i.bf16 %v4023_v43, %v4037_v55  ;;  %v4088_v21 = vld [vmem:[%s9487_s6 + $0x148] sm:$0xff]  ;;  %v4086_v43 = vld [vmem:[%s9487_s6 + $0x138] sm:$0xff]  ;;  %v4101_v55 = vld [vmem:[%s9487_s6 + $0x1b0] sm:$0xff] }
 0x556   : > { %6128 = vrot.lane.b32.xlu0 %v6127_v24, %s9642_s13  ;;  %4982 = vmatpush3.msra.mxu1 %v4111_v3  ;;  %v4105_v24 = vld [vmem:[%s9487_s6 + $0x1d0] sm:$0xff]  ;;  %v4103_v3 = vld [vmem:[%s9487_s6 + $0x1c0] sm:$0xff] }
 0x557   : > { %6123 = vrot.lane.b32.xlu1 %v6122_v9, %s9688_s30  ;;  %v4104_v9 = vld [vmem:[%s9487_s6 + $0x1c8] sm:$0xff] }
 0x55a   : > { %6138 = vrot.lane.b32.xlu0 %v6137_v51, %s9688_s30  ;;  %v4087_v51 = vld [vmem:[%s9487_s6 + $0x140] sm:$0xff]  ;;  %s4533_s30 = scalar_lea.hbm %s9491_s10, %s9563_s1 }
 0x55b   : > { %6133 = vrot.lane.b32.xlu1 %v6132_v44, %s9679_s16  ;;  %v4102_v44 = vld [vmem:[%s9487_s6 + $0x1b8] sm:$0xff] }
 0x55f   : > { %6143 = vrot.lane.b32.xlu1 %v6142_v39, %s9642_s13  ;;  %v4085_v39 = vld [vmem:[%s9487_s6 + $0x130] sm:$0xff] }
 0x5c0   : > { %v6109_v38 = vpop.permute.xlu0 %6108 }
 0x5c1   : > { %v6104_v22 = vpop.permute.xlu1 %6103  ;;  %v6111_v6 = vunpack.i.h.bf16 %v6109_v38  ;;  %v6110_v23 = vunpack.i.l.bf16 %v6109_v38  ;;  %v4100_v38 = vld [vmem:[%s9487_s6 + $0x1a8] sm:$0xff] }
 0x5c2   : > { %v6106_v52 = vunpack.i.h.bf16 %v6104_v22  ;;  %v6105_v4 = vunpack.i.l.bf16 %v6104_v22  ;;  %v4084_v22 = vld [vmem:[%s9487_s6 + $0x128] sm:$0xff] }
 0x5c4   : > { %v4002_v37 = vsel %vm498_vm0, %v9138_v0, %v6106_v52  ;;  %v9231_v10 = vpop.permute.xlu0 %6118  ;;  %v4005_v26 = vsel %vm498_vm0, %v3961_v20, %v6105_v4  ;;  %v4094_v0 = vld [vmem:[%s9487_s6 + $0x178] sm:$0xff]  ;;  %v4099_v52 = vld [vmem:[%s9487_s6 + $0x1a0] sm:$0xff] }
 0x5c5   : > { %v6114_v59 = vpop.permute.xlu1 %6113  ;;  %v6120_v11 = vunpack.i.l.bf16 %v9231_v10  ;;  %v4006_v36 = vsel %vm2617_vm3, %v4005_v26, %v6110_v23  ;;  %v4003_v31 = vsel %vm2617_vm3, %v4002_v37, %v6111_v6  ;;  %v4083_v4 = vld [vmem:[%s9487_s6 + $0x120] sm:$0xff]  ;;  %v4098_v20 = vld [vmem:[%s9487_s6 + $0x198] sm:$0xff]  ;;  %v6121_v23 = vunpack.i.h.bf16 %v9231_v10  ;;  %v4097_v37 = vld [vmem:[%s9487_s6 + $0x190] sm:$0xff] }
 0x5c6   : > { %v6116_v42 = vunpack.i.h.bf16 %v6114_v59  ;;  %v6115_v5 = vunpack.i.l.bf16 %v6114_v59  ;;  %v4082_v6 = vld [vmem:[%s9487_s6 + $0x118] sm:$0xff]  ;;  %v4081_v59 = vld [vmem:[%s9487_s6 + $0x110] sm:$0xff]  ;;  %v4080_v10 = vld [vmem:[%s9487_s6 + $0x108] sm:$0xff] }
 0x5c7   : > { %v4011_v28 = vsel %vm498_vm0, %v3988_v2, %v6120_v11  ;;  %v4439_v2 = vld [vmem:[%s9489_s8 + $0x28] sm:$0xff] }
 0x5c8   : > { %v4007_v62 = vsel %vm2653_vm5, %v4006_v36, %v6115_v5  ;;  %v9238_v45 = vpop.permute.xlu0 %6128  ;;  %v4004_v47 = vsel %vm2653_vm5, %v4003_v31, %v6116_v42  ;;  %v4096_v42 = vld [vmem:[%s9487_s6 + $0x188] sm:$0xff]  ;;  %v4008_v5 = vsel %vm498_vm0, %v9163_v56, %v6121_v23  ;;  %v4095_v36 = vld [vmem:[%s9487_s6 + $0x180] sm:$0xff]  ;;  %v4146_v56 = vld [vmem:[%s9487_s6 + $0x318] sm:$0xff] }
 0x5c9   : > { %4215 = vmatprep.mubr.f32.mxu0 %v4007_v62  ;;  %v9244_v35 = vpop.permute.xlu1 %6123  ;;  %v6130_v33 = vunpack.i.l.bf16 %v9238_v45  ;;  %v6131_v11 = vunpack.i.h.bf16 %v9238_v45  ;;  %v4079_v31 = vld [vmem:[%s9487_s6 + $0x100] sm:$0xff] }
 0x5ca   : > { %v6125_v1 = vunpack.i.l.bf16 %v9244_v35  ;;  %4216 = vmatmul.mubr.f32.vlgmr.msra.gmra.mxu0 %v4004_v47  ;;  %v6126_v26 = vunpack.i.h.bf16 %v9244_v35  ;;  %v4145_v47 = vld [vmem:[%s9487_s6 + $0x310] sm:$0xff]  ;;  %v4143_v35 = vld [vmem:[%s9487_s6 + $0x300] sm:$0xff] }
 0x5cb   : > { %4917 = vmatpush3.msra.mxu0 %v4094_v0  ;;  %v4144_v0 = vld [vmem:[%s9487_s6 + $0x308] sm:$0xff] }
 0x5cc   : > { %4918 = vmatprep.subr.mxu0 %v4109_v54  ;;  %v6139_v25 = vpop.permute.xlu0 %6138  ;;  %v4012_v16 = vsel %vm2617_vm3, %v4011_v28, %v6125_v1  ;;  %v4009_v62 = vsel %vm2617_vm3, %v4008_v5, %v6126_v26  ;;  %v4441_v54 = vld [vmem:[%s9489_s8 + $0x38] sm:$0xff]  ;;  %v4438_v1 = vld [vmem:[%s9489_s8 + $0x20] sm:$0xff]  ;;  %v4435_v28 = vld [vmem:[%s9489_s8 + $0x8] sm:$0xff] }
 0x5cd   : > { %4919 = vmatpush3.msra.mxu0 %v4093_v12  ;;  %v6134_v14 = vpop.permute.xlu1 %6133  ;;  %v4013_v34 = vsel %vm2653_vm5, %v4012_v16, %v6130_v33  ;;  %v6141_v48 = vunpack.i.h.bf16 %v6139_v25  ;;  %v6140_v53 = vunpack.i.l.bf16 %v6139_v25  ;;  %v4010_v45 = vsel %vm2653_vm5, %v4009_v62, %v6131_v11  ;;  %v4437_v12 = vld [vmem:[%s9489_s8 + $0x18] sm:$0xff]  ;;  %v4434_v25 = vld [vmem:[%s9489_s8] sm:$0xff] }
 0x5ce   : > { %4920 = vmatprep.subr.mxu0 %v4108_v41  ;;  %v6136_v60 = vunpack.i.h.bf16 %v6134_v14  ;;  %v6135_v61 = vunpack.i.l.bf16 %v6134_v14  ;;  %4285 = vmatprep.mubr.f32.mxu0 %v4013_v34  ;;  %v3947_v33 = vmax.f32 %v9198_v57, 0.0  ;;  %v4440_v57 = vld [vmem:[%s9489_s8 + $0x30] sm:$0xff] }
 0x5cf   : > { %4921 = vmatpush3.msra.mxu0 %v4092_v40  ;;  %v4436_v41 = vld [vmem:[%s9489_s8 + $0x10] sm:$0xff] }
 0x5d0   : > { %v4041_v50 = vsel %vm498_vm0, %v9182_v32, %v6136_v60  ;;  %4922 = vmatprep.subr.mxu0 %v4107_v8  ;;  %v4044_v30 = vsel %vm498_vm0, %v4027_v63, %v6135_v61  ;;  %v4089_v32 = vld [vmem:[%s9487_s6 + $0x150] sm:$0xff]  ;;  %v4147_v8 = vld [vmem:[%s9488_s7] sm:$0x1] }
 0x5d1   : > { %4923 = vmatpush3.msra.mxu0 %v4091_v13  ;;  %v6144_v27 = vpop.permute.xlu1 %6143  ;;  %v4042_v15 = vsel %vm2617_vm3, %v4041_v50, %v6141_v48  ;;  %v4045_v29 = vsel %vm2617_vm3, %v4044_v30, %v6140_v53 }
 0x5d2   : > { %4924 = vmatprep.subr.mxu0 %v4106_v7  ;;  %v6146_v58 = vunpack.i.h.bf16 %v6144_v27  ;;  %v6145_v49 = vunpack.i.l.bf16 %v6144_v27 }
 0x5d3   : > { %4925 = vmatpush3.msra.mxu0 %v4090_v18 }
 0x5d4   : > { %v4043_v17 = vsel %vm2653_vm5, %v4042_v15, %v6146_v58  ;;  %4926 = vmatprep.subr.mxu0 %v4105_v24  ;;  %v4046_v46 = vsel %vm2653_vm5, %v4045_v29, %v6145_v49 }
 0x5d5   : > { %4927 = vmatpush3.msra.mxu0 %v4089_v32  ;;  %4355 = vmatprep.mubr.f32.mxu1 %v4046_v46 }
 0x5d6   : > { %4928 = vmatprep.subr.mxu0 %v4104_v9  ;;  %4356 = vmatmul.mubr.f32.vlgmr.msra.gmra.mxu1 %v4043_v17 }
 0x5d7   : > { %4929 = vmatpush3.msra.mxu0 %v4088_v21 }
 0x5d8   : > { %4930 = vmatprep.subr.mxu0 %v4103_v3 }
 0x5d9   : > { %4931 = vmatpush3.msra.mxu0 %v4087_v51 }
 0x5da   : > { %4932 = vmatprep.subr.mxu0 %v4102_v44 }
 0x5db   : > { %4933 = vmatpush3.msra.mxu0 %v4086_v43 }
 0x5dc   : > { %4934 = vmatprep.subr.mxu0 %v4101_v55 }
 0x5dd   : > { %4935 = vmatpush3.msra.mxu0 %v4085_v39 }
 0x5de   : > { %4936 = vmatprep.subr.mxu0 %v4100_v38 }
 0x5df   : > { %4937 = vmatpush3.msra.mxu0 %v4084_v22 }
 0x5e0   : > { %4938 = vmatprep.subr.mxu0 %v4099_v52 }
 0x5e1   : > { %4939 = vmatpush3.msra.mxu0 %v4083_v4 }
 0x5e2   : > { %4940 = vmatprep.subr.mxu0 %v4098_v20 }
 0x5e3   : > { %4941 = vmatpush3.msra.mxu0 %v4082_v6 }
 0x5e4   : > { %4942 = vmatprep.subr.mxu0 %v4097_v37 }
 0x5e5   : > { %4943 = vmatpush3.msra.mxu0 %v4081_v59 }
 0x5e6   : > { %4944 = vmatprep.subr.mxu0 %v4096_v42 }
 0x5e7   : > { %4945 = vmatpush3.msra.mxu0 %v4080_v10 }
 0x5e8   : > { %4946 = vmatprep.subr.mxu0 %v4095_v36 }
 0x5e9   : > { %4947 = vmatpush3.msra.mxu0 %v4079_v31 }
 0x5ea   : > { %4286 = vmatmul.mubr.f32.vlgmr.msra.gmra.mxu0 %v4010_v45  ;;  %5158 = vmatprep.subr.mxu0 %v9672_v19 }
 0x5eb   : > { %5159 = vmatpush3.msra.mxu0 %v4146_v56  ;;  %5166 = vmatprep.mubr.msk.f32.mxu0 %vm6292_vm8, %v9672_v19 }
 0x5ec   : > { %5160 = vmatprep.subr.mxu0 %v9672_v19 }
 0x5ed   : > { %5161 = vmatpush3.msra.mxu0 %v4145_v47 }
 0x5ee   : > { %5162 = vmatprep.subr.mxu0 %v9672_v19 }
 0x5ef   : > { %5163 = vmatpush3.msra.mxu0 %v4144_v0 }
 0x5f0   : > { %5164 = vmatprep.subr.mxu0 %v9672_v19 }
 0x5f1   : > { %5165 = vmatpush3.msra.mxu0 %v4143_v35 }
 0x5f2   : > { %5167 = vmatmul.mubr.msk.f32.vlgmr.msra.gmra.mxu0 %vm498_vm0, %v3947_v33  ;;  %5169 = vmatprep.subr.mxu0 %v9672_v19 }
 0x5f3   : > { %5185 = vmatprep.mubr.msk.f32.mxu0 %vm6292_vm8, %v9672_v19  ;;  %5170 = vmatpush3.msra.mxu0 %v4441_v54 }
 0x5f4   : > { %5171 = vmatprep.subr.mxu0 %v9672_v19 }
 0x5f5   : > { %5172 = vmatpush3.msra.mxu0 %v4440_v57 }
 0x5f6   : > { %5173 = vmatprep.subr.mxu0 %v9672_v19 }
 0x5f7   : > { %5174 = vmatpush3.msra.mxu0 %v4439_v2 }
 0x5f8   : > { %5175 = vmatprep.subr.mxu0 %v9672_v19 }
 0x5f9   : > { %5176 = vmatpush3.msra.mxu0 %v4438_v1 }
 0x5fa   : > { %5177 = vmatprep.subr.mxu0 %v9672_v19 }
 0x5fb   : > { %5178 = vmatpush3.msra.mxu0 %v4437_v12 }
 0x5fc   : > { %5179 = vmatprep.subr.mxu0 %v9672_v19 }
 0x5fd   : > { %5180 = vmatpush3.msra.mxu0 %v4436_v41 }
 0x5fe   : > { %5181 = vmatprep.subr.mxu0 %v9672_v19 }
 0x5ff   : > { %5182 = vmatpush3.msra.mxu0 %v4435_v28 }
 0x600   : > { %5183 = vmatprep.subr.mxu0 %v9672_v19 }
 0x601   : > { %5184 = vmatpush3.msra.mxu0 %v4434_v25 }
 0x68a   : > { %v4913_v40 = vpop.f32.mrf.mxu0 }
 0x68c   : > { %v4914_v16 = vpop.f32.mrf.mxu0 }
 0x68d   : > { %v4915_v34 = vadd.f32 %v4914_v16, %v4913_v40 }
 0x68f   : > { %v4218_v63 = vadd.f32 %v4915_v34, %v4147_v8 }
 0x696   : > { %v4983_v14 = vpop.f32.mrf.mxu1 }
 0x698   : > { %v4984_v61 = vpop.f32.mrf.mxu1 }
 0x699   : > { %v4985_v53 = vadd.f32 %v4984_v61, %v4983_v14 }
 0x6aa   : > { %v4948_v60 = vpop.f32.mrf.mxu0 }
 0x6ac   : > { %v4949_v13 = vpop.f32.mrf.mxu0 }
 0x6ad   : > { %v4950_v48 = vadd.f32 %v4949_v13, %v4948_v60 }
 0x6af   : > { %v4288_v7 = vadd.f32 %v4950_v48, %v4218_v63 }
 0x6b1   : > { %v4358_v50 = vadd.f32 %v4985_v53, %v4288_v7 }
 0x6b2   : > { %v4427_v19 = vpop.f32.mrf.mxu0 }
 0x6b3   : > { %v4428_v18 = vadd.f32 %v4427_v19, %v4358_v50 }
 0x6b4   : > { %v5168_v30 = vpop.f32.mrf.mxu0 }
 0x6b5   : > { %v4431_v27 = vmax.f32 %v4428_v18, 0.0 }
 0x6b7   : > { %5186 = vmatmul.mubr.msk.f32.vlgmr.msra.gmra.mxu0 %vm2617_vm3, %v4431_v27  ;;  %4433 = vst.msk [vmem:[%s382_s0] sm:$0x1] %vm4432_vm9, %v4431_v27 }
 0x6b8   : > { %6205 = shalt.err (!%p6202_p3)
}
 0x6b9   : > { %s6206_s14 = scalar_lea.hbm %s4533_s30, 16  ;;  %s6210_s16 = scalar_lea.hbm %s9491_s10, 32 }
 0x6ba   : > { %p6207_p4 = scmp.ne.s32.totalorder %s4533_s30, %s6206_s14  ;;  %p6211_p9 = scmp.lt.s32.totalorder %s4533_s30, %s9491_s10 }
 0x6bb   : > { %p6212_p10 = scmp.lt.s32.totalorder %s6210_s16, %s6206_s14 }
 0x6bc   : > { %p6208_p7 = pnand %p6207_p4, %p6393_p5 }
 0x6bd   : > { %p6213_p11 = por %p6212_p10, %p6211_p9 }
 0x6be   : > { %p6209_p8 = pneg %p6208_p7 }
 0x6c0   : > { %p6214_p12 = pnand %p6213_p11, %p6209_p8 }
 0x6c2   : > { %6217 = shalt.err (!%p6214_p12)
}
 0x6c3   : > { %5189 = dma.vmem_to_hbm [thread:$0]  (%p6393_p5), %s4536_s2, 16, %s4533_s30, %s4519_s15   ;;  %v4442_v24 = vld [vmem:[%s9490_s9] sm:$0x1]  ;;  %vm4516_vm10 = vcmask 57344  }
 0x6c4   : > { %s388_s24 = scalar_lea.vmem [#allocation5], %s9413_s25  ;;  %s9734_s3 = sshll.u32 %s6376_s21, 4 }
 0x6c5   : > { %s4548_s29 = sshll.u32 %s388_s24, 4  ;;  %s9445_s0 = scalar_lea.hbm %s9492_s11, %s9734_s3  ;;  %s4549_s29 = int_to_ptr.vmem [resolvable:$true] %s4548_s29 }
 0x6c6   : > { %s4523_s13 = scalar_lea.sflag [#allocation6], %s9413_s25  ;;  %s6218_s30 = scalar_lea.vmem %s4549_s29, 16 }
 0x6c7   : > { %p6219_p13 = scmp.ne.s32.totalorder %s4549_s29, %s6218_s30  ;;  %s6294_s2 = smov [#allocation5]  }
 0x6c8   : > { %s6222_s15 = sshll.u32 %s6294_s2, 4  ;;  %s6223_s15 = int_to_ptr.vmem [resolvable:$false] %s6222_s15 }
 0x6c9   : > { %p6220_p0 = pnand %p6219_p13, %p6393_p5  ;;  %s6224_s16 = scalar_lea.vmem %s6223_s15, 32 }
 0x6ca   : > { %p6225_p2 = scmp.lt.s32.totalorder %s4549_s29, %s6223_s15  ;;  %p6226_p3 = scmp.lt.s32.totalorder %s6224_s16, %s6218_s30 }
 0x6cb   : > { %p6221_p1 = pneg %p6220_p0 }
 0x6cc   : > { %p6227_p4 = por %p6226_p3, %p6225_p2 }
 0x6ce   : > { %p6228_p7 = pnand %p6227_p4, %p6221_p1 }
 0x777   : > { %v4512_v58 = vpop.f32.mrf.mxu0 }
 0x778   : > { %v4513_v49 = vadd.f32 %v4512_v58, %v4442_v24 }
 0x779   : > { %v5187_v32 = vpop.f32.mrf.mxu0 }
 0x77a   : > { %4517 = vst.msk [vmem:[%s388_s24] sm:$0x1] %vm4516_vm10, %v4513_v49 }
 0x77b   : > { %6231 = shalt.err (!%p6228_p7)
}
 0x77c   : > { %s6232_s21 = scalar_lea.hbm %s9445_s0, 16  ;;  %s6236_s22 = scalar_lea.hbm %s9492_s11, 32 }
 0x77d   : > { %p6233_p8 = scmp.ne.s32.totalorder %s9445_s0, %s6232_s21  ;;  %p6237_p11 = scmp.lt.s32.totalorder %s9445_s0, %s9492_s11 }
 0x77e   : > { %p6238_p12 = scmp.lt.s32.totalorder %s6236_s22, %s6232_s21 }
 0x77f   : > { %p6234_p9 = pnand %p6233_p8, %p6393_p5 }
 0x780   : > { %p6239_p13 = por %p6238_p12, %p6237_p11 }
 0x781   : > { %p6235_p10 = pneg %p6234_p9 }
 0x783   : > { %p6240_p0 = pnand %p6239_p13, %p6235_p10 }
 0x785   : > { %6243 = shalt.err (!%p6240_p0)
}
 0x786   : > { %5190 = dma.vmem_to_hbm [thread:$0]  (%p6393_p5), %s4549_s29, 16, %s9445_s0, %s4523_s13  }
 0x787 PF: > { %p5200_p1 = scmp.ge.s32.totalorder %s6282_s20, 2  ;;  %s4560_s1 = sand.u32 1, %s6270_s17  }
 0x788   : > { %s4561_s14 = scalar_lea.sflag [#allocation4], %s4560_s1 }
 0x789   : > { %p5194_p2 = pnand %p5200_p1, %p6397_p6 }
 0x78b   : > { %p5195_p3 = pneg %p5194_p2 }
 0x78d   : > { %6261 = dma.done.wait (%p5195_p3), %s4561_s14, 16  }
 0x78e   : > { %6263 = vsyncadd (%p5195_p3), %s4561_s14, 4294967280  ;;  %s4569_s30 = scalar_lea.sflag [#allocation6], %s4560_s1 }
 0x78f   : > { %6265 = dma.done.wait (%p5195_p3), %s4569_s30, 16  }
 0x790   : > { %6267 = vsyncadd (%p5195_p3), %s4569_s30, 4294967280  ;;  %p25_p5 = scmp.ge.s32.totalorder %s6380_s23, 4   ;;  %s9735_s17 = smov %s6274_s18 }
 0x791   : > { %s9736_s18 = smov %s6278_s19  ;;  %s9737_s19 = smov %s6391_s26 }
 0x792   : > { %s9738_s20 = smov %s6380_s23  ;;  %27 = sbr.rel (!%p25_p5) target bundleno = 10 (0xa), region = 112 }
 0x797   :  { %4573 = vsyncpa [#allocation4], 1 }
 0x798   :  { %4575 = vsyncpa [#allocation4 + $0x1], 1 }
 0x799   :  { %4576 = vsyncpa [#allocation6], 1 }
 0x79a   :  { %4578 = vsyncpa [#allocation6 + $0x1], 1 }

</bundles_post_ra>
